<compile_context>
chip_gen: v7x
topology: tpu7x:2x2x1
jax: 0.10.0
libtpu: 0.0.40
codegen_flags: <defaults>
</compile_context>

<pallas_src>
import jax
import jax.numpy as jnp
from jax import lax
from jax.experimental import pallas as pl
from jax.experimental.pallas import tpu as pltpu


# ----------------------------- helpers -----------------------------

def _round_up(v, m):
    return ((v + m - 1) // m) * m


def _allowed_taps(k):
    """Taps kept by MaskedConv2d(mask_type='B') for an odd k x k kernel.

    mask[:, :, :U, :] = 1 ; mask[:, :, U, :V+1] = 1  with U = V = k // 2.
    """
    U = V = k // 2
    return [(dy, dx) for dy in range(k) for dx in range(k)
            if (dy < U) or (dy == U and dx <= V)]


def _concat_weights_T(w):
    """OIHW (C, C, k, k) -> (C_out, T*C_in); column block t = w[:, :, dy_t, dx_t]."""
    k = int(w.shape[-1])
    taps = _allowed_taps(k)
    return jnp.concatenate([w[:, :, dy, dx] for (dy, dx) in taps], axis=1)


# ----------------------------- fused kernel -----------------------------

def _make_kernel(ks, C, W_pad, BS, MG):
    taps_per_conv = [_allowed_taps(k) for k in ks]

    def kernel(x_ref, mask_ref, w1_ref, w2_ref, w3_ref, o_ref,
               plane_ref, patch_ref):
        # Zero the shift margins so every (non-positive-offset) tap read sees
        # finite zeros; the interior is overwritten right below.
        plane_ref[:, :MG] = jnp.zeros((C, MG), jnp.float32)
        plane_ref[:, MG + BS:MG + BS + MG] = jnp.zeros((C, MG), jnp.float32)
        # Stage the (already zero-padded, flattened) input planes.
        plane_ref[:, MG:MG + BS] = x_ref[...].astype(jnp.float32)

        keep = mask_ref[...] != 0.0          # (1, BS) interior indicator

        w_refs = (w1_ref, w2_ref, w3_ref)
        h = None
        for li, (k, taps) in enumerate(zip(ks, taps_per_conv)):
            p = k // 2
            T = len(taps)
            # Transposed im2col: tap t occupies rows [t*C, (t+1)*C) of the
            # patch; each tap is one constant lane-shift of the plane, stored
            # as a full-width, sublane-aligned slab.
            for t, (dy, dx) in enumerate(taps):
                d = (dy - p) * W_pad + (dx - p)
                patch_ref[t * C:(t + 1) * C, :] = \
                    plane_ref[:, MG + d:MG + d + BS]

            # One MXU matmul per conv: (C, T*C) @ (T*C, BS), lane-dense N=BS.
            h = jnp.dot(w_refs[li][...], patch_ref[:T * C, :],
                        preferred_element_type=jnp.float32)

            if li < len(ks) - 1:
                # ReLU, then zero the padding / garbage columns so the next
                # conv sees proper zero padding; this IS the next plane.
                h = jnp.where(keep, jnp.maximum(h, 0.0), 0.0)
                plane_ref[:, MG:MG + BS] = h

        # Residual add (re-read x here to keep its live range short).  The
        # pad/garbage columns are discarded by the wrapper's final slice.
        o_ref[...] = (h + x_ref[...].astype(jnp.float32)).astype(o_ref.dtype)

    return kernel


# ----------------------------- wrapper -----------------------------

def pixelcnn_resblock3_nobn(x, w1, w2, w3, *, batch_tile=None, interpret=False):
    """y = conv3(relu(conv2(relu(conv1(x))))) + x, all convs 'B'-masked.

    x:  (N, C, H, W) float32  (PyTorch NCHW layout)
    w*: (C, C, k, k) float32  (PyTorch OIHW layout, unmasked; the 'B' mask is
        enforced by only gathering the allowed taps)
    """
    N, C, H, W = x.shape
    weights = (w1, w2, w3)
    ks = tuple(int(w.shape[-1]) for w in weights)
    for k, w in zip(ks, weights):
        assert k % 2 == 1, "kernel sizes must be odd"
        assert w.shape == (C, C, k, k), "weights must be (C, C, k, k) OIHW"

    P = max(k // 2 for k in ks)                    # global (max) padding
    H_pad, W_pad = H + 2 * P, W + 2 * P
    S_pad = H_pad * W_pad                          # flat padded plane size
    S_tile = _round_up(S_pad, 128)                 # lane-aligned per-image slab
    Tmax = max(len(_allowed_taps(k)) for k in ks)

    # Batch tile: amortize per-step overhead, keep >= 2 grid steps (v7x
    # megacore) and keep VMEM (dominated by the f32 patch) to a few MB.
    if batch_tile is None:
        batch_tile = 1
        for b in range(1, min(N, 4) + 1):
            if N % b == 0 and (N // b) >= 2:
                batch_tile = b
    assert N % batch_tile == 0
    BS = batch_tile * S_tile
    MG = max(128, _round_up(P * W_pad + P, 128))   # shift margin (lane-aligned)

    # Pre-concatenated ('pre-masked') transposed weights, (C, T*C) each.
    w_cats = [_concat_weights_T(w) for w in weights]

    # Zero-padded, per-image flattened, channels-major input planes:
    # x_k[c, b*S_tile + (y+P)*W_pad + (x+P)] = x[b, c, y, x].  (Cheap XLA ops.)
    x_pad = jnp.pad(x, ((0, 0), (0, 0), (P, P), (P, P)))
    x_pad = x_pad.reshape(N, C, S_pad)
    x_pad = jnp.pad(x_pad, ((0, 0), (0, 0), (0, S_tile - S_pad)))
    x_k = x_pad.transpose(1, 0, 2).reshape(C, N * S_tile)

    # Interior-column indicator (1 inside the un-padded image, 0 elsewhere).
    m2 = jnp.zeros((H_pad, W_pad), jnp.float32).at[P:P + H, P:P + W].set(1.0)
    m1 = jnp.pad(m2.reshape(S_pad), (0, S_tile - S_pad))
    mask_k = jnp.tile(m1, (N,)).reshape(1, N * S_tile)

    kernel = _make_kernel(ks, C, W_pad, BS, MG)

    y_k = pl.pallas_call(
        kernel,
        out_shape=jax.ShapeDtypeStruct((C, N * S_tile), x.dtype),
        grid_spec=pltpu.PrefetchScalarGridSpec(
            num_scalar_prefetch=0,
            grid=(N // batch_tile,),
            in_specs=[
                pl.BlockSpec((C, BS), lambda i: (0, i)),       # input planes
                pl.BlockSpec((1, BS), lambda i: (0, i)),       # interior mask
                # Constant index_maps: weights DMA'd once, VMEM-resident.
                pl.BlockSpec(w_cats[0].shape, lambda i: (0, 0)),
                pl.BlockSpec(w_cats[1].shape, lambda i: (0, 0)),
                pl.BlockSpec(w_cats[2].shape, lambda i: (0, 0)),
            ],
            out_specs=pl.BlockSpec((C, BS), lambda i: (0, i)),  # lane-dense
            scratch_shapes=[
                # Shift buffer: [left margin | planes | right margin].
                pltpu.VMEM((C, MG + BS + MG), jnp.float32),
                # Transposed im2col patch, sized for the widest conv.
                pltpu.VMEM((Tmax * C, BS), jnp.float32),
            ],
        ),
        compiler_params=pltpu.CompilerParams(
            dimension_semantics=("parallel",)),
        interpret=interpret,
    )(x_k, mask_k, *w_cats)

    # Epilogue (cheap XLA): (C, N*S_tile) -> (N, C, H, W), dropping padding.
    y = y_k.reshape(C, N, S_tile)[:, :, :S_pad].reshape(C, N, H_pad, W_pad)
    return y.transpose(1, 0, 2, 3)[:, :, P:P + H, P:P + W]


# ----------------------------- reference (pure JAX) -----------------------------

def _oihw_mask(c_out, c_in, k):
    U = V = k // 2
    m = jnp.zeros((c_out, c_in, k, k), jnp.float32)
    m = m.at[:, :, :U, :].set(1.0)
    m = m.at[:, :, U, :V + 1].set(1.0)
    return m


def _ref_masked_conv(x, w):
    wm = w * _oihw_mask(w.shape[0], w.shape[1], w.shape[-1])
    return lax.conv_general_dilated(
        x, wm, window_strides=(1, 1), padding="SAME",
        dimension_numbers=("NCHW", "OIHW", "NCHW"))


def _ref_block(x, w1, w2, w3):
    h = jnp.maximum(_ref_masked_conv(x, w1), 0.0)
    h = jnp.maximum(_ref_masked_conv(h, w2), 0.0)
    return _ref_masked_conv(h, w3) + x


# ------------------------------------ main ------------------------------------

if __name__ == "__main__":
    num_filters = 32
    ks = (3, 5, 3)          # kernel_size_1, kernel_size_2, kernel_size_3 (odd)
    N, H, W = 2, 16, 16

    key = jax.random.PRNGKey(0)
    kx, k1, k2, k3 = jax.random.split(key, 4)

    # NCHW activations; OIHW weights (exactly the PyTorch layouts).
    x = jax.random.normal(kx, (N, num_filters, H, W), jnp.float32)
    w1 = 0.1 * jax.random.normal(k1, (num_filters, num_filters, ks[0], ks[0]), jnp.float32)
    w2 = 0.1 * jax.random.normal(k2, (num_filters, num_filters, ks[1], ks[1]), jnp.float32)
    w3 = 0.1 * jax.random.normal(k3, (num_filters, num_filters, ks[2], ks[2]), jnp.float32)

    y = jax.jit(pixelcnn_resblock3_nobn)(x, w1, w2, w3)
    y = jax.block_until_ready(y)

    y_ref = _ref_block(x, w1, w2, w3)
    assert y.shape == (N, num_filters, H, W)
    assert jnp.allclose(y, y_ref, atol=1e-4, rtol=1e-4), "mismatch vs JAX reference"

    print("KERNEL_OK")
</pallas_src>

<mosaic_0001>
module attributes {stable_mosaic.version = 11 : i64} {
  func.func @kernel(%arg0: i32, %arg1: memref<32x512xf32, #tpu.memory_space<vmem>>, %arg2: memref<1x512xf32, #tpu.memory_space<vmem>>, %arg3: memref<32x160xf32, #tpu.memory_space<vmem>>, %arg4: memref<32x416xf32, #tpu.memory_space<vmem>>, %arg5: memref<32x160xf32, #tpu.memory_space<vmem>>, %arg6: memref<32x512xf32, #tpu.memory_space<vmem>>, %arg7: memref<32x768xf32, #tpu.memory_space<vmem>>, %arg8: memref<416x512xf32, #tpu.memory_space<vmem>>) attributes {dimension_semantics = [#tpu.dimension_semantics<parallel>], iteration_bounds = array<i64: 2>, scalar_prefetch = 0 : i64, scratch_operands = 2 : i64, tpu.core_type = #tpu.core_type<tc>, window_params = [{transform_indices = @transform_0, window_bounds = array<i64: 32, 512>}, {transform_indices = @transform_1, window_bounds = array<i64: 1, 512>}, {pipeline_mode = #tpu.pipeline_mode<synchronous>, transform_indices = @transform_2, window_bounds = array<i64: 32, 160>}, {pipeline_mode = #tpu.pipeline_mode<synchronous>, transform_indices = @transform_3, window_bounds = array<i64: 32, 416>}, {pipeline_mode = #tpu.pipeline_mode<synchronous>, transform_indices = @transform_4, window_bounds = array<i64: 32, 160>}, {transform_indices = @transform_5, window_bounds = array<i64: 32, 512>}]} {
    %cst = arith.constant 0.000000e+00 : f32
    %0 = vector.broadcast %cst : f32 to vector<32x128xf32>
    %c0 = arith.constant 0 : index
    %c0_0 = arith.constant 0 : index
    %1 = vector.load %arg7[%c0, %c0_0] : memref<32x768xf32, #tpu.memory_space<vmem>>, vector<32x128xf32>
    tpu.vector_store %arg7[%c0, %c0_0], %0 {strides = array<i32>} : memref<32x768xf32, #tpu.memory_space<vmem>>, vector<32x128xf32>,
    %cst_1 = arith.constant 0.000000e+00 : f32
    %2 = vector.broadcast %cst_1 : f32 to vector<32x128xf32>
    %c0_2 = arith.constant 0 : index
    %c640 = arith.constant 640 : index
    %3 = vector.load %arg7[%c0_2, %c640] : memref<32x768xf32, #tpu.memory_space<vmem>>, vector<32x128xf32>
    tpu.vector_store %arg7[%c0_2, %c640], %2 {strides = array<i32>} : memref<32x768xf32, #tpu.memory_space<vmem>>, vector<32x128xf32>,
    %c0_3 = arith.constant 0 : index
    %c0_4 = arith.constant 0 : index
    %4 = vector.load %arg1[%c0_3, %c0_4] : memref<32x512xf32, #tpu.memory_space<vmem>>, vector<32x512xf32>
    %c0_5 = arith.constant 0 : index
    %c128 = arith.constant 128 : index
    %5 = vector.load %arg7[%c0_5, %c128] : memref<32x768xf32, #tpu.memory_space<vmem>>, vector<32x512xf32>
    tpu.vector_store %arg7[%c0_5, %c128], %4 {strides = array<i32>} : memref<32x768xf32, #tpu.memory_space<vmem>>, vector<32x512xf32>,
    %c0_6 = arith.constant 0 : index
    %c0_7 = arith.constant 0 : index
    %6 = vector.load %arg2[%c0_6, %c0_7] : memref<1x512xf32, #tpu.memory_space<vmem>>, vector<1x512xf32>
    %cst_8 = arith.constant 0.000000e+00 : f32
    %7 = vector.broadcast %cst_8 : f32 to vector<1x512xf32>
    %8 = arith.cmpf one, %6, %7 : vector<1x512xf32>
    %c0_9 = arith.constant 0 : index
    %c107 = arith.constant 107 : index
    %9 = vector.load %arg7[%c0_9, %c107] : memref<32x768xf32, #tpu.memory_space<vmem>>, vector<32x512xf32>
    %c0_10 = arith.constant 0 : index
    %c0_11 = arith.constant 0 : index
    %10 = vector.load %arg8[%c0_10, %c0_11] : memref<416x512xf32, #tpu.memory_space<vmem>>, vector<32x512xf32>
    tpu.vector_store %arg8[%c0_10, %c0_11], %9 {strides = array<i32>} : memref<416x512xf32, #tpu.memory_space<vmem>>, vector<32x512xf32>,
    %c0_12 = arith.constant 0 : index
    %c108 = arith.constant 108 : index
    %11 = vector.load %arg7[%c0_12, %c108] : memref<32x768xf32, #tpu.memory_space<vmem>>, vector<32x512xf32>
    %c32 = arith.constant 32 : index
    %c0_13 = arith.constant 0 : index
    %12 = vector.load %arg8[%c32, %c0_13] : memref<416x512xf32, #tpu.memory_space<vmem>>, vector<32x512xf32>
    tpu.vector_store %arg8[%c32, %c0_13], %11 {strides = array<i32>} : memref<416x512xf32, #tpu.memory_space<vmem>>, vector<32x512xf32>,
    %c0_14 = arith.constant 0 : index
    %c109 = arith.constant 109 : index
    %13 = vector.load %arg7[%c0_14, %c109] : memref<32x768xf32, #tpu.memory_space<vmem>>, vector<32x512xf32>
    %c64 = arith.constant 64 : index
    %c0_15 = arith.constant 0 : index
    %14 = vector.load %arg8[%c64, %c0_15] : memref<416x512xf32, #tpu.memory_space<vmem>>, vector<32x512xf32>
    tpu.vector_store %arg8[%c64, %c0_15], %13 {strides = array<i32>} : memref<416x512xf32, #tpu.memory_space<vmem>>, vector<32x512xf32>,
    %c0_16 = arith.constant 0 : index
    %c127 = arith.constant 127 : index
    %15 = vector.load %arg7[%c0_16, %c127] : memref<32x768xf32, #tpu.memory_space<vmem>>, vector<32x512xf32>
    %c96 = arith.constant 96 : index
    %c0_17 = arith.constant 0 : index
    %16 = vector.load %arg8[%c96, %c0_17] : memref<416x512xf32, #tpu.memory_space<vmem>>, vector<32x512xf32>
    tpu.vector_store %arg8[%c96, %c0_17], %15 {strides = array<i32>} : memref<416x512xf32, #tpu.memory_space<vmem>>, vector<32x512xf32>,
    %c0_18 = arith.constant 0 : index
    %c128_19 = arith.constant 128 : index
    %17 = vector.load %arg7[%c0_18, %c128_19] : memref<32x768xf32, #tpu.memory_space<vmem>>, vector<32x512xf32>
    %c128_20 = arith.constant 128 : index
    %c0_21 = arith.constant 0 : index
    %18 = vector.load %arg8[%c128_20, %c0_21] : memref<416x512xf32, #tpu.memory_space<vmem>>, vector<32x512xf32>
    tpu.vector_store %arg8[%c128_20, %c0_21], %17 {strides = array<i32>} : memref<416x512xf32, #tpu.memory_space<vmem>>, vector<32x512xf32>,
    %c0_22 = arith.constant 0 : index
    %c0_23 = arith.constant 0 : index
    %19 = vector.load %arg3[%c0_22, %c0_23] : memref<32x160xf32, #tpu.memory_space<vmem>>, vector<32x160xf32>
    %c0_24 = arith.constant 0 : index
    %c0_25 = arith.constant 0 : index
    %20 = vector.load %arg8[%c0_24, %c0_25] : memref<416x512xf32, #tpu.memory_space<vmem>>, vector<160x512xf32>
    %cst_26 = arith.constant dense<0.000000e+00> : vector<32x512xf32>
    %21 = tpu.matmul %19, %20, %cst_26 {dimension_numbers = #tpu.dot_dimension_numbers<[1], [0], [0], [1], [0, 0, 1, 1], [], []>} : vector<32x160xf32>, vector<160x512xf32>, vector<32x512xf32> -> vector<32x512xf32>
    %cst_27 = arith.constant 0.000000e+00 : f32
    %22 = vector.broadcast %cst_27 : f32 to vector<32x512xf32>
    %23 = arith.maximumf %21, %22 : vector<32x512xf32>
    %cst_28 = arith.constant 0.000000e+00 : f32
    %24 = vector.shape_cast %8 : vector<1x512xi1> to vector<1x512xi1>
    %25 = vector.broadcast %24 : vector<1x512xi1> to vector<32x512xi1>
    %26 = vector.broadcast %cst_28 : f32 to vector<32x512xf32>
    %27 = arith.select %25, %23, %26 : vector<32x512xi1>, vector<32x512xf32>
    %c0_29 = arith.constant 0 : index
    %c128_30 = arith.constant 128 : index
    %28 = vector.load %arg7[%c0_29, %c128_30] : memref<32x768xf32, #tpu.memory_space<vmem>>, vector<32x512xf32>
    tpu.vector_store %arg7[%c0_29, %c128_30], %27 {strides = array<i32>} : memref<32x768xf32, #tpu.memory_space<vmem>>, vector<32x512xf32>,
    %c0_31 = arith.constant 0 : index
    %c86 = arith.constant 86 : index
    %29 = vector.load %arg7[%c0_31, %c86] : memref<32x768xf32, #tpu.memory_space<vmem>>, vector<32x512xf32>
    %c0_32 = arith.constant 0 : index
    %c0_33 = arith.constant 0 : index
    %30 = vector.load %arg8[%c0_32, %c0_33] : memref<416x512xf32, #tpu.memory_space<vmem>>, vector<32x512xf32>
    tpu.vector_store %arg8[%c0_32, %c0_33], %29 {strides = array<i32>} : memref<416x512xf32, #tpu.memory_space<vmem>>, vector<32x512xf32>,
    %c0_34 = arith.constant 0 : index
    %c87 = arith.constant 87 : index
    %31 = vector.load %arg7[%c0_34, %c87] : memref<32x768xf32, #tpu.memory_space<vmem>>, vector<32x512xf32>
    %c32_35 = arith.constant 32 : index
    %c0_36 = arith.constant 0 : index
    %32 = vector.load %arg8[%c32_35, %c0_36] : memref<416x512xf32, #tpu.memory_space<vmem>>, vector<32x512xf32>
    tpu.vector_store %arg8[%c32_35, %c0_36], %31 {strides = array<i32>} : memref<416x512xf32, #tpu.memory_space<vmem>>, vector<32x512xf32>,
    %c0_37 = arith.constant 0 : index
    %c88 = arith.constant 88 : index
    %33 = vector.load %arg7[%c0_37, %c88] : memref<32x768xf32, #tpu.memory_space<vmem>>, vector<32x512xf32>
    %c64_38 = arith.constant 64 : index
    %c0_39 = arith.constant 0 : index
    %34 = vector.load %arg8[%c64_38, %c0_39] : memref<416x512xf32, #tpu.memory_space<vmem>>, vector<32x512xf32>
    tpu.vector_store %arg8[%c64_38, %c0_39], %33 {strides = array<i32>} : memref<416x512xf32, #tpu.memory_space<vmem>>, vector<32x512xf32>,
    %c0_40 = arith.constant 0 : index
    %c89 = arith.constant 89 : index
    %35 = vector.load %arg7[%c0_40, %c89] : memref<32x768xf32, #tpu.memory_space<vmem>>, vector<32x512xf32>
    %c96_41 = arith.constant 96 : index
    %c0_42 = arith.constant 0 : index
    %36 = vector.load %arg8[%c96_41, %c0_42] : memref<416x512xf32, #tpu.memory_space<vmem>>, vector<32x512xf32>
    tpu.vector_store %arg8[%c96_41, %c0_42], %35 {strides = array<i32>} : memref<416x512xf32, #tpu.memory_space<vmem>>, vector<32x512xf32>,
    %c0_43 = arith.constant 0 : index
    %c90 = arith.constant 90 : index
    %37 = vector.load %arg7[%c0_43, %c90] : memref<32x768xf32, #tpu.memory_space<vmem>>, vector<32x512xf32>
    %c128_44 = arith.constant 128 : index
    %c0_45 = arith.constant 0 : index
    %38 = vector.load %arg8[%c128_44, %c0_45] : memref<416x512xf32, #tpu.memory_space<vmem>>, vector<32x512xf32>
    tpu.vector_store %arg8[%c128_44, %c0_45], %37 {strides = array<i32>} : memref<416x512xf32, #tpu.memory_space<vmem>>, vector<32x512xf32>,
    %c0_46 = arith.constant 0 : index
    %c106 = arith.constant 106 : index
    %39 = vector.load %arg7[%c0_46, %c106] : memref<32x768xf32, #tpu.memory_space<vmem>>, vector<32x512xf32>
    %c160 = arith.constant 160 : index
    %c0_47 = arith.constant 0 : index
    %40 = vector.load %arg8[%c160, %c0_47] : memref<416x512xf32, #tpu.memory_space<vmem>>, vector<32x512xf32>
    tpu.vector_store %arg8[%c160, %c0_47], %39 {strides = array<i32>} : memref<416x512xf32, #tpu.memory_space<vmem>>, vector<32x512xf32>,
    %c0_48 = arith.constant 0 : index
    %c107_49 = arith.constant 107 : index
    %41 = vector.load %arg7[%c0_48, %c107_49] : memref<32x768xf32, #tpu.memory_space<vmem>>, vector<32x512xf32>
    %c192 = arith.constant 192 : index
    %c0_50 = arith.constant 0 : index
    %42 = vector.load %arg8[%c192, %c0_50] : memref<416x512xf32, #tpu.memory_space<vmem>>, vector<32x512xf32>
    tpu.vector_store %arg8[%c192, %c0_50], %41 {strides = array<i32>} : memref<416x512xf32, #tpu.memory_space<vmem>>, vector<32x512xf32>,
    %c0_51 = arith.constant 0 : index
    %c108_52 = arith.constant 108 : index
    %43 = vector.load %arg7[%c0_51, %c108_52] : memref<32x768xf32, #tpu.memory_space<vmem>>, vector<32x512xf32>
    %c224 = arith.constant 224 : index
    %c0_53 = arith.constant 0 : index
    %44 = vector.load %arg8[%c224, %c0_53] : memref<416x512xf32, #tpu.memory_space<vmem>>, vector<32x512xf32>
    tpu.vector_store %arg8[%c224, %c0_53], %43 {strides = array<i32>} : memref<416x512xf32, #tpu.memory_space<vmem>>, vector<32x512xf32>,
    %c0_54 = arith.constant 0 : index
    %c109_55 = arith.constant 109 : index
    %45 = vector.load %arg7[%c0_54, %c109_55] : memref<32x768xf32, #tpu.memory_space<vmem>>, vector<32x512xf32>
    %c256 = arith.constant 256 : index
    %c0_56 = arith.constant 0 : index
    %46 = vector.load %arg8[%c256, %c0_56] : memref<416x512xf32, #tpu.memory_space<vmem>>, vector<32x512xf32>
    tpu.vector_store %arg8[%c256, %c0_56], %45 {strides = array<i32>} : memref<416x512xf32, #tpu.memory_space<vmem>>, vector<32x512xf32>,
    %c0_57 = arith.constant 0 : index
    %c110 = arith.constant 110 : index
    %47 = vector.load %arg7[%c0_57, %c110] : memref<32x768xf32, #tpu.memory_space<vmem>>, vector<32x512xf32>
    %c288 = arith.constant 288 : index
    %c0_58 = arith.constant 0 : index
    %48 = vector.load %arg8[%c288, %c0_58] : memref<416x512xf32, #tpu.memory_space<vmem>>, vector<32x512xf32>
    tpu.vector_store %arg8[%c288, %c0_58], %47 {strides = array<i32>} : memref<416x512xf32, #tpu.memory_space<vmem>>, vector<32x512xf32>,
    %c0_59 = arith.constant 0 : index
    %c126 = arith.constant 126 : index
    %49 = vector.load %arg7[%c0_59, %c126] : memref<32x768xf32, #tpu.memory_space<vmem>>, vector<32x512xf32>
    %c320 = arith.constant 320 : index
    %c0_60 = arith.constant 0 : index
    %50 = vector.load %arg8[%c320, %c0_60] : memref<416x512xf32, #tpu.memory_space<vmem>>, vector<32x512xf32>
    tpu.vector_store %arg8[%c320, %c0_60], %49 {strides = array<i32>} : memref<416x512xf32, #tpu.memory_space<vmem>>, vector<32x512xf32>,
    %c0_61 = arith.constant 0 : index
    %c127_62 = arith.constant 127 : index
    %51 = vector.load %arg7[%c0_61, %c127_62] : memref<32x768xf32, #tpu.memory_space<vmem>>, vector<32x512xf32>
    %c352 = arith.constant 352 : index
    %c0_63 = arith.constant 0 : index
    %52 = vector.load %arg8[%c352, %c0_63] : memref<416x512xf32, #tpu.memory_space<vmem>>, vector<32x512xf32>
    tpu.vector_store %arg8[%c352, %c0_63], %51 {strides = array<i32>} : memref<416x512xf32, #tpu.memory_space<vmem>>, vector<32x512xf32>,
    %c0_64 = arith.constant 0 : index
    %c128_65 = arith.constant 128 : index
    %53 = vector.load %arg7[%c0_64, %c128_65] : memref<32x768xf32, #tpu.memory_space<vmem>>, vector<32x512xf32>
    %c384 = arith.constant 384 : index
    %c0_66 = arith.constant 0 : index
    %54 = vector.load %arg8[%c384, %c0_66] : memref<416x512xf32, #tpu.memory_space<vmem>>, vector<32x512xf32>
    tpu.vector_store %arg8[%c384, %c0_66], %53 {strides = array<i32>} : memref<416x512xf32, #tpu.memory_space<vmem>>, vector<32x512xf32>,
    %c0_67 = arith.constant 0 : index
    %c0_68 = arith.constant 0 : index
    %55 = vector.load %arg4[%c0_67, %c0_68] : memref<32x416xf32, #tpu.memory_space<vmem>>, vector<32x416xf32>
    %c0_69 = arith.constant 0 : index
    %c0_70 = arith.constant 0 : index
    %56 = vector.load %arg8[%c0_69, %c0_70] : memref<416x512xf32, #tpu.memory_space<vmem>>, vector<416x512xf32>
    %cst_71 = arith.constant dense<0.000000e+00> : vector<32x512xf32>
    %57 = tpu.matmul %55, %56, %cst_71 {dimension_numbers = #tpu.dot_dimension_numbers<[1], [0], [0], [1], [0, 0, 1, 1], [], []>} : vector<32x416xf32>, vector<416x512xf32>, vector<32x512xf32> -> vector<32x512xf32>
    %cst_72 = arith.constant 0.000000e+00 : f32
    %58 = vector.broadcast %cst_72 : f32 to vector<32x512xf32>
    %59 = arith.maximumf %57, %58 : vector<32x512xf32>
    %cst_73 = arith.constant 0.000000e+00 : f32
    %60 = vector.shape_cast %8 : vector<1x512xi1> to vector<1x512xi1>
    %61 = vector.broadcast %60 : vector<1x512xi1> to vector<32x512xi1>
    %62 = vector.broadcast %cst_73 : f32 to vector<32x512xf32>
    %63 = arith.select %61, %59, %62 : vector<32x512xi1>, vector<32x512xf32>
    %c0_74 = arith.constant 0 : index
    %c128_75 = arith.constant 128 : index
    %64 = vector.load %arg7[%c0_74, %c128_75] : memref<32x768xf32, #tpu.memory_space<vmem>>, vector<32x512xf32>
    tpu.vector_store %arg7[%c0_74, %c128_75], %63 {strides = array<i32>} : memref<32x768xf32, #tpu.memory_space<vmem>>, vector<32x512xf32>,
    %c0_76 = arith.constant 0 : index
    %c107_77 = arith.constant 107 : index
    %65 = vector.load %arg7[%c0_76, %c107_77] : memref<32x768xf32, #tpu.memory_space<vmem>>, vector<32x512xf32>
    %c0_78 = arith.constant 0 : index
    %c0_79 = arith.constant 0 : index
    %66 = vector.load %arg8[%c0_78, %c0_79] : memref<416x512xf32, #tpu.memory_space<vmem>>, vector<32x512xf32>
    tpu.vector_store %arg8[%c0_78, %c0_79], %65 {strides = array<i32>} : memref<416x512xf32, #tpu.memory_space<vmem>>, vector<32x512xf32>,
    %c0_80 = arith.constant 0 : index
    %c108_81 = arith.constant 108 : index
    %67 = vector.load %arg7[%c0_80, %c108_81] : memref<32x768xf32, #tpu.memory_space<vmem>>, vector<32x512xf32>
    %c32_82 = arith.constant 32 : index
    %c0_83 = arith.constant 0 : index
    %68 = vector.load %arg8[%c32_82, %c0_83] : memref<416x512xf32, #tpu.memory_space<vmem>>, vector<32x512xf32>
    tpu.vector_store %arg8[%c32_82, %c0_83], %67 {strides = array<i32>} : memref<416x512xf32, #tpu.memory_space<vmem>>, vector<32x512xf32>,
    %c0_84 = arith.constant 0 : index
    %c109_85 = arith.constant 109 : index
    %69 = vector.load %arg7[%c0_84, %c109_85] : memref<32x768xf32, #tpu.memory_space<vmem>>, vector<32x512xf32>
    %c64_86 = arith.constant 64 : index
    %c0_87 = arith.constant 0 : index
    %70 = vector.load %arg8[%c64_86, %c0_87] : memref<416x512xf32, #tpu.memory_space<vmem>>, vector<32x512xf32>
    tpu.vector_store %arg8[%c64_86, %c0_87], %69 {strides = array<i32>} : memref<416x512xf32, #tpu.memory_space<vmem>>, vector<32x512xf32>,
    %c0_88 = arith.constant 0 : index
    %c127_89 = arith.constant 127 : index
    %71 = vector.load %arg7[%c0_88, %c127_89] : memref<32x768xf32, #tpu.memory_space<vmem>>, vector<32x512xf32>
    %c96_90 = arith.constant 96 : index
    %c0_91 = arith.constant 0 : index
    %72 = vector.load %arg8[%c96_90, %c0_91] : memref<416x512xf32, #tpu.memory_space<vmem>>, vector<32x512xf32>
    tpu.vector_store %arg8[%c96_90, %c0_91], %71 {strides = array<i32>} : memref<416x512xf32, #tpu.memory_space<vmem>>, vector<32x512xf32>,
    %c0_92 = arith.constant 0 : index
    %c128_93 = arith.constant 128 : index
    %73 = vector.load %arg7[%c0_92, %c128_93] : memref<32x768xf32, #tpu.memory_space<vmem>>, vector<32x512xf32>
    %c128_94 = arith.constant 128 : index
    %c0_95 = arith.constant 0 : index
    %74 = vector.load %arg8[%c128_94, %c0_95] : memref<416x512xf32, #tpu.memory_space<vmem>>, vector<32x512xf32>
    tpu.vector_store %arg8[%c128_94, %c0_95], %73 {strides = array<i32>} : memref<416x512xf32, #tpu.memory_space<vmem>>, vector<32x512xf32>,
    %c0_96 = arith.constant 0 : index
    %c0_97 = arith.constant 0 : index
    %75 = vector.load %arg5[%c0_96, %c0_97] : memref<32x160xf32, #tpu.memory_space<vmem>>, vector<32x160xf32>
    %c0_98 = arith.constant 0 : index
    %c0_99 = arith.constant 0 : index
    %76 = vector.load %arg8[%c0_98, %c0_99] : memref<416x512xf32, #tpu.memory_space<vmem>>, vector<160x512xf32>
    %cst_100 = arith.constant dense<0.000000e+00> : vector<32x512xf32>
    %77 = tpu.matmul %75, %76, %cst_100 {dimension_numbers = #tpu.dot_dimension_numbers<[1], [0], [0], [1], [0, 0, 1, 1], [], []>} : vector<32x160xf32>, vector<160x512xf32>, vector<32x512xf32> -> vector<32x512xf32>
    %c0_101 = arith.constant 0 : index
    %c0_102 = arith.constant 0 : index
    %78 = vector.load %arg1[%c0_101, %c0_102] : memref<32x512xf32, #tpu.memory_space<vmem>>, vector<32x512xf32>
    %79 = arith.addf %77, %78 : vector<32x512xf32>
    %c0_103 = arith.constant 0 : index
    %c0_104 = arith.constant 0 : index
    %80 = vector.load %arg6[%c0_103, %c0_104] : memref<32x512xf32, #tpu.memory_space<vmem>>, vector<32x512xf32>
    tpu.vector_store %arg6[%c0_103, %c0_104], %79 {strides = array<i32>} : memref<32x512xf32, #tpu.memory_space<vmem>>, vector<32x512xf32>,
    return
  }
  func.func @transform_0(%arg0: i32) -> (i32, i32) {
    %c0_i32 = arith.constant 0 : i32
    %c0_i32_0 = arith.constant 0 : i32
    return %c0_i32, %arg0 : i32, i32
  }
  func.func @transform_1(%arg0: i32) -> (i32, i32) {
    %c0_i32 = arith.constant 0 : i32
    %c0_i32_0 = arith.constant 0 : i32
    return %c0_i32, %arg0 : i32, i32
  }
  func.func @transform_2(%arg0: i32) -> (i32, i32) {
    %c0_i32 = arith.constant 0 : i32
    %c0_i32_0 = arith.constant 0 : i32
    %c0_i32_1 = arith.constant 0 : i32
    return %c0_i32, %c0_i32_0 : i32, i32
  }
  func.func @transform_3(%arg0: i32) -> (i32, i32) {
    %c0_i32 = arith.constant 0 : i32
    %c0_i32_0 = arith.constant 0 : i32
    %c0_i32_1 = arith.constant 0 : i32
    return %c0_i32, %c0_i32_0 : i32, i32
  }
  func.func @transform_4(%arg0: i32) -> (i32, i32) {
    %c0_i32 = arith.constant 0 : i32
    %c0_i32_0 = arith.constant 0 : i32
    %c0_i32_1 = arith.constant 0 : i32
    return %c0_i32, %c0_i32_0 : i32, i32
  }
  func.func @transform_5(%arg0: i32) -> (i32, i32) {
    %c0_i32 = arith.constant 0 : i32
    %c0_i32_0 = arith.constant 0 : i32
    return %c0_i32, %arg0 : i32, i32
  }
}

</mosaic_0001>

<bundles_post_ra>
// kernel: pixelcnn_resblock3_nobn.1
= control target key start
LH: loop header
LB: loop body
LE: loop exit
PB: predicated region body
PF: predicated region fallthrough
CT: control target
= control target key end

     0   :  { %s6000_s18 = smov 0   ;;  %s6002_s19 = smov 0   ;;  %s8150_s0 = inlined_call_operand.vmem [shape: f32[32,1024], index: 0, kind: input, shape index: {}]   ;;  %s8151_s1 = inlined_call_operand.vmem [shape: f32[1,1024], index: 1, kind: input, shape index: {}]   ;;  %s8152_s2 = inlined_call_operand.vmem [shape: f32[32,160], index: 2, kind: input, shape index: {}]   ;;  %s8153_s3 = inlined_call_operand.vmem [shape: f32[32,416], index: 3, kind: input, shape index: {}]   ;;  %s8154_s4 = inlined_call_operand.vmem [shape: f32[32,160], index: 4, kind: input, shape index: {}]   ;;  %s8155_s5 = inlined_call_operand.vmem [shape: f32[32,1024], index: 5, kind: output, shape index: {}]  }
   0x1   :  { %s6004_s20 = smov 0  }
   0x2 LB: > { %s6016_s21 = sadd.s32 4294967295, %s5954_s20   ;;  %s6019_s22 = sadd.s32 1, %s5954_s20   ;;  %s5954_s20 = sphi %s6004_s20, %s8407_s20   ;;  %s5950_s19 = sphi %s6002_s19, %s8406_s19   ;;  %s5946_s18 = sphi %s6000_s18, %s8405_s18  }
   0x3   : > { %s19_s23 = ssub.s32 %s5954_s20, %s6019_s22  ;;  %s22_s24 = sadd.s32 1, %s5950_s19 }
   0x4   : > { %p20_p0 = scmp.eq.s32.totalorder %s19_s23, 0  ;;  %p29_p1 = scmp.ne.s32.totalorder %s5950_s19, %s5946_s18 }
   0x5   : > { %p30_p2 = scmp.eq.s32.totalorder %s5954_s20, 0  ;;  %p148_p3 = scmp.eq.s32.totalorder %s6016_s21, 1 }
   0x6   : > { %s6029_s25 = scalar_select %p20_p0, %s5950_s19, %s22_s24  }
   0x7   : > { %p31_p4 = por %p30_p2, %p29_p1  ;;  %p6031_p5 = por %p148_p3, %p29_p1 }
   0x8   : > { %p4423_p6 = scmp.ge.s32.totalorder %s5954_s20, 2 }
   0xa   : > { %179 = sbr.rel (%p4423_p6) target bundleno = 29 (0x1d), region = 28 }
  0x11   : > { %182 = sbr.rel (!%p31_p4) target bundleno = 29 (0x1d), region = 32  ;;  %s184_s27 = sand.u32 (%p31_p4), 1, %s5950_s19  }
  0x12   : > { %s4460_s28 = sshll.u32 (%p31_p4), %s5954_s20, 5  ;;  %s4424_s29 = sshll.u32 (%p31_p4), %s184_s27, 7 }
  0x13   : > { %s6041_s7 = scalar_lea.vmem (%p31_p4), %s8150_s0, %s4460_s28  ;;  %s186_s8 = scalar_lea.vmem (%p31_p4), [#allocation4], %s4424_s29 }
  0x14   : > { %v202_v0 = vld [vmem:[%s6041_s7] sm:$0xff] (%p31_p4)  ;;  %v204_v1 = vld [vmem:[%s6041_s7 + $0x8] sm:$0xff] (%p31_p4)  ;;  %v206_v2 = vld [vmem:[%s6041_s7 + $0x10] sm:$0xff] (%p31_p4) }
  0x15   : > { %203 = vst [vmem:[%s186_s8] sm:$0xff] (%p31_p4), %v202_v0  ;;  %205 = vst [vmem:[%s186_s8 + $0x8] sm:$0xff] (%p31_p4), %v204_v1  ;;  %v208_v3 = vld [vmem:[%s6041_s7 + $0x18] sm:$0xff] (%p31_p4)  ;;  %v210_v4 = vld [vmem:[%s6041_s7 + $0x40] sm:$0xff] (%p31_p4) }
  0x16   : > { %207 = vst [vmem:[%s186_s8 + $0x10] sm:$0xff] (%p31_p4), %v206_v2  ;;  %v212_v5 = vld [vmem:[%s6041_s7 + $0x48] sm:$0xff] (%p31_p4)  ;;  %209 = vst [vmem:[%s186_s8 + $0x18] sm:$0xff] (%p31_p4), %v208_v3  ;;  %v214_v6 = vld [vmem:[%s6041_s7 + $0x50] sm:$0xff] (%p31_p4) }
  0x17   : > { %211 = vst [vmem:[%s186_s8 + $0x20] sm:$0xff] (%p31_p4), %v210_v4  ;;  %213 = vst [vmem:[%s186_s8 + $0x28] sm:$0xff] (%p31_p4), %v212_v5  ;;  %v216_v7 = vld [vmem:[%s6041_s7 + $0x58] sm:$0xff] (%p31_p4)  ;;  %v218_v8 = vld [vmem:[%s6041_s7 + $0x80] sm:$0xff] (%p31_p4) }
  0x18   : > { %215 = vst [vmem:[%s186_s8 + $0x30] sm:$0xff] %v214_v6  ;;  %217 = vst [vmem:[%s186_s8 + $0x38] sm:$0xff] %v216_v7  ;;  %v220_v9 = vld [vmem:[%s6041_s7 + $0x88] sm:$0xff]  ;;  %v222_v10 = vld [vmem:[%s6041_s7 + $0x90] sm:$0xff] }
  0x19   : > { %219 = vst [vmem:[%s186_s8 + $0x40] sm:$0xff] %v218_v8  ;;  %v224_v11 = vld [vmem:[%s6041_s7 + $0x98] sm:$0xff]  ;;  %221 = vst [vmem:[%s186_s8 + $0x48] sm:$0xff] %v220_v9  ;;  %v226_v12 = vld [vmem:[%s6041_s7 + $0xc0] sm:$0xff] }
  0x1a   : > { %223 = vst [vmem:[%s186_s8 + $0x50] sm:$0xff] %v222_v10  ;;  %225 = vst [vmem:[%s186_s8 + $0x58] sm:$0xff] %v224_v11  ;;  %v228_v13 = vld [vmem:[%s6041_s7 + $0xc8] sm:$0xff]  ;;  %v230_v14 = vld [vmem:[%s6041_s7 + $0xd0] sm:$0xff] }
  0x1b   : > { %227 = vst [vmem:[%s186_s8 + $0x60] sm:$0xff] %v226_v12  ;;  %229 = vst [vmem:[%s186_s8 + $0x68] sm:$0xff] %v228_v13  ;;  %v232_v15 = vld [vmem:[%s6041_s7 + $0xd8] sm:$0xff] }
  0x1c   : > { %231 = vst [vmem:[%s186_s8 + $0x70] sm:$0xff] %v230_v14  ;;  %233 = vst [vmem:[%s186_s8 + $0x78] sm:$0xff] %v232_v15 }
  0x1d PF: > { %p4427_p7 = scmp.ge.s32.totalorder %s5954_s20, 1  ;;  %p246_p8 = scmp.lt.s32.totalorder %s5954_s20, 3 }
  0x1f   : > { %p247_p9 = pnand %p4427_p7, %p246_p8 }
  0x21   : > { %250 = sbr.rel (%p247_p9) target bundleno = 1459 (0x5b3), region = 59 }
  0x28   : > { %s253_s9 = sand.u32 1, %s5946_s18   ;;  %s5956_s12 = smov 21   ;;  %v8156_v36 = vmov 0.0   ;;  %v881_v41 = vld [vmem:[%s8152_s2 + $0x8] sm:$0xff]  ;;  %vm968_vm0 = vcmask 261120   ;;  %vm412_vm1 = vcmask 171008  }
  0x29   : > { %s6062_s10 = sshll.u32 %s253_s9, 7  ;;  %s5958_s13 = smov 20   ;;  %4431 = vmatprep.mubr.msk.f32.mxu0 %vm968_vm0, %v881_v41  ;;  %4435 = vmatprep.mubr.msk.f32.mxu1 %vm968_vm0, %v881_v41  ;;  %vm541_vm2 = vcmask 162816   ;;  %vm670_vm3 = vcmask 154624   ;;  %vm799_vm4 = vcmask 7168   ;;  %vm1308_vm10 = vcmask 343040  }
  0x2a   : > { %s6065_s11 = scalar_lea.vmem [#allocation4], %s6062_s10  ;;  %s5959_s14 = smov 19   ;;  %vm1437_vm11 = vcmask 334848   ;;  %vm1566_vm12 = vcmask 326656   ;;  %vm1695_vm13 = vcmask 318464   ;;  %vm1824_vm14 = vcmask 310272  }
  0x2b   : > { %v6068_v16 = vld [vmem:[%s6065_s11 + $0x20] sm:$0xff]  ;;  %v6071_v17 = vld [vmem:[%s6065_s11 + $0x28] sm:$0xff]  ;;  %v6082_v21 = vld [vmem:[%s6065_s11 + $0x30] sm:$0xff]  ;;  %s5960_s15 = smov 1   ;;  %s5961_s18 = smov 42   ;;  %vm1953_vm15 = vcmask 179200  }
  0x2c   : > { %v6074_v18 = vld [vmem:[%s6065_s11] sm:$0xff]  ;;  %v4947_v19 = vpack.i.bf16 %v6071_v17, %v6068_v16  ;;  %v6079_v20 = vld [vmem:[%s6065_s11 + $0x8] sm:$0xff]  ;;  %v6085_v22 = vld [vmem:[%s6065_s11 + $0x38] sm:$0xff]  ;;  %s5962_s20 = smov 41   ;;  %s5963_s23 = smov 40  }
  0x2d   : > { %v4932_v23 = vpack.i.bf16 %v6079_v20, %v6074_v18  ;;  %v6090_v24 = vld [vmem:[%s6065_s11 + $0x10] sm:$0xff]  ;;  %v6093_v25 = vld [vmem:[%s6065_s11 + $0x18] sm:$0xff]  ;;  %v4952_v26 = vpack.i.bf16 %v6085_v22, %v6082_v21  ;;  %v6102_v28 = vld [vmem:[%s6065_s11 + $0x40] sm:$0xff]  ;;  %s5964_s24 = smov 39   ;;  %s5965_s27 = smov 38  }
  0x2e   : > { %4948 = vrot.lane.b32.xlu1 %v4947_v19, %s5956_s12  ;;  %v4937_v27 = vpack.i.bf16 %v6093_v25, %v6090_v24  ;;  %v6105_v29 = vld [vmem:[%s6065_s11 + $0x48] sm:$0xff]  ;;  %v6112_v31 = vld [vmem:[%s6065_s11 + $0x60] sm:$0xff]  ;;  %v6118_v33 = vld [vmem:[%s6065_s11 + $0x50] sm:$0xff]  ;;  %s5966_s28 = smov 22   ;;  %s4430_s16 = sshll.u32 %s6016_s21, 2 }
  0x2f   : > { %4933 = vrot.lane.b32.xlu0 %v4932_v23, %s5956_s12  ;;  %v4957_v30 = vpack.i.bf16 %v6105_v29, %v6102_v28  ;;  %v6115_v32 = vld [vmem:[%s6065_s11 + $0x68] sm:$0xff]  ;;  %v6121_v34 = vld [vmem:[%s6065_s11 + $0x58] sm:$0xff]  ;;  %v6131_v38 = vld [vmem:[%s6065_s11 + $0x70] sm:$0xff]  ;;  %p285_p10 = scmp.lt.s32.totalorder %s4430_s16, 7  ;;  %s5968_s6 = smov 18  }
  0x30   : > { %v4967_v35 = vpack.i.bf16 %v6115_v32, %v6112_v31  ;;  %v4962_v37 = vpack.i.bf16 %v6121_v34, %v6118_v33  ;;  %v6134_v39 = vld [vmem:[%s6065_s11 + $0x78] sm:$0xff] }
  0x31   : > { %v4972_v40 = vpack.i.bf16 %v6134_v39, %v6131_v38  ;;  %s8409_s16 = smov (!%p285_p10, %s4430_s16), 7 }
  0x32   : > { %4953 = vrot.lane.b32.xlu1 %v4952_v26, %s5956_s12  ;;  %s287_s30 = scalar_lea.vmem %s8151_s1, %s8409_s16 }
  0x33   : > { %4938 = vrot.lane.b32.xlu0 %v4937_v27, %s5956_s12 }
  0x36   : > { %4958 = vrot.lane.b32.xlu1 %v4957_v30, %s5956_s12 }
  0x37   : > { %4943 = vrot.lane.b32.xlu0 %v8156_v36, %s5956_s12 }
  0x3a   : > { %4968 = vrot.lane.b32.xlu1 %v4967_v35, %s5956_s12 }
  0x3b   : > { %4963 = vrot.lane.b32.xlu0 %v4962_v37, %s5956_s12 }
  0x3e   : > { %4978 = vrot.lane.b32.xlu1 %v8156_v36, %s5956_s12 }
  0x3f   : > { %4973 = vrot.lane.b32.xlu0 %v4972_v40, %s5956_s12 }
  0x42   : > { %4988 = vrot.lane.b32.xlu1 %v4937_v27, %s5958_s13 }
  0x43   : > { %4983 = vrot.lane.b32.xlu0 %v4932_v23, %s5958_s13 }
  0x46   : > { %4998 = vrot.lane.b32.xlu1 %v4952_v26, %s5958_s13 }
  0x47   : > { %4993 = vrot.lane.b32.xlu0 %v4947_v19, %s5958_s13 }
  0x4a   : > { %5008 = vrot.lane.b32.xlu1 %v4957_v30, %s5958_s13 }
  0x4b   : > { %5003 = vrot.lane.b32.xlu0 %v8156_v36, %s5958_s13 }
  0x4e   : > { %5018 = vrot.lane.b32.xlu1 %v4967_v35, %s5958_s13 }
  0x4f   : > { %5013 = vrot.lane.b32.xlu0 %v4962_v37, %s5958_s13 }
  0x52   : > { %5028 = vrot.lane.b32.xlu1 %v8156_v36, %s5958_s13 }
  0x53   : > { %5023 = vrot.lane.b32.xlu0 %v4972_v40, %s5958_s13 }
  0x56   : > { %5038 = vrot.lane.b32.xlu1 %v4937_v27, %s5959_s14 }
  0x57   : > { %5033 = vrot.lane.b32.xlu0 %v4932_v23, %s5959_s14 }
  0x5a   : > { %5048 = vrot.lane.b32.xlu1 %v4952_v26, %s5959_s14 }
  0x5b   : > { %5043 = vrot.lane.b32.xlu0 %v4947_v19, %s5959_s14 }
  0x5e   : > { %5058 = vrot.lane.b32.xlu1 %v4957_v30, %s5959_s14 }
  0x5f   : > { %5053 = vrot.lane.b32.xlu0 %v8156_v36, %s5959_s14 }
  0x62   : > { %5068 = vrot.lane.b32.xlu1 %v4967_v35, %s5959_s14 }
  0x63   : > { %5063 = vrot.lane.b32.xlu0 %v4962_v37, %s5959_s14 }
  0x66   : > { %5078 = vrot.lane.b32.xlu1 %v8156_v36, %s5959_s14 }
  0x67   : > { %5073 = vrot.lane.b32.xlu0 %v4972_v40, %s5959_s14 }
  0x6a   : > { %5088 = vrot.lane.b32.xlu1 %v4937_v27, %s5960_s15 }
  0x6b   : > { %5083 = vrot.lane.b32.xlu0 %v4932_v23, %s5960_s15 }
  0x6e   : > { %5098 = vrot.lane.b32.xlu1 %v4952_v26, %s5960_s15 }
  0x6f   : > { %5093 = vrot.lane.b32.xlu0 %v4947_v19, %s5960_s15 }
  0x72   : > { %5108 = vrot.lane.b32.xlu1 %v4957_v30, %s5960_s15 }
  0x73   : > { %5103 = vrot.lane.b32.xlu0 %v8156_v36, %s5960_s15 }
  0x76   : > { %5118 = vrot.lane.b32.xlu1 %v4967_v35, %s5960_s15 }
  0x77   : > { %5113 = vrot.lane.b32.xlu0 %v4962_v37, %s5960_s15 }
  0x7a   : > { %5128 = vrot.lane.b32.xlu1 %v8156_v36, %s5960_s15 }
  0x7b   : > { %5123 = vrot.lane.b32.xlu0 %v4972_v40, %s5960_s15 }
  0x7e   : > { %5138 = vrot.lane.b32.xlu1 %v8156_v36, %s5961_s18 }
  0x7f   : > { %5133 = vrot.lane.b32.xlu0 %v8156_v36, %s5961_s18 }
  0x82   : > { %5148 = vrot.lane.b32.xlu1 %v8156_v36, %s5962_s20 }
  0x83   : > { %5143 = vrot.lane.b32.xlu0 %v8156_v36, %s5962_s20 }
  0x86   : > { %5158 = vrot.lane.b32.xlu1 %v8156_v36, %s5963_s23 }
  0x87   : > { %5153 = vrot.lane.b32.xlu0 %v8156_v36, %s5963_s23 }
  0x8a   : > { %5168 = vrot.lane.b32.xlu1 %v8156_v36, %s5964_s24 }
  0x8b   : > { %5163 = vrot.lane.b32.xlu0 %v8156_v36, %s5964_s24 }
  0x8e   : > { %5178 = vrot.lane.b32.xlu1 %v8156_v36, %s5965_s27 }
  0x8f   : > { %5173 = vrot.lane.b32.xlu0 %v8156_v36, %s5965_s27 }
  0x92   : > { %5188 = vrot.lane.b32.xlu1 %v8156_v36, %s5966_s28 }
  0x93   : > { %5183 = vrot.lane.b32.xlu0 %v8156_v36, %s5966_s28 }
  0x96   : > { %5198 = vrot.lane.b32.xlu1 %v8156_v36, %s5956_s12 }
  0x97   : > { %5193 = vrot.lane.b32.xlu0 %v8156_v36, %s5956_s12 }
  0x9a   : > { %5208 = vrot.lane.b32.xlu1 %v8156_v36, %s5958_s13 }
  0x9b   : > { %5203 = vrot.lane.b32.xlu0 %v8156_v36, %s5958_s13 }
  0x9e   : > { %5218 = vrot.lane.b32.xlu1 %v8156_v36, %s5959_s14 }
  0x9f   : > { %5213 = vrot.lane.b32.xlu0 %v8156_v36, %s5959_s14 }
  0xa0   : > { %v4949_v42 = vpop.permute.xlu1 %4948 }
  0xa1   : > { %v4951_v43 = vunpack.i.h.bf16 %v4949_v42  ;;  %v4950_v44 = vunpack.i.l.bf16 %v4949_v42  ;;  %v4934_v45 = vpop.permute.xlu0 %4933 }
  0xa2   : > { %v4936_v46 = vunpack.i.h.bf16 %v4934_v45  ;;  %v4935_v47 = vunpack.i.l.bf16 %v4934_v45 }
  0xa3   : > { %v418_v48 = vsel %vm412_vm1, %v4950_v44, %v4951_v43 }
  0xa4   : > { %v4954_v49 = vpop.permute.xlu1 %4953  ;;  %v414_v50 = vsel %vm412_vm1, %v4935_v47, %v4936_v46 }
  0xa5   : > { %v4956_v51 = vunpack.i.h.bf16 %v4954_v49  ;;  %v4955_v52 = vunpack.i.l.bf16 %v4954_v49  ;;  %v4939_v53 = vpop.permute.xlu0 %4938  ;;  %v4494_v54 = vpack.c.bf16 %v418_v48, %v414_v50 }
  0xa6   : > { %v4941_v55 = vunpack.i.h.bf16 %v4939_v53  ;;  %v4940_v56 = vunpack.i.l.bf16 %v4939_v53 }
  0xa7   : > { %4495 = vmatprep.subr.bf16.mxu0 %v4494_v54  ;;  %v420_v57 = vsel %vm412_vm1, %v4955_v52, %v4956_v51  ;;  %v419_v58 = vsel %vm412_vm1, %v4951_v43, %v4955_v52 }
  0xa8   : > { %v4959_v59 = vpop.permute.xlu1 %4958  ;;  %v416_v60 = vsel %vm412_vm1, %v4940_v56, %v4941_v55  ;;  %v415_v61 = vsel %vm412_vm1, %v4936_v46, %v4940_v56 }
  0xa9   : > { %v4944_v62 = vpop.permute.xlu0 %4943  ;;  %v4534_v63 = vpack.c.bf16 %v420_v57, %v416_v60  ;;  %v4536_v0 = vpack.c.bf16 %v419_v58, %v415_v61  ;;  %v4961_v3 = vunpack.i.h.bf16 %v4959_v59  ;;  %v4960_v4 = vunpack.i.l.bf16 %v4959_v59 }
  0xaa   : > { %v4946_v1 = vunpack.i.h.bf16 %v4944_v62  ;;  %v4945_v2 = vunpack.i.l.bf16 %v4944_v62 }
  0xab   : > { %4535 = vmatprep.subr.bf16.mxu1 %v4534_v63  ;;  %v422_v14 = vsel %vm412_vm1, %v4960_v4, %v4961_v3 }
  0xac   : > { %4537 = vmatpush1.bf16.msra.mxu1 %v4536_v0  ;;  %v4969_v5 = vpop.permute.xlu1 %4968  ;;  %v413_v6 = vsel %vm412_vm1, %v4945_v2, %v4935_v47  ;;  %v417_v7 = vsel %vm412_vm1, %v4946_v1, %v4950_v44 }
  0xad   : > { %v4971_v8 = vunpack.i.h.bf16 %v4969_v5  ;;  %v4970_v9 = vunpack.i.l.bf16 %v4969_v5  ;;  %v4964_v10 = vpop.permute.xlu0 %4963  ;;  %v4496_v11 = vpack.c.bf16 %v417_v7, %v413_v6 }
  0xae   : > { %v4966_v12 = vunpack.i.h.bf16 %v4964_v10  ;;  %v4965_v13 = vunpack.i.l.bf16 %v4964_v10 }
  0xaf   : > { %4497 = vmatpush1.bf16.msra.mxu0 %v4496_v11  ;;  %v426_v15 = vsel %vm412_vm1, %v4970_v9, %v4971_v8 }
  0xb0   : > { %v4979_v19 = vpop.permute.xlu1 %4978  ;;  %v4498_v23 = vpack.c.bf16 %v426_v15, %v422_v14  ;;  %v424_v42 = vsel %vm412_vm1, %v4965_v13, %v4966_v12  ;;  %v423_v46 = vsel %vm412_vm1, %v4961_v3, %v4965_v13 }
  0xb1   : > { %v4981_v26 = vunpack.i.h.bf16 %v4979_v19  ;;  %v4980_v27 = vunpack.i.l.bf16 %v4979_v19  ;;  %v4974_v30 = vpop.permute.xlu0 %4973 }
  0xb2   : > { %v4976_v35 = vunpack.i.h.bf16 %v4974_v30  ;;  %v4975_v37 = vunpack.i.l.bf16 %v4974_v30  ;;  %4499 = vmatprep.subr.bf16.mxu0 %v4498_v23 }
  0xb3   : > { %v421_v40 = vsel %vm412_vm1, %v4980_v27, %v4960_v4  ;;  %v425_v41 = vsel %vm412_vm1, %v4981_v26, %v4970_v9 }
  0xb4   : > { %v4989_v43 = vpop.permute.xlu1 %4988  ;;  %v4500_v44 = vpack.c.bf16 %v425_v41, %v421_v40  ;;  %v428_v45 = vsel %vm412_vm1, %v4975_v37, %v4976_v35  ;;  %v427_v47 = vsel %vm412_vm1, %v4971_v8, %v4975_v37 }
  0xb5   : > { %v4984_v48 = vpop.permute.xlu0 %4983  ;;  %v4538_v49 = vpack.c.bf16 %v428_v45, %v424_v42  ;;  %v4540_v50 = vpack.c.bf16 %v427_v47, %v423_v46  ;;  %v4991_v51 = vunpack.i.h.bf16 %v4989_v43  ;;  %v4990_v52 = vunpack.i.l.bf16 %v4989_v43 }
  0xb6   : > { %4501 = vmatpush1.bf16.msra.mxu0 %v4500_v44  ;;  %v4986_v53 = vunpack.i.h.bf16 %v4984_v48  ;;  %v4985_v54 = vunpack.i.l.bf16 %v4984_v48 }
  0xb7   : > { %4539 = vmatprep.subr.bf16.mxu1 %v4538_v49  ;;  %v545_v62 = vsel %vm541_vm2, %v4990_v52, %v4991_v51 }
  0xb8   : > { %4541 = vmatpush1.bf16.msra.mxu1 %v4540_v50  ;;  %v4999_v55 = vpop.permute.xlu1 %4998  ;;  %v543_v61 = vsel %vm541_vm2, %v4985_v54, %v4986_v53  ;;  %v544_v3 = vsel %vm541_vm2, %v4986_v53, %v4990_v52 }
  0xb9   : > { %v5001_v56 = vunpack.i.h.bf16 %v4999_v55  ;;  %v5000_v57 = vunpack.i.l.bf16 %v4999_v55  ;;  %v4994_v58 = vpop.permute.xlu0 %4993 }
  0xba   : > { %v4996_v59 = vunpack.i.h.bf16 %v4994_v58  ;;  %v4995_v60 = vunpack.i.l.bf16 %v4994_v58 }
  0xbb   : > { %v549_v63 = vsel %vm541_vm2, %v5000_v57, %v5001_v56 }
  0xbc   : > { %v5009_v0 = vpop.permute.xlu1 %5008  ;;  %v547_v1 = vsel %vm541_vm2, %v4995_v60, %v4996_v59  ;;  %v4542_v2 = vpack.c.bf16 %v549_v63, %v545_v62  ;;  %v548_v4 = vsel %vm541_vm2, %v4996_v59, %v5000_v57 }
  0xbd   : > { %v5004_v5 = vpop.permute.xlu0 %5003  ;;  %v4502_v6 = vpack.c.bf16 %v547_v1, %v543_v61  ;;  %v4544_v7 = vpack.c.bf16 %v548_v4, %v544_v3  ;;  %v5011_v10 = vunpack.i.h.bf16 %v5009_v0  ;;  %v5010_v11 = vunpack.i.l.bf16 %v5009_v0 }
  0xbe   : > { %v5006_v8 = vunpack.i.h.bf16 %v5004_v5  ;;  %v5005_v9 = vunpack.i.l.bf16 %v5004_v5  ;;  %4543 = vmatprep.subr.bf16.mxu1 %v4542_v2 }
  0xbf   : > { %4503 = vmatprep.subr.bf16.mxu0 %v4502_v6  ;;  %4545 = vmatpush1.bf16.msra.mxu1 %v4544_v7  ;;  %v551_v35 = vsel %vm541_vm2, %v5010_v11, %v5011_v10 }
  0xc0   : > { %v5019_v12 = vpop.permute.xlu1 %5018  ;;  %v542_v13 = vsel %vm541_vm2, %v5005_v9, %v4985_v54  ;;  %v546_v14 = vsel %vm541_vm2, %v5006_v8, %v4995_v60 }
  0xc1   : > { %v5021_v15 = vunpack.i.h.bf16 %v5019_v12  ;;  %v5020_v19 = vunpack.i.l.bf16 %v5019_v12  ;;  %v5014_v23 = vpop.permute.xlu0 %5013  ;;  %v4504_v26 = vpack.c.bf16 %v546_v14, %v542_v13 }
  0xc2   : > { %v5016_v27 = vunpack.i.h.bf16 %v5014_v23  ;;  %v5015_v30 = vunpack.i.l.bf16 %v5014_v23 }
  0xc3   : > { %4505 = vmatpush1.bf16.msra.mxu0 %v4504_v26  ;;  %v555_v37 = vsel %vm541_vm2, %v5020_v19, %v5021_v15 }
  0xc4   : > { %v5029_v40 = vpop.permute.xlu1 %5028  ;;  %v4506_v41 = vpack.c.bf16 %v555_v37, %v551_v35  ;;  %v553_v49 = vsel %vm541_vm2, %v5015_v30, %v5016_v27  ;;  %v552_v53 = vsel %vm541_vm2, %v5011_v10, %v5015_v30 }
  0xc5   : > { %v5031_v42 = vunpack.i.h.bf16 %v5029_v40  ;;  %v5030_v43 = vunpack.i.l.bf16 %v5029_v40  ;;  %v5024_v44 = vpop.permute.xlu0 %5023 }
  0xc6   : > { %v5026_v45 = vunpack.i.h.bf16 %v5024_v44  ;;  %v5025_v46 = vunpack.i.l.bf16 %v5024_v44  ;;  %4507 = vmatprep.subr.bf16.mxu0 %v4506_v41 }
  0xc7   : > { %v550_v47 = vsel %vm541_vm2, %v5030_v43, %v5010_v11  ;;  %v554_v48 = vsel %vm541_vm2, %v5031_v42, %v5020_v19 }
  0xc8   : > { %v5039_v50 = vpop.permute.xlu1 %5038  ;;  %v4508_v51 = vpack.c.bf16 %v554_v48, %v550_v47  ;;  %v557_v52 = vsel %vm541_vm2, %v5025_v46, %v5026_v45  ;;  %v556_v54 = vsel %vm541_vm2, %v5021_v15, %v5025_v46 }
  0xc9   : > { %v5034_v55 = vpop.permute.xlu0 %5033  ;;  %v4546_v56 = vpack.c.bf16 %v557_v52, %v553_v49  ;;  %v4548_v57 = vpack.c.bf16 %v556_v54, %v552_v53  ;;  %v5041_v58 = vunpack.i.h.bf16 %v5039_v50  ;;  %v5040_v59 = vunpack.i.l.bf16 %v5039_v50 }
  0xca   : > { %4509 = vmatpush1.bf16.msra.mxu0 %v4508_v51  ;;  %v5036_v60 = vunpack.i.h.bf16 %v5034_v55  ;;  %v5035_v61 = vunpack.i.l.bf16 %v5034_v55 }
  0xcb   : > { %4547 = vmatprep.subr.bf16.mxu1 %v4546_v56  ;;  %v674_v5 = vsel %vm670_vm3, %v5040_v59, %v5041_v58 }
  0xcc   : > { %4549 = vmatpush1.bf16.msra.mxu1 %v4548_v57  ;;  %v5049_v62 = vpop.permute.xlu1 %5048  ;;  %v672_v4 = vsel %vm670_vm3, %v5035_v61, %v5036_v60  ;;  %v673_v10 = vsel %vm670_vm3, %v5036_v60, %v5040_v59 }
  0xcd   : > { %v5051_v63 = vunpack.i.h.bf16 %v5049_v62  ;;  %v5050_v0 = vunpack.i.l.bf16 %v5049_v62  ;;  %v5044_v1 = vpop.permute.xlu0 %5043 }
  0xce   : > { %v5046_v2 = vunpack.i.h.bf16 %v5044_v1  ;;  %v5045_v3 = vunpack.i.l.bf16 %v5044_v1 }
  0xcf   : > { %v678_v6 = vsel %vm670_vm3, %v5050_v0, %v5051_v63 }
  0xd0   : > { %v5059_v7 = vpop.permute.xlu1 %5058  ;;  %v676_v8 = vsel %vm670_vm3, %v5045_v3, %v5046_v2  ;;  %v4550_v9 = vpack.c.bf16 %v678_v6, %v674_v5  ;;  %v677_v11 = vsel %vm670_vm3, %v5046_v2, %v5050_v0 }
  0xd1   : > { %v5054_v12 = vpop.permute.xlu0 %5053  ;;  %v4510_v13 = vpack.c.bf16 %v676_v8, %v672_v4  ;;  %v4552_v14 = vpack.c.bf16 %v677_v11, %v673_v10  ;;  %v5061_v23 = vunpack.i.h.bf16 %v5059_v7  ;;  %v5060_v26 = vunpack.i.l.bf16 %v5059_v7 }
  0xd2   : > { %v5056_v15 = vunpack.i.h.bf16 %v5054_v12  ;;  %v5055_v19 = vunpack.i.l.bf16 %v5054_v12  ;;  %4551 = vmatprep.subr.bf16.mxu1 %v4550_v9 }
  0xd3   : > { %4511 = vmatprep.subr.bf16.mxu0 %v4510_v13  ;;  %4553 = vmatpush1.bf16.msra.mxu1 %v4552_v14  ;;  %v680_v45 = vsel %vm670_vm3, %v5060_v26, %v5061_v23 }
  0xd4   : > { %v5069_v27 = vpop.permute.xlu1 %5068  ;;  %v671_v30 = vsel %vm670_vm3, %v5055_v19, %v5035_v61  ;;  %v675_v35 = vsel %vm670_vm3, %v5056_v15, %v5045_v3 }
  0xd5   : > { %v5071_v37 = vunpack.i.h.bf16 %v5069_v27  ;;  %v5070_v40 = vunpack.i.l.bf16 %v5069_v27  ;;  %v5064_v41 = vpop.permute.xlu0 %5063  ;;  %v4512_v42 = vpack.c.bf16 %v675_v35, %v671_v30 }
  0xd6   : > { %v5066_v43 = vunpack.i.h.bf16 %v5064_v41  ;;  %v5065_v44 = vunpack.i.l.bf16 %v5064_v41 }
  0xd7   : > { %4513 = vmatpush1.bf16.msra.mxu0 %v4512_v42  ;;  %v684_v46 = vsel %vm670_vm3, %v5070_v40, %v5071_v37 }
  0xd8   : > { %v5079_v47 = vpop.permute.xlu1 %5078  ;;  %v4514_v48 = vpack.c.bf16 %v684_v46, %v680_v45  ;;  %v682_v56 = vsel %vm670_vm3, %v5065_v44, %v5066_v43  ;;  %v681_v60 = vsel %vm670_vm3, %v5061_v23, %v5065_v44 }
  0xd9   : > { %v5081_v49 = vunpack.i.h.bf16 %v5079_v47  ;;  %v5080_v50 = vunpack.i.l.bf16 %v5079_v47  ;;  %v5074_v51 = vpop.permute.xlu0 %5073 }
  0xda   : > { %v5076_v52 = vunpack.i.h.bf16 %v5074_v51  ;;  %v5075_v53 = vunpack.i.l.bf16 %v5074_v51  ;;  %4515 = vmatprep.subr.bf16.mxu0 %v4514_v48 }
  0xdb   : > { %v679_v54 = vsel %vm670_vm3, %v5080_v50, %v5060_v26  ;;  %v683_v55 = vsel %vm670_vm3, %v5081_v49, %v5070_v40 }
  0xdc   : > { %v5089_v57 = vpop.permute.xlu1 %5088  ;;  %v4516_v58 = vpack.c.bf16 %v683_v55, %v679_v54  ;;  %v686_v59 = vsel %vm670_vm3, %v5075_v53, %v5076_v52  ;;  %v685_v61 = vsel %vm670_vm3, %v5071_v37, %v5075_v53 }
  0xdd   : > { %v5084_v62 = vpop.permute.xlu0 %5083  ;;  %v4554_v63 = vpack.c.bf16 %v686_v59, %v682_v56  ;;  %v4556_v0 = vpack.c.bf16 %v685_v61, %v681_v60  ;;  %v5091_v1 = vunpack.i.h.bf16 %v5089_v57  ;;  %v5090_v2 = vunpack.i.l.bf16 %v5089_v57 }
  0xde   : > { %4517 = vmatpush1.bf16.msra.mxu0 %v4516_v58  ;;  %v5086_v3 = vunpack.i.h.bf16 %v5084_v62  ;;  %v5085_v4 = vunpack.i.l.bf16 %v5084_v62 }
  0xdf   : > { %4555 = vmatprep.subr.bf16.mxu1 %v4554_v63  ;;  %v803_v12 = vsel %vm799_vm4, %v5090_v2, %v5091_v1 }
  0xe0   : > { %4557 = vmatpush1.bf16.msra.mxu1 %v4556_v0  ;;  %v5099_v5 = vpop.permute.xlu1 %5098  ;;  %v801_v11 = vsel %vm799_vm4, %v5085_v4, %v5086_v3  ;;  %v802_v23 = vsel %vm799_vm4, %v5086_v3, %v5090_v2  ;;  %v4526_v0 = vpack.c.bf16 %v6071_v17, %v6079_v20  ;;  %v4530_v17 = vpack.c.bf16 %v6115_v32, %v6105_v29  ;;  %v887_v29 = vld [vmem:[%s8152_s2 + $0x38] sm:$0xff] }
  0xe1   : > { %v5101_v6 = vunpack.i.h.bf16 %v5099_v5  ;;  %v5100_v7 = vunpack.i.l.bf16 %v5099_v5  ;;  %v5094_v8 = vpop.permute.xlu0 %5093  ;;  %v4568_v20 = vpack.c.bf16 %v6082_v21, %v6090_v24  ;;  %v883_v21 = vld [vmem:[%s8152_s2 + $0x18] sm:$0xff]  ;;  %v882_v24 = vld [vmem:[%s8152_s2 + $0x10] sm:$0xff]  ;;  %v1176_v32 = vlaneseq }
  0xe2   : > { %v5096_v9 = vunpack.i.h.bf16 %v5094_v8  ;;  %v5095_v10 = vunpack.i.l.bf16 %v5094_v8  ;;  %v4528_v8 = vpack.c.bf16 %v6068_v16, %v6074_v18  ;;  %v4572_v16 = vpack.c.bf16 %v6131_v38, %v6118_v33  ;;  %v880_v18 = vld [vmem:[%s8152_s2] sm:$0xff] }
  0xe3   : > { %v807_v13 = vsel %vm799_vm4, %v5100_v7, %v5101_v6  ;;  %v330_v33 = vld [vmem:[%s287_s30] sm:$0xf] }
  0xe4   : > { %v5109_v14 = vpop.permute.xlu1 %5108  ;;  %v805_v15 = vsel %vm799_vm4, %v5095_v10, %v5096_v9  ;;  %v4558_v19 = vpack.c.bf16 %v807_v13, %v803_v12  ;;  %v806_v26 = vsel %vm799_vm4, %v5096_v9, %v5100_v7  ;;  %v4566_v7 = vpack.c.bf16 %v6085_v22, %v6093_v25  ;;  %v885_v25 = vld [vmem:[%s8152_s2 + $0x28] sm:$0xff] }
  0xe5   : > { %v5104_v27 = vpop.permute.xlu0 %5103  ;;  %v4518_v30 = vpack.c.bf16 %v805_v15, %v801_v11  ;;  %v4560_v35 = vpack.c.bf16 %v806_v26, %v802_v23  ;;  %v5111_v41 = vunpack.i.h.bf16 %v5109_v14  ;;  %v5110_v42 = vunpack.i.l.bf16 %v5109_v14 }
  0xe6   : > { %v5106_v37 = vunpack.i.h.bf16 %v5104_v27  ;;  %v5105_v40 = vunpack.i.l.bf16 %v5104_v27  ;;  %4559 = vmatprep.subr.bf16.mxu1 %v4558_v19  ;;  %v4570_v9 = vpack.c.bf16 %v6134_v39, %v6121_v34  ;;  %v4532_v22 = vpack.c.bf16 %v6112_v31, %v6102_v28  ;;  %v884_v28 = vld [vmem:[%s8152_s2 + $0x20] sm:$0xff]  ;;  %v886_v31 = vld [vmem:[%s8152_s2 + $0x30] sm:$0xff] }
  0xe7   : > { %4519 = vmatprep.subr.bf16.mxu0 %v4518_v30  ;;  %4561 = vmatpush1.bf16.msra.mxu1 %v4560_v35  ;;  %v809_v52 = vsel %vm799_vm4, %v5110_v42, %v5111_v41  ;;  %v1177_v34 = vshrl.u32 %v1176_v32, 7  ;;  %vm331_vm5 = vcmp.ne.f32.partialorder %v330_v33, 0.0  ;;  %v5967_v39 = vmov 0  }
  0xe8   : > { %v5119_v43 = vpop.permute.xlu1 %5118  ;;  %v800_v44 = vsel %vm799_vm4, %v5105_v40, %v5085_v4  ;;  %v804_v45 = vsel %vm799_vm4, %v5106_v37, %v5095_v10  ;;  %v1175_v10 = vsel %vm331_vm5, 1, %v5967_v39  ;;  %vm2466_vm5 = vcmask 146432  }
  0xe9   : > { %v5121_v46 = vunpack.i.h.bf16 %v5119_v43  ;;  %v5120_v47 = vunpack.i.l.bf16 %v5119_v43  ;;  %v5114_v48 = vpop.permute.xlu0 %5113  ;;  %v4520_v49 = vpack.c.bf16 %v804_v45, %v800_v44  ;;  %v1178_v38 = vsub.s32 0, %v1177_v34 }
  0xea   : > { %v5116_v50 = vunpack.i.h.bf16 %v5114_v48  ;;  %v5115_v51 = vunpack.i.l.bf16 %v5114_v48  ;;  %v1182_v11 = vsub.s32 1, %v1177_v34  ;;  %v1186_v12 = vsub.s32 2, %v1177_v34 }
  0xeb   : > { %4521 = vmatpush1.bf16.msra.mxu0 %v4520_v49  ;;  %v813_v53 = vsel %vm799_vm4, %v5120_v47, %v5121_v46  ;;  %v1190_v13 = vsub.s32 3, %v1177_v34  ;;  %v6331_v14 = vrot.slane %v1175_v10, %v1178_v38 }
  0xec   : > { %v5129_v54 = vpop.permute.xlu1 %5128  ;;  %v4522_v55 = vpack.c.bf16 %v813_v53, %v809_v52  ;;  %v811_v63 = vsel %vm799_vm4, %v5115_v51, %v5116_v50  ;;  %v810_v3 = vsel %vm799_vm4, %v5111_v41, %v5115_v51  ;;  %v6333_v15 = vrot.slane %v1175_v10, %v1182_v11 }
  0xed   : > { %v5131_v56 = vunpack.i.h.bf16 %v5129_v54  ;;  %v5130_v57 = vunpack.i.l.bf16 %v5129_v54  ;;  %v5124_v58 = vpop.permute.xlu0 %5123  ;;  %8225 = vst [vmem:[#allocation6_spill] sm:$0xff] %v6331_v14  ;;  %v6335_v19 = vrot.slane %v1175_v10, %v1186_v12  ;;  %v6337_v23 = vrot.slane %v1175_v10, %v1190_v13 }
  0xee   : > { %v5126_v59 = vunpack.i.h.bf16 %v5124_v58  ;;  %v5125_v60 = vunpack.i.l.bf16 %v5124_v58  ;;  %4523 = vmatprep.subr.bf16.mxu0 %v4522_v55  ;;  %8226 = vst [vmem:[#allocation7_spill] sm:$0xff] %v6333_v15  ;;  %vm1192_vm6 = vcmp.eq.s32.totalorder %v6331_v14, 1  ;;  %vm1193_vm7 = vcmp.eq.s32.totalorder %v6333_v15, 1 }
  0xef   : > { %v808_v61 = vsel %vm799_vm4, %v5130_v57, %v5110_v42  ;;  %v812_v62 = vsel %vm799_vm4, %v5131_v56, %v5120_v47  ;;  %8227 = vst [vmem:[#allocation8_spill] sm:$0xff] %v6335_v19  ;;  %8228 = vst [vmem:[#allocation9_spill] sm:$0xff] %v6337_v23  ;;  %vm1194_vm8 = vcmp.eq.s32.totalorder %v6335_v19, 1  ;;  %vm1195_vm9 = vcmp.eq.s32.totalorder %v6337_v23, 1 }
  0xf0   : > { %v4524_v1 = vpack.c.bf16 %v812_v62, %v808_v61  ;;  %v815_v2 = vsel %vm799_vm4, %v5125_v60, %v5126_v59  ;;  %v814_v4 = vsel %vm799_vm4, %v5121_v46, %v5125_v60 }
  0xf1   : > { %v4562_v5 = vpack.c.bf16 %v815_v2, %v811_v63  ;;  %v4564_v6 = vpack.c.bf16 %v814_v4, %v810_v3 }
  0xf2   : > { %4525 = vmatpush1.bf16.msra.mxu0 %v4524_v1 }
  0xf3   : > { %4563 = vmatprep.subr.bf16.mxu1 %v4562_v5  ;;  %4527 = vmatprep.subr.bf16.mxu0 %v4526_v0 }
  0xf4   : > { %4565 = vmatpush1.bf16.msra.mxu1 %v4564_v6 }
  0xf5   : > { %4567 = vmatprep.subr.bf16.mxu1 %v4566_v7 }
  0xf6   : > { %4529 = vmatpush1.bf16.msra.mxu0 %v4528_v8 }
  0xf7   : > { %4531 = vmatprep.subr.bf16.mxu0 %v4530_v17 }
  0xf8   : > { %4569 = vmatpush1.bf16.msra.mxu1 %v4568_v20 }
  0xf9   : > { %4571 = vmatprep.subr.bf16.mxu1 %v4570_v9 }
  0xfa   : > { %4533 = vmatpush1.bf16.msra.mxu0 %v4532_v22 }
  0xfc   : > { %4573 = vmatpush1.bf16.msra.mxu1 %v4572_v16 }
  0xfd   : > { %1046 = vmatmul.mubr.f32.vlgmr.msra.gmra.mrb[0].mxu0 %v880_v18 }
  0xfe   : > { %4432 = vmatprep.mubr.msk.f32.mxu0 %vm968_vm0, %v883_v21 }
  0xff   : > { %1135 = vmatmul.mubr.f32.vlgmr.msra.gmra.mrb[0].mxu1 %v880_v18 }
 0x100   : > { %4436 = vmatprep.mubr.msk.f32.mxu1 %vm968_vm0, %v883_v21 }
 0x101   : > { %1052 = vmatmul.mubr.f32.gmra.mrb[2].mxu0 %v882_v24 }
 0x102   : > { %4433 = vmatprep.mubr.msk.f32.mxu0 %vm968_vm0, %v885_v25 }
 0x103   : > { %1141 = vmatmul.mubr.f32.gmra.mrb[2].mxu1 %v882_v24 }
 0x104   : > { %4437 = vmatprep.mubr.msk.f32.mxu1 %vm968_vm0, %v885_v25 }
 0x105   : > { %1058 = vmatmul.mubr.f32.gmra.mrb[4].mxu0 %v884_v28 }
 0x106   : > { %4434 = vmatprep.mubr.msk.f32.mxu0 %vm968_vm0, %v887_v29 }
 0x107   : > { %1147 = vmatmul.mubr.f32.gmra.mrb[4].mxu1 %v884_v28 }
 0x108   : > { %4438 = vmatprep.mubr.msk.f32.mxu1 %vm968_vm0, %v887_v29 }
 0x109   : > { %1064 = vmatmul.mubr.f32.gmra.mrb[6].mxu0 %v886_v31 }
 0x10b   : > { %1153 = vmatmul.mubr.f32.gmra.mrb[6].mxu1 %v886_v31 }
 0x1d0   : > { %v1047_v26 = vpop.f32.mrb[0].mxu0 }
 0x1d1   : > { %v1159_v27 = vmax.f32 %v1047_v26, 0.0  ;;  %v1049_v30 = vpop.f32.mrb[1].mxu0 }
 0x1d2   : > { %v1160_v35 = vmax.f32 %v1049_v30, 0.0  ;;  %v1136_v37 = vpop.f32.mrb[0].mxu1 }
 0x1d3   : > { %v1196_v40 = vsel %vm1192_vm6, %v1159_v27, 0.0  ;;  %v1161_v41 = vmax.f32 %v1136_v37, 0.0  ;;  %v1138_v42 = vpop.f32.mrb[1].mxu1 }
 0x1d4   : > { %v1197_v43 = vsel %vm1193_vm7, %v1160_v35, 0.0  ;;  %v1162_v44 = vmax.f32 %v1138_v42, 0.0  ;;  %v1053_v45 = vpop.f32.mrb[2].mxu0 }
 0x1d5   : > { %v1198_v46 = vsel %vm1194_vm8, %v1161_v41, 0.0  ;;  %v1163_v47 = vmax.f32 %v1053_v45, 0.0  ;;  %v1055_v48 = vpop.f32.mrb[3].mxu0  ;;  %v6349_v49 = vpack.i.bf16 %v1197_v43, %v1196_v40  ;;  %v6469_v40 = vpop.permute.xlu0 %5133 }
 0x1d6   : > { %v1199_v50 = vsel %vm1195_vm9, %v1162_v44, 0.0  ;;  %v1164_v51 = vmax.f32 %v1055_v48, 0.0  ;;  %v1142_v52 = vpop.f32.mrb[2].mxu1 }
 0x1d7   : > { %v1200_v53 = vsel %vm1192_vm6, %v1163_v47, 0.0  ;;  %v6355_v54 = vpack.c.bf16 %v1163_v47, %v1159_v27  ;;  %v1165_v55 = vmax.f32 %v1142_v52, 0.0  ;;  %v1144_v56 = vpop.f32.mrb[3].mxu1  ;;  %5223 = vrot.lane.b32.xlu0 %v6349_v49, %s5961_s18  ;;  %v6359_v57 = vpack.i.bf16 %v1199_v50, %v1198_v46 }
 0x1d8   : > { %v1201_v58 = vsel %vm1193_vm7, %v1164_v51, 0.0  ;;  %v6363_v59 = vpack.c.bf16 %v1164_v51, %v1160_v35  ;;  %v1166_v60 = vmax.f32 %v1144_v56, 0.0  ;;  %v1059_v61 = vpop.f32.mrb[4].mxu0 }
 0x1d9   : > { %8229 = vst [vmem:[#allocation10_spill] sm:$0xff] %v6355_v54  ;;  %v1202_v62 = vsel %vm1194_vm8, %v1165_v55, 0.0  ;;  %v6367_v63 = vpack.c.bf16 %v1165_v55, %v1161_v41  ;;  %5228 = vrot.lane.b32.xlu1 %v6359_v57, %s5961_s18  ;;  %v1061_v0 = vpop.f32.mrb[5].mxu0  ;;  %v6381_v7 = vpack.i.bf16 %v1201_v58, %v1200_v53  ;;  %v1167_v9 = vmax.f32 %v1059_v61, 0.0  ;;  %v6473_v41 = vpop.permute.xlu1 %5138 }
 0x1da   : > { %8230 = vst [vmem:[#allocation11_spill] sm:$0xff] %v6363_v59  ;;  %v1203_v1 = vsel %vm1195_vm9, %v1166_v60, 0.0  ;;  %v6373_v2 = vpack.c.bf16 %v1166_v60, %v1162_v44  ;;  %v1148_v3 = vpop.f32.mrb[4].mxu1  ;;  %v1168_v22 = vmax.f32 %v1061_v0, 0.0  ;;  %v6479_v42 = vpop.permute.xlu0 %5143 }
 0x1db   : > { %8231 = vst [vmem:[#allocation12_spill] sm:$0xff] %v6367_v63  ;;  %5233 = vrot.lane.b32.xlu0 %v6349_v49, %s5962_s20  ;;  %v1150_v4 = vpop.f32.mrb[5].mxu1  ;;  %v6379_v6 = vpack.i.bf16 %v1203_v1, %v1202_v62  ;;  %v1204_v21 = vsel %vm1192_vm6, %v1167_v9, 0.0  ;;  %v1169_v24 = vmax.f32 %v1148_v3, 0.0 }
 0x1dc   : > { %8232 = vst [vmem:[#allocation13_spill] sm:$0xff] %v6373_v2  ;;  %v1065_v5 = vpop.f32.mrb[6].mxu0  ;;  %v1170_v25 = vmax.f32 %v1150_v4, 0.0  ;;  %v1205_v28 = vsel %vm1193_vm7, %v1168_v22, 0.0 }
 0x1dd   : > { %5238 = vrot.lane.b32.xlu1 %v6359_v57, %s5962_s20  ;;  %v1067_v8 = vpop.f32.mrb[7].mxu0  ;;  %v1171_v16 = vmax.f32 %v1065_v5, 0.0  ;;  %v1206_v34 = vsel %vm1194_vm8, %v1169_v24, 0.0  ;;  %v6407_v11 = vpack.i.bf16 %v1205_v28, %v1204_v21  ;;  %v6483_v43 = vpop.permute.xlu1 %5148 }
 0x1de   : > { %v1154_v17 = vpop.f32.mrb[6].mxu1  ;;  %v1172_v18 = vmax.f32 %v1067_v8, 0.0  ;;  %v1207_v38 = vsel %vm1195_vm9, %v1170_v25, 0.0  ;;  %v6489_v44 = vpop.permute.xlu0 %5153 }
 0x1df   : > { %5243 = vrot.lane.b32.xlu0 %v6349_v49, %s5963_s23  ;;  %v1156_v20 = vpop.f32.mrb[7].mxu1  ;;  %v1208_v29 = vsel %vm1192_vm6, %v1171_v16, 0.0  ;;  %v6395_v31 = vpack.c.bf16 %v1171_v16, %v1167_v9  ;;  %v1173_v39 = vmax.f32 %v1154_v17, 0.0  ;;  %v6409_v12 = vpack.i.bf16 %v1207_v38, %v1206_v34 }
 0x1e0   : > { %v1209_v32 = vsel %vm1193_vm7, %v1172_v18, 0.0  ;;  %v6399_v33 = vpack.c.bf16 %v1172_v18, %v1168_v22  ;;  %v1174_v10 = vmax.f32 %v1156_v20, 0.0 }
 0x1e1   : > { %5248 = vrot.lane.b32.xlu1 %v6359_v57, %s5963_s23  ;;  %8233 = vst [vmem:[#allocation14_spill] sm:$0xff] %v6395_v31  ;;  %v1210_v13 = vsel %vm1194_vm8, %v1173_v39, 0.0  ;;  %v6415_v26 = vpack.c.bf16 %v1173_v39, %v1169_v24  ;;  %v6425_v35 = vpack.i.bf16 %v1209_v32, %v1208_v29  ;;  %v6493_v45 = vpop.permute.xlu1 %5158  ;;  %v5136_v31 = vunpack.i.h.bf16 %v6469_v40 }
 0x1e2   : > { %8234 = vst [vmem:[#allocation15_spill] sm:$0xff] %v6399_v33  ;;  %v1211_v27 = vsel %vm1195_vm9, %v1174_v10, 0.0  ;;  %v6419_v30 = vpack.c.bf16 %v1174_v10, %v1170_v25  ;;  %8237 = vst [vmem:[#allocation18_spill] sm:$0xff] %v6493_v45  ;;  %v6499_v46 = vpop.permute.xlu0 %5163 }
 0x1e3   : > { %5253 = vrot.lane.b32.xlu0 %v6349_v49, %s5964_s24  ;;  %8235 = vst [vmem:[#allocation16_spill] sm:$0xff] %v6415_v26  ;;  %v6427_v37 = vpack.i.bf16 %v1211_v27, %v1210_v13  ;;  %v5135_v26 = vunpack.i.l.bf16 %v6469_v40 }
 0x1e4   : > { %8236 = vst [vmem:[#allocation17_spill] sm:$0xff] %v6419_v30 }
 0x1e5   : > { %5258 = vrot.lane.b32.xlu1 %v6359_v57, %s5964_s24  ;;  %v6503_v47 = vpop.permute.xlu1 %5168 }
 0x1e6   : > { %8238 = vst [vmem:[#allocation19_spill] sm:$0xff] %v6503_v47  ;;  %v6509_v48 = vpop.permute.xlu0 %5173 }
 0x1e7   : > { %5263 = vrot.lane.b32.xlu0 %v6349_v49, %s5965_s27 }
 0x1e9   : > { %5268 = vrot.lane.b32.xlu1 %v6359_v57, %s5965_s27  ;;  %v6513_v50 = vpop.permute.xlu1 %5178 }
 0x1ea   : > { %8239 = vst [vmem:[#allocation20_spill] sm:$0xff] %v6513_v50  ;;  %v6519_v51 = vpop.permute.xlu0 %5183 }
 0x1eb   : > { %5273 = vrot.lane.b32.xlu0 %v6349_v49, %s5966_s28 }
 0x1ed   : > { %5278 = vrot.lane.b32.xlu1 %v6359_v57, %s5966_s28  ;;  %v6523_v52 = vpop.permute.xlu1 %5188 }
 0x1ee   : > { %8240 = vst [vmem:[#allocation21_spill] sm:$0xff] %v6523_v52  ;;  %v6529_v53 = vpop.permute.xlu0 %5193 }
 0x1ef   : > { %5283 = vrot.lane.b32.xlu0 %v6349_v49, %s5956_s12  ;;  %8241 = vst [vmem:[#allocation22_spill] sm:$0xff] %v6529_v53 }
 0x1f1   : > { %5288 = vrot.lane.b32.xlu1 %v6359_v57, %s5956_s12  ;;  %v6533_v55 = vpop.permute.xlu1 %5198 }
 0x1f2   : > { %8242 = vst [vmem:[#allocation23_spill] sm:$0xff] %v6533_v55  ;;  %v6539_v56 = vpop.permute.xlu0 %5203 }
 0x1f3   : > { %5293 = vrot.lane.b32.xlu0 %v6349_v49, %s5958_s13  ;;  %8243 = vst [vmem:[#allocation24_spill] sm:$0xff] %v6539_v56 }
 0x1f5   : > { %5298 = vrot.lane.b32.xlu1 %v6359_v57, %s5958_s13  ;;  %v6543_v58 = vpop.permute.xlu1 %5208 }
 0x1f6   : > { %8244 = vst [vmem:[#allocation25_spill] sm:$0xff] %v6543_v58  ;;  %v6549_v60 = vpop.permute.xlu0 %5213 }
 0x1f7   : > { %5303 = vrot.lane.b32.xlu0 %v6349_v49, %s5959_s14 }
 0x1f9   : > { %5308 = vrot.lane.b32.xlu1 %v6359_v57, %s5959_s14  ;;  %v6553_v61 = vpop.permute.xlu1 %5218 }
 0x1fa   : > { %8245 = vst [vmem:[#allocation26_spill] sm:$0xff] %v6553_v61 }
 0x1fb   : > { %5313 = vrot.lane.b32.xlu0 %v6349_v49, %s5968_s6 }
 0x1fd   : > { %5323 = vrot.lane.b32.xlu1 %v6379_v6, %s5961_s18 }
 0x1ff   : > { %5318 = vrot.lane.b32.xlu0 %v6381_v7, %s5961_s18 }
 0x201   : > { %5333 = vrot.lane.b32.xlu1 %v6379_v6, %s5962_s20 }
 0x203   : > { %5328 = vrot.lane.b32.xlu0 %v6381_v7, %s5962_s20 }
 0x205   : > { %5343 = vrot.lane.b32.xlu1 %v6379_v6, %s5963_s23 }
 0x207   : > { %5338 = vrot.lane.b32.xlu0 %v6381_v7, %s5963_s23 }
 0x209   : > { %5353 = vrot.lane.b32.xlu1 %v6379_v6, %s5964_s24 }
 0x20b   : > { %5348 = vrot.lane.b32.xlu0 %v6381_v7, %s5964_s24 }
 0x20d   : > { %5363 = vrot.lane.b32.xlu1 %v6379_v6, %s5965_s27 }
 0x20f   : > { %5358 = vrot.lane.b32.xlu0 %v6381_v7, %s5965_s27 }
 0x211   : > { %5373 = vrot.lane.b32.xlu1 %v6379_v6, %s5966_s28 }
 0x213   : > { %5368 = vrot.lane.b32.xlu0 %v6381_v7, %s5966_s28 }
 0x215   : > { %5383 = vrot.lane.b32.xlu1 %v6379_v6, %s5956_s12 }
 0x217   : > { %5378 = vrot.lane.b32.xlu0 %v6381_v7, %s5956_s12 }
 0x219   : > { %5393 = vrot.lane.b32.xlu1 %v6379_v6, %s5958_s13 }
 0x21b   : > { %5388 = vrot.lane.b32.xlu0 %v6381_v7, %s5958_s13 }
 0x21d   : > { %5403 = vrot.lane.b32.xlu1 %v6379_v6, %s5959_s14 }
 0x21f   : > { %5398 = vrot.lane.b32.xlu0 %v6381_v7, %s5959_s14 }
 0x221   : > { %5408 = vrot.lane.b32.xlu1 %v6407_v11, %s5961_s18 }
 0x223   : > { %5413 = vrot.lane.b32.xlu0 %v6409_v12, %s5961_s18 }
 0x225   : > { %5418 = vrot.lane.b32.xlu1 %v6407_v11, %s5962_s20 }
 0x227   : > { %5423 = vrot.lane.b32.xlu0 %v6409_v12, %s5962_s20 }
 0x229   : > { %5428 = vrot.lane.b32.xlu1 %v6407_v11, %s5963_s23 }
 0x22b   : > { %5433 = vrot.lane.b32.xlu0 %v6409_v12, %s5963_s23 }
 0x22d   : > { %5438 = vrot.lane.b32.xlu1 %v6407_v11, %s5964_s24 }
 0x22f   : > { %5443 = vrot.lane.b32.xlu0 %v6409_v12, %s5964_s24 }
 0x231   : > { %5448 = vrot.lane.b32.xlu1 %v6407_v11, %s5965_s27 }
 0x233   : > { %5453 = vrot.lane.b32.xlu0 %v6409_v12, %s5965_s27 }
 0x235   : > { %5458 = vrot.lane.b32.xlu1 %v6407_v11, %s5966_s28 }
 0x237   : > { %5463 = vrot.lane.b32.xlu0 %v6409_v12, %s5966_s28 }
 0x239   : > { %5468 = vrot.lane.b32.xlu1 %v6407_v11, %s5956_s12 }
 0x23b   : > { %5473 = vrot.lane.b32.xlu0 %v6409_v12, %s5956_s12 }
 0x23d   : > { %5478 = vrot.lane.b32.xlu1 %v6407_v11, %s5958_s13 }
 0x23f   : > { %5483 = vrot.lane.b32.xlu0 %v6409_v12, %s5958_s13 }
 0x241   : > { %5488 = vrot.lane.b32.xlu1 %v6407_v11, %s5959_s14 }
 0x243   : > { %5493 = vrot.lane.b32.xlu0 %v6409_v12, %s5959_s14 }
 0x245   : > { %5498 = vrot.lane.b32.xlu1 %v6425_v35, %s5961_s18 }
 0x247   : > { %5508 = vrot.lane.b32.xlu0 %v6427_v37, %s5961_s18  ;;  %s5969_s18 = smov 2  }
 0x249   : > { %5503 = vrot.lane.b32.xlu1 %v6359_v57, %s5968_s6  ;;  %v6559_v62 = vpop.permute.xlu0 %5223 }
 0x24a   : > { %v5225_v39 = vunpack.i.l.bf16 %v6559_v62  ;;  %v5226_v13 = vunpack.i.h.bf16 %v6559_v62  ;;  %v8247_v62 = vmov 0.0  }
 0x24b   : > { %v5229_v0 = vpop.permute.xlu1 %5228  ;;  %5513 = vrot.lane.b32.xlu0 %v6381_v7, %s5968_s6 }
 0x24c   : > { %v5231_v34 = vunpack.i.h.bf16 %v5229_v0  ;;  %v5230_v38 = vunpack.i.l.bf16 %v5229_v0  ;;  %v1309_v14 = vsel %vm1308_vm10, %v5135_v26, %v5225_v39 }
 0x24d   : > { %5518 = vrot.lane.b32.xlu1 %v6425_v35, %s5962_s20  ;;  %v6565_v1 = vpop.permute.xlu0 %5233 }
 0x24e   : > { %v1312_v54 = vsel %vm1308_vm10, %v5230_v38, %v5231_v34  ;;  %v1311_v40 = vsel %vm1308_vm10, %v5226_v13, %v5230_v38 }
 0x24f   : > { %v6567_v3 = vpop.permute.xlu1 %5238  ;;  %5528 = vrot.lane.b32.xlu0 %v6427_v37, %s5962_s20 }
 0x251   : > { %5523 = vrot.lane.b32.xlu1 %v6379_v6, %s5968_s6  ;;  %v6573_v4 = vpop.permute.xlu0 %5243 }
 0x253   : > { %v6575_v5 = vpop.permute.xlu1 %5248  ;;  %5533 = vrot.lane.b32.xlu0 %v8156_v36, %s5968_s6 }
 0x255   : > { %5538 = vrot.lane.b32.xlu1 %v6425_v35, %s5963_s23  ;;  %v6581_v8 = vpop.permute.xlu0 %5253 }
 0x256   : > { %v5256_v55 = vunpack.i.h.bf16 %v6581_v8  ;;  %v5255_v58 = vunpack.i.l.bf16 %v6581_v8 }
 0x257   : > { %v6583_v17 = vpop.permute.xlu1 %5258  ;;  %5548 = vrot.lane.b32.xlu0 %v6427_v37, %s5963_s23 }
 0x259   : > { %5543 = vrot.lane.b32.xlu1 %v6407_v11, %s5968_s6  ;;  %v6589_v20 = vpop.permute.xlu0 %5263 }
 0x25b   : > { %v6591_v9 = vpop.permute.xlu1 %5268  ;;  %5553 = vrot.lane.b32.xlu0 %v6409_v12, %s5968_s6 }
 0x25c   : > { %v5271_v8 = vunpack.i.h.bf16 %v6591_v9 }
 0x25d   : > { %5558 = vrot.lane.b32.xlu1 %v6425_v35, %s5964_s24  ;;  %v6597_v22 = vpop.permute.xlu0 %5273 }
 0x25f   : > { %v6599_v16 = vpop.permute.xlu1 %5278  ;;  %5568 = vrot.lane.b32.xlu0 %v6427_v37, %s5964_s24  ;;  %s8090_s24 = scalar_lea.vmem [#allocation5], %s6062_s10  ;;  %s4461_s10 = sshll.u32 (%p6031_p5), %s6016_s21, 5 }
 0x260   : > { %v5281_v47 = vunpack.i.h.bf16 %v6599_v16 }
 0x261   : > { %5563 = vrot.lane.b32.xlu1 %v8156_v36, %s5968_s6  ;;  %v6605_v18 = vpop.permute.xlu0 %5283 }
 0x263   : > { %v6607_v21 = vpop.permute.xlu1 %5288  ;;  %5573 = vrot.lane.b32.xlu0 %v6349_v49, %s5969_s18 }
 0x265   : > { %5578 = vrot.lane.b32.xlu1 %v6425_v35, %s5965_s27  ;;  %v6613_v24 = vpop.permute.xlu0 %5293 }
 0x267   : > { %v6615_v25 = vpop.permute.xlu1 %5298  ;;  %5588 = vrot.lane.b32.xlu0 %v6427_v37, %s5965_s27 }
 0x269   : > { %5583 = vrot.lane.b32.xlu1 %v6359_v57, %s5969_s18  ;;  %v6621_v28 = vpop.permute.xlu0 %5303 }
 0x26b   : > { %v6623_v29 = vpop.permute.xlu1 %5308  ;;  %5593 = vrot.lane.b32.xlu0 %v6381_v7, %s5969_s18 }
 0x26d   : > { %5598 = vrot.lane.b32.xlu1 %v6425_v35, %s5966_s28  ;;  %v6629_v32 = vpop.permute.xlu0 %5313 }
 0x26e   : > { %8246 = vst [vmem:[#allocation27_spill] sm:$0xff] %v6629_v32 }
 0x26f   : > { %v5324_v10 = vpop.permute.xlu1 %5323  ;;  %5608 = vrot.lane.b32.xlu0 %v6427_v37, %s5966_s28 }
 0x270   : > { %v5326_v27 = vunpack.i.h.bf16 %v5324_v10  ;;  %v5325_v36 = vunpack.i.l.bf16 %v5324_v10 }
 0x271   : > { %5603 = vrot.lane.b32.xlu1 %v6379_v6, %s5969_s18  ;;  %v5319_v33 = vpop.permute.xlu0 %5318 }
 0x272   : > { %v5321_v0 = vunpack.i.h.bf16 %v5319_v33  ;;  %v5320_v30 = vunpack.i.l.bf16 %v5319_v33  ;;  %v1316_v63 = vsel %vm1308_vm10, %v5325_v36, %v5326_v27  ;;  %v1310_v33 = vsel %vm1308_vm10, %v5225_v39, %v5226_v13 }
 0x273   : > { %v6642_v59 = vpop.permute.xlu1 %5333  ;;  %5613 = vrot.lane.b32.xlu0 %v8247_v62, %s5969_s18  ;;  %v4682_v10 = vpack.c.bf16 %v1316_v63, %v1312_v54 }
 0x274   : > { %v1315_v19 = vsel %vm1308_vm10, %v5321_v0, %v5325_v36  ;;  %v1313_v2 = vsel %vm1308_vm10, %v5136_v31, %v5320_v30  ;;  %v1314_v26 = vsel %vm1308_vm10, %v5320_v30, %v5321_v0  ;;  %v5240_v0 = vunpack.i.l.bf16 %v6567_v3 }
 0x275   : > { %4683 = vmatprep.subr.bf16.mxu1 %v4682_v10  ;;  %5618 = vrot.lane.b32.xlu1 %v6425_v35, %s5956_s12  ;;  %v6652_v34 = vpop.permute.xlu0 %5328  ;;  %v4684_v27 = vpack.c.bf16 %v1315_v19, %v1311_v40  ;;  %v4576_v15 = vpack.c.bf16 %v1313_v2, %v1309_v14  ;;  %v4574_v23 = vpack.c.bf16 %v1314_v26, %v1310_v33  ;;  %v2805_v14 = vld [vmem:[%s8153_s3 + $0x8] sm:$0xff]  ;;  %v5145_v33 = vunpack.i.l.bf16 %v6479_v42 }
 0x276   : > { %3104 = vmatprep.mubr.f32.mxu0 %v2805_v14  ;;  %3282 = vmatprep.mubr.f32.mxu1 %v2805_v14  ;;  %v5155_v14 = vunpack.i.l.bf16 %v6489_v44  ;;  %v5235_v26 = vunpack.i.l.bf16 %v6565_v1  ;;  %v5245_v10 = vunpack.i.l.bf16 %v6573_v4  ;;  %v5246_v40 = vunpack.i.h.bf16 %v6573_v4 }
 0x277   : > { %v6655_v54 = vpop.permute.xlu1 %5343  ;;  %5628 = vrot.lane.b32.xlu0 %v6427_v37, %s5956_s12  ;;  %4685 = vmatpush1.bf16.msra.mxu1 %v4684_v27  ;;  %v5236_v27 = vunpack.i.h.bf16 %v6565_v1 }
 0x278   : > { %4575 = vmatprep.subr.bf16.mxu0 %v4574_v23 }
 0x279   : > { %4577 = vmatpush1.bf16.msra.mxu0 %v4576_v15  ;;  %5623 = vrot.lane.b32.xlu1 %v6407_v11, %s5969_s18  ;;  %v6661_v36 = vpop.permute.xlu0 %5338  ;;  %v6781_v4 = vsel %vm1437_vm11, %v5236_v27, %v5240_v0 }
 0x27b   : > { %v6663_v63 = vpop.permute.xlu1 %5353  ;;  %5633 = vrot.lane.b32.xlu0 %v6409_v12, %s5969_s18 }
 0x27d   : > { %5638 = vrot.lane.b32.xlu1 %v6425_v35, %s5958_s13  ;;  %v6672_v15 = vpop.permute.xlu0 %5348 }
 0x27f   : > { %v6674_v19 = vpop.permute.xlu1 %5363  ;;  %5648 = vrot.lane.b32.xlu0 %v6427_v37, %s5958_s13 }
 0x281   : > { %5643 = vrot.lane.b32.xlu1 %v8247_v62, %s5969_s18  ;;  %v6680_v23 = vpop.permute.xlu0 %5358 }
 0x283   : > { %v6682_v2 = vpop.permute.xlu1 %5373  ;;  %5653 = vrot.lane.b32.xlu0 %v6349_v49, %s5960_s15 }
 0x285   : > { %5658 = vrot.lane.b32.xlu1 %v6425_v35, %s5959_s14  ;;  %v6688_v31 = vpop.permute.xlu0 %5368 }
 0x287   : > { %v6690_v30 = vpop.permute.xlu1 %5383  ;;  %5668 = vrot.lane.b32.xlu0 %v6427_v37, %s5959_s14 }
 0x288   : > { %8248 = vst [vmem:[#allocation28_spill] sm:$0xff] %v6690_v30 }
 0x289   : > { %5663 = vrot.lane.b32.xlu1 %v6359_v57, %s5960_s15  ;;  %v6696_v38 = vpop.permute.xlu0 %5378 }
 0x28a   : > { %8249 = vst [vmem:[#allocation29_spill] sm:$0xff] %v6696_v38  ;;  %v5285_v38 = vunpack.i.l.bf16 %v6605_v18 }
 0x28b   : > { %v6698_v39 = vpop.permute.xlu1 %5393  ;;  %5673 = vrot.lane.b32.xlu0 %v6381_v7, %s5960_s15 }
 0x28c   : > { %8250 = vst [vmem:[#allocation30_spill] sm:$0xff] %v6698_v39  ;;  %v5261_v39 = vunpack.i.h.bf16 %v6583_v17 }
 0x28d   : > { %5678 = vrot.lane.b32.xlu1 %v6425_v35, %s5968_s6  ;;  %v6704_v49 = vpop.permute.xlu0 %5388 }
 0x28e   : > { %8251 = vst [vmem:[#allocation31_spill] sm:$0xff] %v6704_v49 }
 0x28f   : > { %v6706_v13 = vpop.permute.xlu1 %5403  ;;  %5688 = vrot.lane.b32.xlu0 %v6427_v37, %s5968_s6 }
 0x290   : > { %8252 = vst [vmem:[#allocation32_spill] sm:$0xff] %v6706_v13 }
 0x291   : > { %5683 = vrot.lane.b32.xlu1 %v6379_v6, %s5960_s15  ;;  %v6712_v57 = vpop.permute.xlu0 %5398  ;;  %v5241_v6 = vunpack.i.h.bf16 %v6567_v3  ;;  %v5251_v3 = vunpack.i.h.bf16 %v6575_v5 }
 0x292   : > { %8253 = vst [vmem:[#allocation33_spill] sm:$0xff] %v6712_v57  ;;  %v5250_v57 = vunpack.i.l.bf16 %v6575_v5 }
 0x293   : > { %v6716_v7 = vpop.permute.xlu1 %5408  ;;  %5693 = vrot.lane.b32.xlu0 %v8247_v62, %s5960_s15  ;;  %v6794_v5 = vsel %vm1437_vm11, %v5240_v0, %v5241_v6  ;;  %v5266_v6 = vunpack.i.h.bf16 %v6589_v20 }
 0x295   : > { %5698 = vrot.lane.b32.xlu1 %v6425_v35, %s5969_s18  ;;  %v6730_v61 = vpop.permute.xlu0 %5413 }
 0x297   : > { %v6740_v49 = vpop.permute.xlu1 %5418  ;;  %5708 = vrot.lane.b32.xlu0 %v6427_v37, %s5969_s18 }
 0x299   : > { %5703 = vrot.lane.b32.xlu1 %v6407_v11, %s5960_s15  ;;  %v6754_v50 = vpop.permute.xlu0 %5423  ;;  %v6784_v11 = vsel %vm1566_vm12, %v5155_v14, %v5245_v10  ;;  %v6802_v14 = vsel %vm1566_vm12, %v5245_v10, %v5246_v40  ;;  %v5270_v10 = vunpack.i.l.bf16 %v6591_v9  ;;  %v5290_v9 = vunpack.i.l.bf16 %v6607_v21 }
 0x29b   : > { %v6763_v13 = vpop.permute.xlu1 %5428  ;;  %5713 = vrot.lane.b32.xlu0 %v6409_v12, %s5960_s15  ;;  %v6778_v12 = vsel %vm1437_vm11, %v5145_v33, %v5235_v26  ;;  %v6797_v33 = vsel %vm1566_vm12, %v5246_v40, %v5250_v57  ;;  %v5275_v40 = vunpack.i.l.bf16 %v6597_v22  ;;  %v6849_v30 = vsel %vm1824_vm14, %v5266_v6, %v5270_v10 }
 0x29c   : > { %8254 = vst [vmem:[#allocation34_spill] sm:$0xff] %v6763_v13  ;;  %8262 = vst [vmem:[#allocation40_spill] sm:$0xff] %v6849_v30 }
 0x29d   : > { %5718 = vrot.lane.b32.xlu1 %v6425_v35, %s5960_s15  ;;  %v6775_v52 = vpop.permute.xlu0 %5433  ;;  %v6791_v35 = vsel %vm1437_vm11, %v5235_v26, %v5236_v27  ;;  %v5265_v26 = vunpack.i.l.bf16 %v6589_v20  ;;  %v6812_v27 = vsel %vm1566_vm12, %v5250_v57, %v5251_v3  ;;  %v8259_v57 = vunpack.i.l.bf16 %v6499_v46 }
 0x29e   : > { %8255 = vst [vmem:[#allocation35_spill] sm:$0xff] %v6775_v52  ;;  %v5286_v3 = vunpack.i.h.bf16 %v6605_v18  ;;  %v5291_v52 = vunpack.i.h.bf16 %v6607_v21 }
 0x29f   : > { %v6786_v1 = vpop.permute.xlu1 %5438  ;;  %5723 = vrot.lane.b32.xlu0 %v6427_v37, %s5960_s15  ;;  %v5260_v37 = vunpack.i.l.bf16 %v6583_v17  ;;  %v5276_v17 = vunpack.i.h.bf16 %v6597_v22  ;;  %v6827_v20 = vsel %vm1695_vm13, %v8259_v57, %v5255_v58  ;;  %v6832_v22 = vsel %vm1695_vm13, %v5255_v58, %v5256_v55 }
 0x2a0   : > { %8256 = vst [vmem:[#allocation36_spill] sm:$0xff] %v6786_v1  ;;  %v5280_v1 = vunpack.i.l.bf16 %v6599_v16  ;;  %v8260_v16 = vunpack.i.l.bf16 %v6509_v48  ;;  %v8263_v58 = vunpack.i.l.bf16 %v6519_v51  ;;  %v6857_v13 = vsel %vm1824_vm14, %v5265_v26, %v5266_v6 }
 0x2a1   : > { %5728 = vrot.lane.b32.xlu1 %v8247_v62, %s5960_s15  ;;  %v6809_v0 = vpop.permute.xlu0 %5443  ;;  %v6835_v45 = vsel %vm1695_vm13, %v5256_v55, %v5260_v37  ;;  %v6846_v18 = vsel %vm1695_vm13, %v5260_v37, %v5261_v39  ;;  %v8264_v39 = vunpack.i.l.bf16 %v6529_v53  ;;  %v6873_v30 = vsel %vm1953_vm15, %v5275_v40, %v5276_v17 }
 0x2a2   : > { %8257 = vst [vmem:[#allocation37_spill] sm:$0xff] %v6809_v0  ;;  %v6854_v55 = vsel %vm1953_vm15, %v8263_v58, %v5275_v40  ;;  %v6863_v21 = vsel %vm1953_vm15, %v5276_v17, %v5280_v1  ;;  %v6876_v58 = vsel %vm1953_vm15, %v5280_v1, %v5281_v47  ;;  %v5336_v6 = vunpack.i.h.bf16 %v6642_v59 }
 0x2a3   : > { %v6822_v0 = vpop.permute.xlu1 %5448  ;;  %v6868_v37 = vsel %vm412_vm1, %v8264_v39, %v5285_v38  ;;  %v5296_v39 = vunpack.i.h.bf16 %v6613_v24  ;;  %v5301_v40 = vunpack.i.h.bf16 %v6615_v25  ;;  %v6892_v47 = vsel %vm412_vm1, %v5290_v9, %v5291_v52  ;;  %5733 = vrot.lane.b32.xlu0 %v8247_v62, %s5956_s12 }
 0x2a4   : > { %8258 = vst [vmem:[#allocation38_spill] sm:$0xff] %v6822_v0  ;;  %v6840_v0 = vsel %vm1824_vm14, %v8260_v16, %v5265_v26  ;;  %v6860_v16 = vsel %vm1824_vm14, %v5270_v10, %v5271_v8  ;;  %8265 = vst [vmem:[#allocation41_spill] sm:$0xff] %v6868_v37  ;;  %v6879_v26 = vsel %vm412_vm1, %v5286_v3, %v5290_v9  ;;  %v5335_v8 = vunpack.i.l.bf16 %v6642_v59 }
 0x2a5   : > { %v6843_v57 = vpop.permute.xlu0 %5453  ;;  %8267 = vst [vmem:[#allocation43_spill] sm:$0xff] %v6879_v26  ;;  %v6884_v10 = vsel %vm412_vm1, %v5285_v38, %v5286_v3  ;;  %8270 = vst [vmem:[#allocation46_spill] sm:$0xff] %v6892_v47  ;;  %v5300_v1 = vunpack.i.l.bf16 %v6615_v25  ;;  %v5306_v26 = vunpack.i.h.bf16 %v6621_v28  ;;  %v5305_v59 = vunpack.i.l.bf16 %v6621_v28  ;;  %5738 = vrot.lane.b32.xlu1 %v8247_v62, %s5956_s12 }
 0x2a6   : > { %8261 = vst [vmem:[#allocation39_spill] sm:$0xff] %v6843_v57  ;;  %8268 = vst [vmem:[#allocation44_spill] sm:$0xff] %v6884_v10  ;;  %v5311_v38 = vunpack.i.h.bf16 %v6623_v29  ;;  %v5310_v3 = vunpack.i.l.bf16 %v6623_v29  ;;  %v5331_v37 = vunpack.i.h.bf16 %v6652_v34  ;;  %v5330_v52 = vunpack.i.l.bf16 %v6652_v34 }
 0x2a7   : > { %v6870_v57 = vpop.permute.xlu1 %5458  ;;  %v5346_v25 = vunpack.i.h.bf16 %v6655_v54  ;;  %v5345_v9 = vunpack.i.l.bf16 %v6655_v54  ;;  %v6908_v28 = vsel %vm1437_vm11, %v5335_v8, %v5336_v6  ;;  %v8272_v47 = vunpack.i.l.bf16 %v6539_v56  ;;  %5743 = vrot.lane.b32.xlu0 %v8247_v62, %s5958_s13 }
 0x2a8   : > { %8266 = vst [vmem:[#allocation42_spill] sm:$0xff] %v6870_v57  ;;  %v5295_v57 = vunpack.i.l.bf16 %v6613_v24  ;;  %v5341_v24 = vunpack.i.h.bf16 %v6661_v36  ;;  %v5340_v10 = vunpack.i.l.bf16 %v6661_v36  ;;  %v8277_v54 = vunpack.i.l.bf16 %v6549_v60 }
 0x2a9   : > { %v6889_v17 = vpop.permute.xlu0 %5463  ;;  %v6937_v36 = vsel %vm670_vm3, %v5306_v26, %v5310_v3  ;;  %5748 = vrot.lane.b32.xlu1 %v8247_v62, %s5958_s13 }
 0x2aa   : > { %8269 = vst [vmem:[#allocation45_spill] sm:$0xff] %v6889_v17  ;;  %v6913_v29 = vsel %vm541_vm2, %v8272_v47, %v5295_v57  ;;  %v6920_v34 = vsel %vm541_vm2, %v5295_v57, %v5296_v39  ;;  %v6928_v6 = vsel %vm670_vm3, %v8277_v54, %v5305_v59  ;;  %v6931_v47 = vsel %vm541_vm2, %v5300_v1, %v5301_v40 }
 0x2ab   : > { %v6902_v17 = vpop.permute.xlu1 %5468  ;;  %8273 = vst [vmem:[#allocation48_spill] sm:$0xff] %v6913_v29  ;;  %8275 = vst [vmem:[#allocation50_spill] sm:$0xff] %v6920_v34  ;;  %v6934_v29 = vsel %vm670_vm3, %v5305_v59, %v5306_v26  ;;  %v8284_v54 = vunpack.i.h.bf16 %v6629_v32  ;;  %v8287_v26 = vunpack.i.h.bf16 %v6479_v42  ;;  %v6962_v57 = vsel %vm1437_vm11, %v5330_v52, %v5331_v37 }
 0x2ac   : > { %8271 = vst [vmem:[#allocation47_spill] sm:$0xff] %v6902_v17  ;;  %v6923_v17 = vsel %vm541_vm2, %v5296_v39, %v5300_v1  ;;  %8278 = vst [vmem:[#allocation52_spill] sm:$0xff] %v6928_v6  ;;  %v6944_v39 = vsel %vm670_vm3, %v5310_v3, %v5311_v38  ;;  %v8285_v6 = vunpack.i.l.bf16 %v6629_v32  ;;  %v6954_v1 = vsel %vm1437_vm11, %v5331_v37, %v5335_v8 }
 0x2ad   : > { %v6917_v53 = vpop.permute.xlu0 %5473  ;;  %8276 = vst [vmem:[#allocation51_spill] sm:$0xff] %v6923_v17  ;;  %8279 = vst [vmem:[#allocation53_spill] sm:$0xff] %v6931_v47  ;;  %v6959_v59 = vsel %vm1437_vm11, %v8287_v26, %v5330_v52  ;;  %v6965_v38 = vsel %vm1566_vm12, %v5345_v9, %v5346_v25  ;;  %v6968_v3 = vsel %vm1566_vm12, %v5341_v24, %v5345_v9  ;;  %v5356_v42 = vunpack.i.h.bf16 %v6663_v63 }
 0x2ae   : > { %8274 = vst [vmem:[#allocation49_spill] sm:$0xff] %v6917_v53  ;;  %8280 = vst [vmem:[#allocation54_spill] sm:$0xff] %v6934_v29  ;;  %v6951_v40 = vsel %vm2466_vm5, %v8285_v6, %v8284_v54  ;;  %v8288_v6 = vunpack.i.h.bf16 %v6489_v44  ;;  %v5355_v26 = vunpack.i.l.bf16 %v6663_v63  ;;  %v5351_v25 = vunpack.i.h.bf16 %v6672_v15 }
 0x2af   : > { %8281 = vst [vmem:[#allocation55_spill] sm:$0xff] %v6937_v36  ;;  %v6939_v53 = vpop.permute.xlu1 %5478  ;;  %8283 = vst [vmem:[#allocation57_spill] sm:$0xff] %v6944_v39  ;;  %v5350_v9 = vunpack.i.l.bf16 %v6672_v15  ;;  %v4582_v63 = vpack.c.bf16 %v6962_v57, %v6791_v35  ;;  %v5411_v32 = vunpack.i.h.bf16 %v6716_v7  ;;  %v5410_v36 = vunpack.i.l.bf16 %v6716_v7 }
 0x2b0   : > { %8282 = vst [vmem:[#allocation56_spill] sm:$0xff] %v6939_v53  ;;  %8286 = vst [vmem:[#allocation58_spill] sm:$0xff] %v6951_v40  ;;  %v6973_v54 = vsel %vm1566_vm12, %v8288_v6, %v5340_v10  ;;  %v8209_v37 = vunpack.i.h.bf16 %v6939_v53  ;;  %v7018_v7 = vsel %vm1695_vm13, %v5351_v25, %v5355_v26  ;;  %v8293_v15 = vunpack.i.h.bf16 %v6499_v46 }
 0x2b1   : > { %v6975_v8 = vpop.permute.xlu0 %5483  ;;  %v7027_v35 = vsel %vm1695_vm13, %v5355_v26, %v5356_v42  ;;  %v5415_v6 = vunpack.i.l.bf16 %v6730_v61  ;;  %v5366_v42 = vunpack.i.h.bf16 %v6674_v19  ;;  %v8296_v53 = vunpack.i.l.bf16 %v6473_v41 }
 0x2b2   : > { %8289 = vst [vmem:[#allocation59_spill] sm:$0xff] %v6975_v8  ;;  %v8208_v52 = vunpack.i.l.bf16 %v6975_v8  ;;  %v7007_v8 = vsel %vm1566_vm12, %v5340_v10, %v5341_v24  ;;  %v7023_v10 = vsel %vm1695_vm13, %v8293_v15, %v5350_v9  ;;  %v5416_v24 = vunpack.i.h.bf16 %v6730_v61 }
 0x2b3   : > { %v6983_v40 = vpop.permute.xlu1 %5488  ;;  %v1317_v39 = vsel %vm1308_vm10, %v8296_v53, %v5410_v36  ;;  %v1318_v61 = vsel %vm1308_vm10, %v5410_v36, %v5411_v32  ;;  %v7055_v47 = vsel %vm1695_vm13, %v5350_v9, %v5351_v25  ;;  %v1319_v53 = vsel %vm1308_vm10, %v5411_v32, %v5415_v6 }
 0x2b4   : > { %8290 = vst [vmem:[#allocation60_spill] sm:$0xff] %v6983_v40  ;;  %v6994_v44 = vsel %vm541_vm2, %v8209_v37, %v8208_v52  ;;  %v8294_v46 = vunpack.i.h.bf16 %v6983_v40  ;;  %v4590_v25 = vpack.c.bf16 %v7007_v8, %v6802_v14  ;;  %v4600_v32 = vpack.c.bf16 %v7023_v10, %v6827_v20 }
 0x2b5   : > { %8291 = vst [vmem:[#allocation61_spill] sm:$0xff] %v6994_v44  ;;  %v7004_v29 = vpop.permute.xlu0 %5493  ;;  %v8298_v9 = vunpack.i.h.bf16 %v6509_v48  ;;  %v4598_v14 = vpack.c.bf16 %v7055_v47, %v6832_v22  ;;  %v8299_v8 = vunpack.i.l.bf16 %v6674_v19  ;;  %v8320_v47 = vld [vmem:[#allocation22_spill] sm:$0xff] }
 0x2b6   : > { %8292 = vst [vmem:[#allocation62_spill] sm:$0xff] %v7004_v29  ;;  %v8219_v57 = vunpack.i.l.bf16 %v7004_v29  ;;  %v8297_v29 = vunpack.i.h.bf16 %v6473_v41  ;;  %v1320_v41 = vsel %vm1308_vm10, %v5415_v6, %v5416_v24 }
 0x2b7   : > { %v5499_v52 = vpop.permute.xlu1 %5498  ;;  %v7084_v24 = vsel %vm1824_vm14, %v8299_v8, %v5366_v42  ;;  %v8301_v42 = vpack.c.bf16 %v6908_v28, %v6794_v5  ;;  %v5370_v8 = vunpack.i.l.bf16 %v6688_v31 }
 0x2b8   : > { %v7039_v15 = vsel %vm670_vm3, %v8294_v46, %v8219_v57  ;;  %v5501_v37 = vunpack.i.h.bf16 %v5499_v52  ;;  %v5500_v44 = vunpack.i.l.bf16 %v5499_v52  ;;  %v5360_v52 = vunpack.i.l.bf16 %v6680_v23 }
 0x2b9   : > { %8295 = vst [vmem:[#allocation63_spill] sm:$0xff] %v7039_v15  ;;  %v5509_v62 = vpop.permute.xlu0 %5508 }
 0x2ba   : > { %v1321_v40 = vsel %vm1308_vm10, %v8297_v29, %v5500_v44  ;;  %v5511_v17 = vunpack.i.h.bf16 %v5509_v62  ;;  %v5510_v46 = vunpack.i.l.bf16 %v5509_v62  ;;  %v1322_v57 = vsel %vm1308_vm10, %v5500_v44, %v5501_v37 }
 0x2bb   : > { %v4580_v15 = vpack.c.bf16 %v1321_v40, %v1317_v39  ;;  %v7052_v34 = vpop.permute.xlu1 %5503  ;;  %v4578_v26 = vpack.c.bf16 %v1322_v57, %v1318_v61  ;;  %v5421_v62 = vunpack.i.h.bf16 %v6740_v49  ;;  %v5420_v44 = vunpack.i.l.bf16 %v6740_v49 }
 0x2bc   : > { %v1323_v36 = vsel %vm1308_vm10, %v5501_v37, %v5510_v46  ;;  %v1324_v29 = vsel %vm1308_vm10, %v5510_v46, %v5511_v17  ;;  %v4706_v37 = vpack.c.bf16 %v7027_v35, %v6846_v18  ;;  %v4708_v17 = vpack.c.bf16 %v7018_v7, %v6835_v45  ;;  %v8328_v7 = vld [vmem:[#allocation46_spill] sm:$0xff] }
 0x2bd   : > { %v4688_v56 = vpack.c.bf16 %v1323_v36, %v1319_v53  ;;  %4579 = vmatprep.subr.bf16.mxu0 %v4578_v26  ;;  %v7063_v39 = vpop.permute.xlu0 %5513  ;;  %v4686_v40 = vpack.c.bf16 %v1324_v29, %v1320_v41  ;;  %v5361_v49 = vunpack.i.h.bf16 %v6680_v23  ;;  %v7077_v6 = vsel %vm1824_vm14, %v8298_v9, %v5360_v52 }
 0x2be   : > { %4581 = vmatpush1.bf16.msra.mxu0 %v4580_v15  ;;  %v5426_v15 = vunpack.i.h.bf16 %v6754_v50  ;;  %v5425_v23 = vunpack.i.l.bf16 %v6754_v50  ;;  %v5376_v61 = vunpack.i.h.bf16 %v6682_v2  ;;  %v8300_v46 = vunpack.i.l.bf16 %v6483_v43 }
 0x2bf   : > { %v5519_v57 = vpop.permute.xlu1 %5518  ;;  %4583 = vmatprep.subr.bf16.mxu0 %v4582_v63  ;;  %4687 = vmatprep.subr.bf16.mxu1 %v4686_v40  ;;  %v5375_v63 = vunpack.i.l.bf16 %v6682_v2  ;;  %v1447_v41 = vsel %vm1437_vm11, %v5420_v44, %v5421_v62  ;;  %v8302_v50 = vunpack.i.h.bf16 %v6483_v43  ;;  %v8303_v2 = vpack.c.bf16 %v6959_v59, %v6778_v12 }
 0x2c0   : > { %v5521_v26 = vunpack.i.h.bf16 %v5519_v57  ;;  %v5520_v48 = vunpack.i.l.bf16 %v5519_v57  ;;  %4689 = vmatpush1.bf16.msra.mxu1 %v4688_v56  ;;  %v1446_v53 = vsel %vm1437_vm11, %v8300_v46, %v5420_v44  ;;  %v5371_v57 = vunpack.i.h.bf16 %v6688_v31 }
 0x2c1   : > { %v5529_v36 = vpop.permute.xlu0 %5528  ;;  %4691 = vmatprep.subr.bf16.mxu1 %v8301_v42  ;;  %v1448_v43 = vsel %vm1437_vm11, %v5421_v62, %v5425_v23  ;;  %v1449_v12 = vsel %vm1437_vm11, %v5425_v23, %v5426_v15  ;;  %v8306_v62 = vunpack.i.l.bf16 %v6674_v19  ;;  %v4714_v15 = vpack.c.bf16 %v7084_v24, %v6860_v16 }
 0x2c2   : > { %v1450_v29 = vsel %vm1437_vm11, %v8302_v50, %v5520_v48  ;;  %v5531_v56 = vunpack.i.h.bf16 %v5529_v36  ;;  %v5530_v40 = vunpack.i.l.bf16 %v5529_v36  ;;  %4585 = vmatpush1.bf16.msra.mxu0 %v8303_v2  ;;  %v1451_v9 = vsel %vm1437_vm11, %v5520_v48, %v5521_v26  ;;  %v8305_v48 = vld [vmem:[#allocation34_spill] sm:$0xff] }
 0x2c3   : > { %v4588_v5 = vpack.c.bf16 %v1450_v29, %v1446_v53  ;;  %v7106_v28 = vpop.permute.xlu1 %5523  ;;  %v4586_v44 = vpack.c.bf16 %v1451_v9, %v1447_v41  ;;  %v8304_v36 = vpack.c.bf16 %v6954_v1, %v6781_v4  ;;  %v5431_v42 = vunpack.i.h.bf16 %v8305_v48 }
 0x2c4   : > { %v1452_v46 = vsel %vm1437_vm11, %v5521_v26, %v5530_v40  ;;  %v1453_v59 = vsel %vm1437_vm11, %v5530_v40, %v5531_v56  ;;  %v5430_v31 = vunpack.i.l.bf16 %v8305_v48  ;;  %v7122_v26 = vsel %vm1824_vm14, %v5361_v49, %v8306_v62  ;;  %v8308_v56 = vld [vmem:[#allocation28_spill] sm:$0xff]  ;;  %vm7655_vm11 = vmpackc.low %vm1195_vm9, %vm1195_vm9 }
 0x2c5   : > { %4693 = vmatpush1.bf16.msra.mxu1 %v8304_v36  ;;  %v4696_v53 = vpack.c.bf16 %v1452_v46, %v1448_v43  ;;  %4587 = vmatprep.subr.bf16.mxu0 %v4586_v44  ;;  %v7117_v50 = vpop.permute.xlu0 %5533  ;;  %v4694_v41 = vpack.c.bf16 %v1453_v59, %v1449_v12  ;;  %v7125_v4 = vsel %vm1824_vm14, %v5360_v52, %v5361_v49  ;;  %v8307_v29 = vunpack.i.h.bf16 %v6519_v51  ;;  %v8309_v49 = vld [vmem:[#allocation35_spill] sm:$0xff]  ;;  %v8310_v46 = vld [vmem:[#allocation18_spill] sm:$0xff] }
 0x2c6   : > { %4589 = vmatpush1.bf16.msra.mxu0 %v4588_v5  ;;  %v4608_v1 = vpack.c.bf16 %v7077_v6, %v6840_v0  ;;  %v7132_v23 = vsel %vm1953_vm15, %v5371_v57, %v5375_v63  ;;  %v5386_v40 = vunpack.i.h.bf16 %v8308_v56  ;;  %v7141_v52 = vsel %vm1953_vm15, %v5375_v63, %v5376_v61 }
 0x2c7   : > { %v7137_v19 = vsel %vm1953_vm15, %v8307_v29, %v5370_v8  ;;  %v5539_v2 = vpop.permute.xlu1 %5538  ;;  %4591 = vmatprep.subr.bf16.mxu0 %v4590_v25  ;;  %4695 = vmatprep.subr.bf16.mxu1 %v4694_v41  ;;  %v5436_v9 = vunpack.i.h.bf16 %v8309_v49  ;;  %v5435_v5 = vunpack.i.l.bf16 %v8309_v49  ;;  %v5385_v51 = vunpack.i.l.bf16 %v8308_v56 }
 0x2c8   : > { %v5541_v44 = vunpack.i.h.bf16 %v5539_v2  ;;  %v5540_v43 = vunpack.i.l.bf16 %v5539_v2  ;;  %v8311_v36 = vunpack.i.l.bf16 %v8310_v46  ;;  %v8312_v25 = vpack.c.bf16 %v6965_v38, %v6812_v27  ;;  %v8315_v2 = vld [vmem:[#allocation29_spill] sm:$0xff] }
 0x2c9   : > { %4697 = vmatpush1.bf16.msra.mxu1 %v4696_v53  ;;  %v5549_v59 = vpop.permute.xlu0 %5548  ;;  %v1576_v61 = vsel %vm1566_vm12, %v5430_v31, %v5431_v42  ;;  %v7154_v63 = vsel %vm1953_vm15, %v5370_v8, %v5371_v57  ;;  %v8313_v48 = vunpack.i.h.bf16 %v8310_v46  ;;  %v8314_v29 = vpack.c.bf16 %v6973_v54, %v6784_v11 }
 0x2ca   : > { %v1575_v12 = vsel %vm1566_vm12, %v8311_v36, %v5430_v31  ;;  %4699 = vmatprep.subr.bf16.mxu1 %v8312_v25  ;;  %v5551_v41 = vunpack.i.h.bf16 %v5549_v59  ;;  %v5550_v62 = vunpack.i.l.bf16 %v5549_v59  ;;  %v1580_v56 = vsel %vm1566_vm12, %v5540_v43, %v5541_v44 }
 0x2cb   : > { %v1579_v53 = vsel %vm1566_vm12, %v8313_v48, %v5540_v43  ;;  %4593 = vmatpush1.bf16.msra.mxu0 %v8314_v29  ;;  %v5381_v27 = vunpack.i.h.bf16 %v8315_v2  ;;  %v5380_v38 = vunpack.i.l.bf16 %v8315_v2  ;;  %v7165_v49 = vpop.permute.xlu1 %5543  ;;  %v4594_v57 = vpack.c.bf16 %v1580_v56, %v1576_v61  ;;  %v8317_v43 = vld [vmem:[#allocation36_spill] sm:$0xff] }
 0x2cc   : > { %v4596_v31 = vpack.c.bf16 %v1579_v53, %v1575_v12  ;;  %v1577_v8 = vsel %vm1566_vm12, %v5431_v42, %v5435_v5  ;;  %v1581_v46 = vsel %vm1566_vm12, %v5541_v44, %v5550_v62  ;;  %v8316_v36 = vpack.c.bf16 %v6968_v3, %v6797_v33  ;;  %v8318_v44 = vld [vmem:[#allocation40_spill] sm:$0xff] }
 0x2cd   : > { %v1578_v11 = vsel %vm1566_vm12, %v5435_v5, %v5436_v9  ;;  %v1582_v54 = vsel %vm1566_vm12, %v5550_v62, %v5551_v41  ;;  %v5441_v59 = vunpack.i.h.bf16 %v8317_v43  ;;  %v5440_v25 = vunpack.i.l.bf16 %v8317_v43  ;;  %4595 = vmatprep.subr.bf16.mxu0 %v4594_v57  ;;  %v7176_v48 = vpop.permute.xlu0 %5553  ;;  %v8319_v62 = vld [vmem:[#allocation37_spill] sm:$0xff]  ;;  %vm7662_vm12 = vmpackc.low %vm1193_vm7, %vm1193_vm7 }
 0x2ce   : > { %4701 = vmatpush1.bf16.msra.mxu1 %v8316_v36  ;;  %v4704_v12 = vpack.c.bf16 %v1581_v46, %v1577_v8  ;;  %v4702_v61 = vpack.c.bf16 %v1582_v54, %v1578_v11  ;;  %v4606_v42 = vpack.c.bf16 %v7125_v4, %v6857_v13  ;;  %v4716_v33 = vpack.c.bf16 %v7122_v26, %v8318_v44  ;;  %v8322_v8 = vld [vmem:[#allocation19_spill] sm:$0xff]  ;;  %v8341_v44 = vld [vmem:[#allocation44_spill] sm:$0xff] }
 0x2cf   : > { %4597 = vmatpush1.bf16.msra.mxu0 %v4596_v31  ;;  %v4616_v3 = vpack.c.bf16 %v7137_v19, %v6854_v55  ;;  %v4722_v9 = vpack.c.bf16 %v7141_v52, %v6876_v58  ;;  %v5216_v5 = vunpack.i.h.bf16 %v6549_v60  ;;  %v5559_v53 = vpop.permute.xlu1 %5558  ;;  %v4614_v13 = vpack.c.bf16 %v7154_v63, %v6873_v30 }
 0x2d0   : > { %4599 = vmatprep.subr.bf16.mxu0 %v4598_v14  ;;  %4703 = vmatprep.subr.bf16.mxu1 %v4702_v61  ;;  %v4724_v4 = vpack.c.bf16 %v7132_v23, %v6863_v21  ;;  %v7195_v41 = vsel %vm412_vm1, %v5385_v51, %v5386_v40  ;;  %v5446_v29 = vunpack.i.h.bf16 %v8319_v62  ;;  %v5445_v56 = vunpack.i.l.bf16 %v8319_v62  ;;  %v8351_v21 = vld [vmem:[#allocation51_spill] sm:$0xff] }
 0x2d1   : > { %v5561_v2 = vunpack.i.h.bf16 %v5559_v53  ;;  %v5560_v31 = vunpack.i.l.bf16 %v5559_v53  ;;  %v7200_v22 = vsel %vm412_vm1, %v5381_v27, %v5385_v51  ;;  %v8321_v14 = vunpack.i.h.bf16 %v8320_v47  ;;  %v5569_v36 = vpop.permute.xlu0 %5568  ;;  %v8325_v53 = vld [vmem:[#allocation30_spill] sm:$0xff] }
 0x2d2   : > { %4705 = vmatpush1.bf16.msra.mxu1 %v4704_v12  ;;  %v8323_v46 = vunpack.i.l.bf16 %v8322_v8  ;;  %v1705_v11 = vsel %vm1695_vm13, %v5440_v25, %v5441_v59  ;;  %v8324_v54 = vunpack.i.h.bf16 %v8322_v8  ;;  %v5571_v43 = vunpack.i.h.bf16 %v5569_v36 }
 0x2d3   : > { %v7205_v57 = vsel %vm412_vm1, %v8321_v14, %v5380_v38  ;;  %4707 = vmatprep.subr.bf16.mxu1 %v4706_v37  ;;  %v5570_v12 = vunpack.i.l.bf16 %v5569_v36  ;;  %4601 = vmatpush1.bf16.msra.mxu0 %v4600_v32  ;;  %v1709_v61 = vsel %vm1695_vm13, %v5560_v31, %v5561_v2  ;;  %v5396_v62 = vunpack.i.h.bf16 %v8325_v53  ;;  %v7223_v35 = vpop.permute.xlu1 %5563  ;;  %v8326_v32 = vld [vmem:[#allocation38_spill] sm:$0xff] }
 0x2d4   : > { %v1704_v40 = vsel %vm1695_vm13, %v8323_v46, %v5440_v25  ;;  %v1708_v51 = vsel %vm1695_vm13, %v8324_v54, %v5560_v31  ;;  %v5395_v47 = vunpack.i.l.bf16 %v8325_v53  ;;  %v4602_v37 = vpack.c.bf16 %v1709_v61, %v1705_v11  ;;  %v8330_v11 = vld [vmem:[#allocation31_spill] sm:$0xff] }
 0x2d5   : > { %v4604_v18 = vpack.c.bf16 %v1708_v51, %v1704_v40  ;;  %v1706_v25 = vsel %vm1695_vm13, %v5441_v59, %v5445_v56  ;;  %v1710_v14 = vsel %vm1695_vm13, %v5561_v2, %v5570_v12  ;;  %v1707_v20 = vsel %vm1695_vm13, %v5445_v56, %v5446_v29  ;;  %v7234_v40 = vpop.permute.xlu0 %5573  ;;  %v8327_v2 = vld [vmem:[#allocation41_spill] sm:$0xff]  ;;  %v8329_v29 = vld [vmem:[#allocation43_spill] sm:$0xff] }
 0x2d6   : > { %4709 = vmatpush1.bf16.msra.mxu1 %v4708_v17  ;;  %v1711_v10 = vsel %vm1695_vm13, %v5570_v12, %v5571_v43  ;;  %v5451_v31 = vunpack.i.h.bf16 %v8326_v32  ;;  %v5450_v8 = vunpack.i.l.bf16 %v8326_v32  ;;  %v4712_v46 = vpack.c.bf16 %v1710_v14, %v1706_v25  ;;  %4603 = vmatprep.subr.bf16.mxu0 %v4602_v37  ;;  %v8331_v43 = vld [vmem:[#allocation39_spill] sm:$0xff]  ;;  %v8334_v32 = vld [vmem:[#allocation20_spill] sm:$0xff]  ;;  %vm7672_vm13 = vmpackc.low %vm1194_vm8, %vm1194_vm8 }
 0x2d7   : > { %v4710_v36 = vpack.c.bf16 %v1711_v10, %v1707_v20  ;;  %4605 = vmatpush1.bf16.msra.mxu0 %v4604_v18  ;;  %v7237_v59 = vsel %vm412_vm1, %v5380_v38, %v5381_v27  ;;  %v4730_v17 = vpack.c.bf16 %v7195_v41, %v8328_v7  ;;  %v5391_v54 = vunpack.i.h.bf16 %v8330_v11  ;;  %v5579_v61 = vpop.permute.xlu1 %5578  ;;  %v8332_v38 = vld [vmem:[#allocation32_spill] sm:$0xff]  ;;  %v8333_v20 = vld [vmem:[#allocation33_spill] sm:$0xff] }
 0x2d8   : > { %v5390_v51 = vunpack.i.l.bf16 %v8330_v11  ;;  %v5455_v12 = vunpack.i.l.bf16 %v8331_v43  ;;  %4607 = vmatprep.subr.bf16.mxu0 %v4606_v42  ;;  %v7249_v27 = vsel %vm541_vm2, %v5395_v47, %v5396_v62  ;;  %v5406_v53 = vunpack.i.h.bf16 %v8332_v38 }
 0x2d9   : > { %4711 = vmatprep.subr.bf16.mxu1 %v4710_v36  ;;  %v5456_v18 = vunpack.i.h.bf16 %v8331_v43  ;;  %v5581_v37 = vunpack.i.h.bf16 %v5579_v61  ;;  %v5580_v25 = vunpack.i.l.bf16 %v5579_v61  ;;  %v5405_v14 = vunpack.i.l.bf16 %v8332_v38  ;;  %v5589_v42 = vpop.permute.xlu0 %5588 }
 0x2da   : > { %4713 = vmatpush1.bf16.msra.mxu1 %v4712_v46  ;;  %v5401_v10 = vunpack.i.h.bf16 %v8333_v20  ;;  %v8335_v11 = vunpack.i.l.bf16 %v8334_v32  ;;  %v1834_v62 = vsel %vm1824_vm14, %v5450_v8, %v5451_v31  ;;  %v8336_v36 = vunpack.i.h.bf16 %v8334_v32 }
 0x2db   : > { %4715 = vmatprep.subr.bf16.mxu1 %v4714_v15  ;;  %v5591_v46 = vunpack.i.h.bf16 %v5589_v42  ;;  %v5590_v61 = vunpack.i.l.bf16 %v5589_v42  ;;  %4609 = vmatpush1.bf16.msra.mxu0 %v4608_v1  ;;  %v1838_v38 = vsel %vm1824_vm14, %v5580_v25, %v5581_v37  ;;  %v1835_v45 = vsel %vm1824_vm14, %v5451_v31, %v5455_v12  ;;  %v7271_v24 = vpop.permute.xlu1 %5583 }
 0x2dc   : > { %v1833_v56 = vsel %vm1824_vm14, %v8335_v11, %v5450_v8  ;;  %v1837_v43 = vsel %vm1824_vm14, %v8336_v36, %v5580_v25  ;;  %v5400_v11 = vunpack.i.l.bf16 %v8333_v20  ;;  %v4610_v15 = vpack.c.bf16 %v1838_v38, %v1834_v62  ;;  %v8337_v8 = vld [vmem:[#allocation42_spill] sm:$0xff]  ;;  %v8338_v25 = vld [vmem:[#allocation45_spill] sm:$0xff] }
 0x2dd   : > { %v4612_v16 = vpack.c.bf16 %v1837_v43, %v1833_v56  ;;  %v5461_v32 = vunpack.i.h.bf16 %v8337_v8  ;;  %v1839_v36 = vsel %vm1824_vm14, %v5581_v37, %v5590_v61  ;;  %v1836_v0 = vsel %vm1824_vm14, %v5455_v12, %v5456_v18  ;;  %v7282_v20 = vpop.permute.xlu0 %5593  ;;  %v8339_v37 = vld [vmem:[#allocation24_spill] sm:$0xff]  ;;  %v8342_v12 = vld [vmem:[#allocation53_spill] sm:$0xff] }
 0x2de   : > { %4717 = vmatpush1.bf16.msra.mxu1 %v4716_v33  ;;  %v1840_v6 = vsel %vm1824_vm14, %v5590_v61, %v5591_v46  ;;  %v5460_v1 = vunpack.i.l.bf16 %v8337_v8  ;;  %v5465_v31 = vunpack.i.l.bf16 %v8338_v25  ;;  %v4720_v56 = vpack.c.bf16 %v1839_v36, %v1835_v45  ;;  %4611 = vmatprep.subr.bf16.mxu0 %v4610_v15  ;;  %v8343_v45 = vld [vmem:[#allocation26_spill] sm:$0xff]  ;;  %vm7682_vm14 = vmpackc.low %vm1192_vm6, %vm1192_vm6 }
 0x2df   : > { %v4718_v42 = vpack.c.bf16 %v1840_v6, %v1836_v0  ;;  %v7285_v62 = vsel %vm541_vm2, %v5391_v54, %v5395_v47  ;;  %v8340_v43 = vunpack.i.h.bf16 %v8339_v37  ;;  %4613 = vmatpush1.bf16.msra.mxu0 %v4612_v16  ;;  %v4622_v33 = vpack.c.bf16 %v7237_v59, %v8341_v44  ;;  %v5599_v38 = vpop.permute.xlu1 %5598  ;;  %v8344_v0 = vld [vmem:[#allocation21_spill] sm:$0xff] }
 0x2e0   : > { %v4738_v18 = vpack.c.bf16 %v7249_v27, %v8342_v12  ;;  %v7298_v61 = vsel %vm670_vm3, %v5401_v10, %v5405_v14  ;;  %4615 = vmatprep.subr.bf16.mxu0 %v4614_v13  ;;  %v7304_v47 = vsel %vm541_vm2, %v5390_v51, %v5391_v54  ;;  %v7307_v16 = vsel %vm670_vm3, %v5405_v14, %v5406_v53 }
 0x2e1   : > { %v7290_v26 = vsel %vm541_vm2, %v8340_v43, %v5390_v51  ;;  %4719 = vmatprep.subr.bf16.mxu1 %v4718_v42  ;;  %v7312_v59 = vsel %vm670_vm3, %v5216_v5, %v5400_v11  ;;  %v5466_v15 = vunpack.i.h.bf16 %v8338_v25  ;;  %v5601_v8 = vunpack.i.h.bf16 %v5599_v38  ;;  %v5609_v54 = vpop.permute.xlu0 %5608 }
 0x2e2   : > { %v5600_v36 = vunpack.i.l.bf16 %v5599_v38  ;;  %4721 = vmatpush1.bf16.msra.mxu1 %v4720_v56  ;;  %v8345_v30 = vunpack.i.l.bf16 %v8344_v0  ;;  %v1964_v13 = vsel %vm1953_vm15, %v5461_v32, %v5465_v31  ;;  %v1963_v60 = vsel %vm1953_vm15, %v5460_v1, %v5461_v32  ;;  %v8347_v56 = vld [vmem:[#allocation47_spill] sm:$0xff]  ;;  %v8349_v38 = vld [vmem:[#allocation48_spill] sm:$0xff] }
 0x2e3   : > { %4723 = vmatprep.subr.bf16.mxu1 %v4722_v9  ;;  %v7324_v5 = vsel %vm670_vm3, %v5400_v11, %v5401_v10  ;;  %v8346_v51 = vunpack.i.h.bf16 %v8344_v0  ;;  %v5611_v14 = vunpack.i.h.bf16 %v5609_v54  ;;  %v5610_v6 = vunpack.i.l.bf16 %v5609_v54  ;;  %4617 = vmatpush1.bf16.msra.mxu0 %v4616_v3  ;;  %v7335_v32 = vpop.permute.xlu1 %5603  ;;  %v8348_v11 = vld [vmem:[#allocation49_spill] sm:$0xff] }
 0x2e4   : > { %v1962_v63 = vsel %vm1953_vm15, %v8345_v30, %v5460_v1  ;;  %v1967_v25 = vsel %vm1953_vm15, %v5600_v36, %v5601_v8  ;;  %v5471_v58 = vunpack.i.h.bf16 %v8347_v56  ;;  %v5470_v52 = vunpack.i.l.bf16 %v8347_v56 }
 0x2e5   : > { %v1966_v53 = vsel %vm1953_vm15, %v8346_v51, %v5600_v36  ;;  %v4618_v10 = vpack.c.bf16 %v1967_v25, %v1963_v60  ;;  %v5475_v1 = vunpack.i.l.bf16 %v8348_v11  ;;  %v1968_v42 = vsel %vm1953_vm15, %v5601_v8, %v5610_v6  ;;  %v7345_v43 = vpop.permute.xlu0 %5613  ;;  %v8350_v8 = vld [vmem:[#allocation50_spill] sm:$0xff] }
 0x2e6   : > { %v4620_v9 = vpack.c.bf16 %v1966_v53, %v1962_v63  ;;  %4725 = vmatpush1.bf16.msra.mxu1 %v4724_v4  ;;  %v1965_v55 = vsel %vm1953_vm15, %v5465_v31, %v5466_v15  ;;  %v1969_v19 = vsel %vm1953_vm15, %v5610_v6, %v5611_v14  ;;  %v5476_v3 = vunpack.i.h.bf16 %v8348_v11  ;;  %v8352_v4 = vld [vmem:[#allocation52_spill] sm:$0xff]  ;;  %v8353_v15 = vld [vmem:[#allocation57_spill] sm:$0xff]  ;;  %v8356_v53 = vld [vmem:[#allocation54_spill] sm:$0xff] }
 0x2e7   : > { %v4728_v37 = vpack.c.bf16 %v1968_v42, %v1964_v13  ;;  %4619 = vmatprep.subr.bf16.mxu0 %v4618_v10  ;;  %v4726_v44 = vpack.c.bf16 %v1969_v19, %v1965_v55  ;;  %v4632_v36 = vpack.c.bf16 %v7290_v26, %v8349_v38  ;;  %v4630_v0 = vpack.c.bf16 %v7304_v47, %v8350_v8  ;;  %v8354_v13 = vld [vmem:[#allocation23_spill] sm:$0xff]  ;;  %v5619_v51 = vpop.permute.xlu1 %5618  ;;  %v8358_v11 = vld [vmem:[#allocation56_spill] sm:$0xff] }
 0x2e8   : > { %4621 = vmatpush1.bf16.msra.mxu0 %v4620_v9  ;;  %v4740_v23 = vpack.c.bf16 %v7285_v62, %v8351_v21  ;;  %v5220_v63 = vunpack.i.l.bf16 %v8343_v45  ;;  %v8355_v54 = vunpack.i.l.bf16 %v8354_v13  ;;  %v4638_v47 = vpack.c.bf16 %v7324_v5, %v8356_v53  ;;  %v8357_v14 = vld [vmem:[#allocation55_spill] sm:$0xff]  ;;  %v8360_v8 = vld [vmem:[#allocation60_spill] sm:$0xff]  ;;  %v8375_v62 = vld [vmem:[#allocation61_spill] sm:$0xff] }
 0x2e9   : > { %4623 = vmatprep.subr.bf16.mxu0 %v4622_v33  ;;  %4727 = vmatprep.subr.bf16.mxu1 %v4726_v44  ;;  %v2092_v25 = vsel %vm412_vm1, %v5471_v58, %v5475_v1  ;;  %v5621_v56 = vunpack.i.h.bf16 %v5619_v51  ;;  %v5620_v9 = vunpack.i.l.bf16 %v5619_v51  ;;  %v2091_v10 = vsel %vm412_vm1, %v5470_v52, %v5471_v58  ;;  %v8359_v55 = vld [vmem:[#allocation59_spill] sm:$0xff]  ;;  %v5629_v44 = vpop.permute.xlu0 %5628 }
 0x2ea   : > { %v2090_v60 = vsel %vm412_vm1, %v8355_v54, %v5470_v52  ;;  %4729 = vmatpush1.bf16.msra.mxu1 %v4728_v37  ;;  %v5480_v42 = vunpack.i.l.bf16 %v8358_v11  ;;  %v5486_v19 = vunpack.i.h.bf16 %v8359_v55  ;;  %v5490_v33 = vunpack.i.l.bf16 %v8360_v8 }
 0x2eb   : > { %4731 = vmatprep.subr.bf16.mxu1 %v4730_v17  ;;  %v2093_v54 = vsel %vm412_vm1, %v5475_v1, %v5476_v3  ;;  %v8361_v6 = vunpack.i.h.bf16 %v8354_v13  ;;  %v5631_v37 = vunpack.i.h.bf16 %v5629_v44  ;;  %v5630_v31 = vunpack.i.l.bf16 %v5629_v44  ;;  %v7383_v7 = vpop.permute.xlu1 %5623  ;;  %v8364_v44 = vld [vmem:[#allocation25_spill] sm:$0xff] }
 0x2ec   : > { %v8362_v58 = vpack.c.bf16 %v7205_v57, %v8327_v2  ;;  %v2095_v52 = vsel %vm412_vm1, %v5620_v9, %v5621_v56  ;;  %v5516_v46 = vunpack.i.h.bf16 %v7063_v39  ;;  %v5515_v30 = vunpack.i.l.bf16 %v7063_v39 }
 0x2ed   : > { %v2094_v51 = vsel %vm412_vm1, %v8361_v6, %v5620_v9  ;;  %v4626_v17 = vpack.c.bf16 %v2095_v52, %v2091_v10  ;;  %v5526_v1 = vunpack.i.h.bf16 %v7106_v28  ;;  %v5525_v3 = vunpack.i.l.bf16 %v7106_v28  ;;  %v7394_v9 = vpop.permute.xlu0 %5633 }
 0x2ee   : > { %4625 = vmatpush1.bf16.msra.mxu0 %v8362_v58  ;;  %v4628_v41 = vpack.c.bf16 %v2094_v51, %v2090_v60  ;;  %v2096_v13 = vsel %vm412_vm1, %v5621_v56, %v5630_v31  ;;  %v8363_v57 = vpack.c.bf16 %v7200_v22, %v8329_v29  ;;  %v2097_v2 = vsel %vm412_vm1, %v5630_v31, %v5631_v37  ;;  %v8368_v56 = vld [vmem:[#allocation62_spill] sm:$0xff] }
 0x2ef   : > { %v5536_v6 = vunpack.i.h.bf16 %v7117_v50  ;;  %v5535_v39 = vunpack.i.l.bf16 %v7117_v50  ;;  %v4736_v60 = vpack.c.bf16 %v2096_v13, %v2092_v25  ;;  %4627 = vmatprep.subr.bf16.mxu0 %v4626_v17  ;;  %v4734_v10 = vpack.c.bf16 %v2097_v2, %v2093_v54  ;;  %v5639_v52 = vpop.permute.xlu1 %5638 }
 0x2f0   : > { %4733 = vmatpush1.bf16.msra.mxu1 %v8363_v57  ;;  %v8365_v51 = vunpack.i.l.bf16 %v8364_v44  ;;  %v7402_v22 = vsel %vm670_vm3, %v5220_v63, %v5490_v33  ;;  %v8366_v29 = vunpack.i.h.bf16 %v8358_v11  ;;  %v8367_v50 = vunpack.i.l.bf16 %v8359_v55 }
 0x2f1   : > { %v5496_v54 = vunpack.i.h.bf16 %v8368_v56  ;;  %v5506_v37 = vunpack.i.h.bf16 %v7052_v34  ;;  %v5505_v58 = vunpack.i.l.bf16 %v7052_v34  ;;  %4735 = vmatprep.subr.bf16.mxu1 %v4734_v10  ;;  %v7414_v63 = vsel %vm2466_vm5, %v5515_v30, %v5516_v46 }
 0x2f2   : > { %v2218_v28 = vsel %vm541_vm2, %v8365_v51, %v5480_v42  ;;  %4629 = vmatpush1.bf16.msra.mxu0 %v4628_v41  ;;  %v2219_v31 = vsel %vm541_vm2, %v5480_v42, %v8366_v29  ;;  %v2221_v25 = vsel %vm541_vm2, %v8367_v50, %v5486_v19  ;;  %v7417_v11 = vsel %vm2466_vm5, %v5516_v46, %v5525_v3  ;;  %v8369_v19 = vld [vmem:[#allocation27_spill] sm:$0xff]  ;;  %v5649_v46 = vpop.permute.xlu0 %5648  ;;  %v2804_v50 = vld [vmem:[%s8153_s3] sm:$0xff] }
 0x2f3   : > { %4631 = vmatprep.subr.bf16.mxu0 %v4630_v0  ;;  %v5641_v42 = vunpack.i.h.bf16 %v5639_v52  ;;  %v5640_v41 = vunpack.i.l.bf16 %v5639_v52  ;;  %v7420_v55 = vsel %vm2466_vm5, %v5525_v3, %v5526_v1  ;;  %v8370_v17 = vunpack.i.l.bf16 %v8369_v19  ;;  %v7444_v27 = vpop.permute.xlu1 %5643 }
 0x2f4   : > { %4737 = vmatpush1.bf16.msra.mxu1 %v4736_v60  ;;  %v7428_v34 = vsel %vm2466_vm5, %v5536_v6, %v5515_v30  ;;  %v5546_v0 = vunpack.i.h.bf16 %v7165_v49  ;;  %v5545_v57 = vunpack.i.l.bf16 %v7165_v49  ;;  %v8371_v1 = vunpack.i.h.bf16 %v8364_v44 }
 0x2f5   : > { %v7425_v13 = vsel %vm2466_vm5, %v5535_v39, %v8370_v17  ;;  %4739 = vmatprep.subr.bf16.mxu1 %v4738_v18  ;;  %v5651_v2 = vunpack.i.h.bf16 %v5649_v46  ;;  %v5650_v60 = vunpack.i.l.bf16 %v5649_v46  ;;  %v2223_v30 = vsel %vm541_vm2, %v5640_v41, %v5641_v42 }
 0x2f6   : > { %v2222_v3 = vsel %vm541_vm2, %v8371_v1, %v5640_v41  ;;  %4633 = vmatpush1.bf16.msra.mxu0 %v4632_v36  ;;  %v5556_v6 = vunpack.i.h.bf16 %v7176_v48  ;;  %v5555_v39 = vunpack.i.l.bf16 %v7176_v48  ;;  %vm2595_vm10 = vcmask 15360   ;;  %v2809_v41 = vld [vmem:[%s8153_s3 + $0x28] sm:$0xff] }
 0x2f7   : > { %v4636_v10 = vpack.c.bf16 %v2222_v3, %v2218_v28  ;;  %v4634_v12 = vpack.c.bf16 %v2223_v30, %v2219_v31  ;;  %v2224_v18 = vsel %vm541_vm2, %v5641_v42, %v5650_v60  ;;  %v2225_v26 = vsel %vm541_vm2, %v5650_v60, %v5651_v2  ;;  %v5659_v52 = vpop.permute.xlu1 %5658 }
 0x2f8   : > { %4741 = vmatpush1.bf16.msra.mxu1 %v4740_v23  ;;  %v8372_v38 = vunpack.i.h.bf16 %v8360_v8  ;;  %v8373_v48 = vunpack.i.l.bf16 %v8368_v56  ;;  %v8374_v51 = vunpack.i.h.bf16 %v8369_v19  ;;  %v4744_v21 = vpack.c.bf16 %v2224_v18, %v8375_v62  ;;  %v7467_v23 = vpop.permute.xlu0 %5653  ;;  %v8376_v56 = vld [vmem:[#allocation58_spill] sm:$0xff] }
 0x2f9   : > { %4635 = vmatprep.subr.bf16.mxu0 %v4634_v12  ;;  %v4742_v29 = vpack.c.bf16 %v2225_v26, %v2221_v25  ;;  %v7470_v8 = vsel %vm2466_vm5, %v5505_v58, %v5506_v37  ;;  %v4648_v31 = vpack.c.bf16 %v7428_v34, %v7425_v13  ;;  %v7484_v37 = vsel %vm2466_vm5, %v5546_v0, %v5555_v39 }
 0x2fa   : > { %v2347_v36 = vsel %vm670_vm3, %v5490_v33, %v8372_v38  ;;  %v7459_v44 = vsel %vm670_vm3, %v8373_v48, %v5496_v54  ;;  %v7464_v28 = vsel %vm2466_vm5, %v8374_v51, %v5505_v58  ;;  %4637 = vmatpush1.bf16.msra.mxu0 %v4636_v10  ;;  %v4646_v54 = vpack.c.bf16 %v7414_v63, %v8376_v56  ;;  %v2808_v10 = vld [vmem:[%s8153_s3 + $0x20] sm:$0xff]  ;;  %v8381_v48 = vld [vmem:[#allocation63_spill] sm:$0xff] }
 0x2fb   : > { %v4756_v33 = vpack.c.bf16 %v7417_v11, %v7464_v28  ;;  %v4754_v25 = vpack.c.bf16 %v7420_v55, %v7470_v8  ;;  %v5565_v58 = vunpack.i.l.bf16 %v7223_v35  ;;  %4639 = vmatprep.subr.bf16.mxu0 %v4638_v47  ;;  %4743 = vmatprep.subr.bf16.mxu1 %v4742_v29  ;;  %v7493_v42 = vsel %vm2466_vm5, %v5545_v57, %v5546_v0  ;;  %v7523_v12 = vpop.permute.xlu1 %5663 }
 0x2fc   : > { %v7496_v63 = vsel %vm2466_vm5, %v5555_v39, %v5556_v6  ;;  %v5596_v19 = vunpack.i.h.bf16 %v7282_v20  ;;  %v5595_v17 = vunpack.i.l.bf16 %v7282_v20  ;;  %v5661_v46 = vunpack.i.h.bf16 %v5659_v52  ;;  %4745 = vmatpush1.bf16.msra.mxu1 %v4744_v21  ;;  %v5669_v3 = vpop.permute.xlu0 %5668 }
 0x2fd   : > { %v5660_v5 = vunpack.i.l.bf16 %v5659_v52  ;;  %v5576_v53 = vunpack.i.h.bf16 %v7234_v40  ;;  %v5575_v47 = vunpack.i.l.bf16 %v7234_v40  ;;  %v5585_v0 = vunpack.i.l.bf16 %v7271_v24  ;;  %3105 = vmatmul.mubr.f32.vlgmr.msra.gmra.mrb[8].mxu0 %v2804_v50 }
 0x2fe   : > { %v5605_v1 = vunpack.i.l.bf16 %v7335_v32  ;;  %v8377_v2 = vpack.c.bf16 %v7307_v16, %v8353_v15  ;;  %v8378_v60 = vunpack.i.h.bf16 %v8343_v45  ;;  %v5671_v30 = vunpack.i.h.bf16 %v5669_v3  ;;  %3110 = vmatprep.mubr.f32.mxu0 %v2809_v41 }
 0x2ff   : > { %v5670_v6 = vunpack.i.l.bf16 %v5669_v3  ;;  %v8379_v39 = vpack.c.bf16 %v7312_v59, %v8352_v4  ;;  %v2351_v40 = vsel %vm670_vm3, %v5660_v5, %v5661_v46  ;;  %v5586_v16 = vunpack.i.h.bf16 %v7271_v24  ;;  %3283 = vmatmul.mubr.f32.vlgmr.msra.gmra.mrb[8].mxu1 %v2804_v50  ;;  %v2813_v59 = vld [vmem:[%s8153_s3 + $0x48] sm:$0xff]  ;;  %v5679_v50 = vpop.permute.xlu1 %5678 }
 0x300   : > { %4747 = vmatprep.subr.bf16.mxu1 %v8377_v2  ;;  %v2350_v20 = vsel %vm670_vm3, %v8378_v60, %v5660_v5  ;;  %v5606_v15 = vunpack.i.h.bf16 %v7335_v32  ;;  %v4642_v18 = vpack.c.bf16 %v2351_v40, %v2347_v36  ;;  %v5615_v4 = vunpack.i.l.bf16 %v7345_v43  ;;  %3288 = vmatprep.mubr.f32.mxu1 %v2809_v41  ;;  %v7542_v62 = vpop.permute.xlu0 %5673 }
 0x301   : > { %4641 = vmatpush1.bf16.msra.mxu0 %v8379_v39  ;;  %v4644_v45 = vpack.c.bf16 %v2350_v20, %v7402_v22  ;;  %v2352_v26 = vsel %vm670_vm3, %v5661_v46, %v5670_v6  ;;  %v8380_v38 = vpack.c.bf16 %v7298_v61, %v8357_v14  ;;  %v2353_v24 = vsel %vm670_vm3, %v5670_v6, %v5671_v30  ;;  %v2816_v39 = vld [vmem:[%s8153_s3 + $0x60] sm:$0xff] }
 0x302   : > { %v7535_v32 = vsel %vm2595_vm10, %v5595_v17, %v5596_v19  ;;  %v7538_v22 = vsel %vm2595_vm10, %v5596_v19, %v5605_v1  ;;  %v5616_v36 = vunpack.i.h.bf16 %v7345_v43  ;;  %v4752_v51 = vpack.c.bf16 %v2352_v26, %v8381_v48  ;;  %4643 = vmatprep.subr.bf16.mxu0 %v4642_v18  ;;  %3111 = vmatmul.mubr.f32.gmra.mrb[10].mxu0 %v2808_v10 }
 0x303   : > { %4749 = vmatpush1.bf16.msra.mxu1 %v8380_v38  ;;  %v4750_v21 = vpack.c.bf16 %v2353_v24, %v7459_v44  ;;  %v2475_v61 = vsel %vm2466_vm5, %v5565_v58, %v5545_v57  ;;  %v7549_v14 = vsel %vm2595_vm10, %v5576_v53, %v5585_v0  ;;  %v2597_v29 = vsel %vm2595_vm10, %v5575_v47, %v5576_v53  ;;  %v7586_v8 = vpop.permute.xlu1 %5683 }
 0x304   : > { %3116 = vmatprep.mubr.f32.mxu0 %v2813_v59  ;;  %v5566_v43 = vunpack.i.h.bf16 %v7223_v35  ;;  %v4654_v56 = vpack.c.bf16 %v7535_v32, %v2597_v29  ;;  %v7555_v44 = vsel %vm2595_vm10, %v5585_v0, %v5586_v16  ;;  %v7558_v49 = vsel %vm2595_vm10, %v5605_v1, %v5606_v15  ;;  %v2812_v35 = vld [vmem:[%s8153_s3 + $0x40] sm:$0xff]  ;;  %v5689_v53 = vpop.permute.xlu0 %5688  ;;  %3289 = vmatmul.mubr.f32.gmra.mrb[10].mxu1 %v2808_v10 }
 0x305   : > { %4645 = vmatpush1.bf16.msra.mxu0 %v4644_v45  ;;  %4751 = vmatprep.subr.bf16.mxu1 %v4750_v21  ;;  %v4764_v57 = vpack.c.bf16 %v7538_v22, %v7549_v14  ;;  %v7563_v58 = vsel %vm2595_vm10, %v5615_v4, %v5575_v47  ;;  %v5681_v52 = vunpack.i.h.bf16 %v5679_v50  ;;  %v5680_v41 = vunpack.i.l.bf16 %v5679_v50  ;;  %v2817_v47 = vld [vmem:[%s8153_s3 + $0x68] sm:$0xff]  ;;  %v2807_v45 = vld [vmem:[%s8153_s3 + $0x18] sm:$0xff] }
 0x306   : > { %4647 = vmatprep.subr.bf16.mxu0 %v4646_v54  ;;  %v7569_v54 = vsel %vm2595_vm10, %v5616_v36, %v5595_v17  ;;  %v5626_v19 = vunpack.i.h.bf16 %v7383_v7  ;;  %v5625_v46 = vunpack.i.l.bf16 %v7383_v7  ;;  %v5635_v5 = vunpack.i.l.bf16 %v7394_v9  ;;  %3294 = vmatprep.mubr.f32.mxu1 %v2813_v59 }
 0x307   : > { %4753 = vmatpush1.bf16.msra.mxu1 %v4752_v51  ;;  %v2479_v0 = vsel %vm2466_vm5, %v5566_v43, %v5680_v41  ;;  %v5691_v17 = vunpack.i.h.bf16 %v5689_v53  ;;  %v5690_v1 = vunpack.i.l.bf16 %v5689_v53  ;;  %v2480_v7 = vsel %vm2466_vm5, %v5680_v41, %v5681_v52  ;;  %3117 = vmatmul.mubr.f32.gmra.mrb[12].mxu0 %v2812_v35  ;;  %v5699_v15 = vpop.permute.xlu1 %5698 }
 0x308   : > { %4755 = vmatprep.subr.bf16.mxu1 %v4754_v25  ;;  %v5645_v3 = vunpack.i.l.bf16 %v7444_v27  ;;  %v4652_v55 = vpack.c.bf16 %v2479_v0, %v2475_v61  ;;  %v4650_v25 = vpack.c.bf16 %v2480_v7, %v7493_v42  ;;  %v4762_v2 = vpack.c.bf16 %v7558_v49, %v7555_v44  ;;  %3122 = vmatprep.mubr.f32.mxu0 %v2817_v47  ;;  %v5694_v30 = vpop.permute.xlu0 %5693 }
 0x309   : > { %4649 = vmatpush1.bf16.msra.mxu0 %v4648_v31  ;;  %v4656_v60 = vpack.c.bf16 %v7569_v54, %v7563_v58  ;;  %v2481_v13 = vsel %vm2466_vm5, %v5681_v52, %v5690_v1  ;;  %v2482_v34 = vsel %vm2466_vm5, %v5690_v1, %v5691_v17  ;;  %v5676_v31 = vunpack.i.h.bf16 %v7542_v62  ;;  %3295 = vmatmul.mubr.f32.gmra.mrb[12].mxu1 %v2812_v35 }
 0x30a   : > { %v5675_v42 = vunpack.i.l.bf16 %v7542_v62  ;;  %v4760_v20 = vpack.c.bf16 %v2481_v13, %v7484_v37  ;;  %4651 = vmatprep.subr.bf16.mxu0 %v4650_v25  ;;  %v4758_v6 = vpack.c.bf16 %v2482_v34, %v7496_v63  ;;  %v5636_v11 = vunpack.i.h.bf16 %v7394_v9  ;;  %3300 = vmatprep.mubr.f32.mxu1 %v2817_v47 }
 0x30b   : > { %4757 = vmatpush1.bf16.msra.mxu1 %v4756_v33  ;;  %v7609_v28 = vsel %vm2595_vm10, %v5626_v19, %v5635_v5  ;;  %v5646_v33 = vunpack.i.h.bf16 %v7444_v27  ;;  %v2605_v37 = vsel %vm2595_vm10, %v5625_v46, %v5626_v19  ;;  %v2604_v63 = vsel %vm2595_vm10, %v5645_v3, %v5625_v46  ;;  %3123 = vmatmul.mubr.f32.gmra.mrb[14].mxu0 %v2816_v39  ;;  %v5704_v61 = vpop.permute.xlu1 %5703 }
 0x30c   : > { %v5656_v40 = vunpack.i.h.bf16 %v7467_v23  ;;  %v5655_v10 = vunpack.i.l.bf16 %v7467_v23  ;;  %v5666_v16 = vunpack.i.h.bf16 %v7523_v12  ;;  %4759 = vmatprep.subr.bf16.mxu1 %v4758_v6  ;;  %v5686_v27 = vunpack.i.h.bf16 %v7586_v8  ;;  %v5709_v24 = vpop.permute.xlu0 %5708  ;;  %4439 = vmatprep.mubr.msk.f32.mxu0 %vm968_vm0, %v2807_v45 }
 0x30d   : > { %4653 = vmatpush1.bf16.msra.mxu0 %v4652_v55  ;;  %v5685_v18 = vunpack.i.l.bf16 %v7586_v8  ;;  %v5701_v59 = vunpack.i.h.bf16 %v5699_v15  ;;  %v5700_v4 = vunpack.i.l.bf16 %v5699_v15  ;;  %v5665_v26 = vunpack.i.l.bf16 %v7523_v12  ;;  %3301 = vmatmul.mubr.f32.gmra.mrb[14].mxu1 %v2816_v39  ;;  %v8388_v15 = vld [vmem:[#allocation13_spill] sm:$0xff] }
 0x30e   : > { %4655 = vmatprep.subr.bf16.mxu0 %v4654_v56  ;;  %v5696_v23 = vunpack.i.h.bf16 %v5694_v30  ;;  %v5695_v38 = vunpack.i.l.bf16 %v5694_v30  ;;  %v2729_v32 = vsel %vm799_vm4, %v5675_v42, %v5676_v31  ;;  %v5711_v48 = vunpack.i.h.bf16 %v5709_v24  ;;  %4443 = vmatprep.mubr.msk.f32.mxu1 %vm968_vm0, %v2807_v45 }
 0x30f   : > { %4761 = vmatpush1.bf16.msra.mxu1 %v4760_v20  ;;  %v2608_v36 = vsel %vm2595_vm10, %v5646_v33, %v5700_v4  ;;  %v5710_v51 = vunpack.i.l.bf16 %v5709_v24  ;;  %v2609_v62 = vsel %vm2595_vm10, %v5700_v4, %v5701_v59  ;;  %v2725_v12 = vsel %vm799_vm4, %v5655_v10, %v5656_v40  ;;  %v8399_v24 = vld [vmem:[#allocation15_spill] sm:$0xff]  ;;  %v3992_v4 = vld [vmem:[%s8154_s4 + $0x20] sm:$0xff] }
 0x310   : > { %4763 = vmatprep.subr.bf16.mxu1 %v4762_v2  ;;  %v4660_v21 = vpack.c.bf16 %v2608_v36, %v2604_v63  ;;  %v4658_v29 = vpack.c.bf16 %v2609_v62, %v2605_v37  ;;  %v2607_v43 = vsel %vm2595_vm10, %v5635_v5, %v5636_v11  ;;  %v4662_v56 = vpack.c.bf16 %v2729_v32, %v2725_v12  ;;  %v5714_v41 = vpop.permute.xlu0 %5713  ;;  %v5719_v5 = vpop.permute.xlu1 %5718  ;;  %v8400_v32 = vld [vmem:[#allocation16_spill] sm:$0xff]  ;;  %v3989_v37 = vld [vmem:[%s8154_s4 + $0x8] sm:$0xff] }
 0x311   : > { %4657 = vmatpush1.bf16.msra.mxu0 %v4656_v60  ;;  %v2610_v50 = vsel %vm2595_vm10, %v5701_v59, %v5710_v51  ;;  %v2611_v44 = vsel %vm2595_vm10, %v5710_v51, %v5711_v48  ;;  %v2731_v49 = vsel %vm799_vm4, %v5685_v18, %v5686_v27  ;;  %v2724_v58 = vsel %vm799_vm4, %v5695_v38, %v5655_v10  ;;  %v8398_v38 = vld [vmem:[#allocation17_spill] sm:$0xff]  ;;  %v2806_v36 = vld [vmem:[%s8153_s3 + $0x10] sm:$0xff]  ;;  %v8401_v48 = vld [vmem:[#allocation14_spill] sm:$0xff] }
 0x312   : > { %v2728_v52 = vsel %vm799_vm4, %v5696_v23, %v5675_v42  ;;  %v4768_v9 = vpack.c.bf16 %v2610_v50, %v7609_v28  ;;  %4659 = vmatprep.subr.bf16.mxu0 %v4658_v29  ;;  %v4766_v35 = vpack.c.bf16 %v2611_v44, %v2607_v43  ;;  %v2730_v54 = vsel %vm799_vm4, %v5676_v31, %v5685_v18  ;;  %v8392_v18 = vld [vmem:[#allocation11_spill] sm:$0xff]  ;;  %v8397_v23 = vld [vmem:[#allocation10_spill] sm:$0xff]  ;;  %v2811_v51 = vld [vmem:[%s8153_s3 + $0x38] sm:$0xff] }
 0x313   : > { %4765 = vmatpush1.bf16.msra.mxu1 %v4764_v57  ;;  %v5706_v19 = vunpack.i.h.bf16 %v5704_v61  ;;  %v5705_v46 = vunpack.i.l.bf16 %v5704_v61  ;;  %v2727_v22 = vsel %vm799_vm4, %v5665_v26, %v5666_v16  ;;  %v5716_v14 = vunpack.i.h.bf16 %v5714_v41  ;;  %v2810_v62 = vld [vmem:[%s8153_s3 + $0x30] sm:$0xff]  ;;  %v2819_v29 = vld [vmem:[%s8153_s3 + $0x78] sm:$0xff]  ;;  %v3993_v27 = vld [vmem:[%s8154_s4 + $0x28] sm:$0xff] }
 0x314   : > { %v5715_v57 = vunpack.i.l.bf16 %v5714_v41  ;;  %4767 = vmatprep.subr.bf16.mxu1 %v4766_v35  ;;  %v4770_v53 = vpack.c.bf16 %v2731_v49, %v2727_v22  ;;  %v2726_v47 = vsel %vm799_vm4, %v5656_v40, %v5665_v26  ;;  %v4664_v0 = vpack.c.bf16 %v2728_v52, %v2724_v58  ;;  %v5724_v3 = vpop.permute.xlu0 %5723  ;;  %v5729_v13 = vpop.permute.xlu1 %5728  ;;  %v8396_v26 = vld [vmem:[#allocation12_spill] sm:$0xff]  ;;  %v3991_v16 = vld [vmem:[%s8154_s4 + $0x18] sm:$0xff] }
 0x315   : > { %4661 = vmatpush1.bf16.msra.mxu0 %v4660_v21  ;;  %v5721_v17 = vunpack.i.h.bf16 %v5719_v5  ;;  %v5720_v1 = vunpack.i.l.bf16 %v5719_v5  ;;  %v4772_v7 = vpack.c.bf16 %v2730_v54, %v2726_v47  ;;  %v5726_v55 = vunpack.i.h.bf16 %v5724_v3  ;;  %v2815_v21 = vld [vmem:[%s8153_s3 + $0x58] sm:$0xff]  ;;  %v2814_v61 = vld [vmem:[%s8153_s3 + $0x50] sm:$0xff] }
 0x316   : > { %4663 = vmatprep.subr.bf16.mxu0 %v4662_v56  ;;  %v5725_v8 = vunpack.i.l.bf16 %v5724_v3  ;;  %v2733_v25 = vsel %vm799_vm4, %v5705_v46, %v5706_v19  ;;  %v2734_v60 = vsel %vm799_vm4, %v5706_v19, %v5715_v57  ;;  %v2735_v31 = vsel %vm799_vm4, %v5715_v57, %v5716_v14  ;;  %v2818_v12 = vld [vmem:[%s8153_s3 + $0x70] sm:$0xff] }
 0x317   : > { %4769 = vmatpush1.bf16.msra.mxu1 %v4768_v9  ;;  %v2737_v2 = vsel %vm799_vm4, %v5720_v1, %v5721_v17  ;;  %v5731_v20 = vunpack.i.h.bf16 %v5729_v13  ;;  %v5730_v30 = vunpack.i.l.bf16 %v5729_v13  ;;  %v8402_v43 = vmov 0.0   ;;  %v3990_v63 = vld [vmem:[%s8154_s4 + $0x10] sm:$0xff] }
 0x318   : > { %4771 = vmatprep.subr.bf16.mxu1 %v4770_v53  ;;  %v4666_v34 = vpack.c.bf16 %v2737_v2, %v2733_v25  ;;  %v2738_v42 = vsel %vm799_vm4, %v5721_v17, %v5725_v8  ;;  %v2739_v6 = vsel %vm799_vm4, %v5725_v8, %v5726_v55  ;;  %5753 = vrot.lane.b32.xlu0 %v8402_v43, %s5959_s14  ;;  %v5734_v10 = vpop.permute.xlu0 %5733  ;;  %v7830_v59 = vpop.permute.xlu1 %5738 }
 0x319   : > { %4665 = vmatpush1.bf16.msra.mxu0 %v4664_v0  ;;  %v4776_v39 = vpack.c.bf16 %v2738_v42, %v2734_v60  ;;  %v4774_v11 = vpack.c.bf16 %v2739_v6, %v2735_v31  ;;  %v2732_v28 = vsel %vm799_vm4, %v5730_v30, %v5705_v46  ;;  %v2736_v33 = vsel %vm799_vm4, %v5731_v20, %v5720_v1 }
 0x31a   : > { %4667 = vmatprep.subr.bf16.mxu0 %v4666_v34  ;;  %v4668_v40 = vpack.c.bf16 %v2736_v33, %v2732_v28  ;;  %5758 = vrot.lane.b32.xlu1 %v8402_v43, %s5959_s14 }
 0x31b   : > { %4773 = vmatpush1.bf16.msra.mxu1 %v4772_v7 }
 0x31c   : > { %4775 = vmatprep.subr.bf16.mxu1 %v4774_v11 }
 0x31d   : > { %4669 = vmatpush1.bf16.msra.mxu0 %v4668_v40 }
 0x31e   : > { %4672 = vmatprep.subr.msk.bf16.mxu0 %vm7662_vm12, %v8392_v18 }
 0x31f   : > { %4777 = vmatpush1.bf16.msra.mxu1 %v4776_v39 }
 0x320   : > { %4780 = vmatprep.subr.msk.bf16.mxu1 %vm7655_vm11, %v8388_v15 }
 0x321   : > { %4675 = vmatpush1.bf16.msk.msra.mxu0 %vm7682_vm14, %v8397_v23 }
 0x322   : > { %4678 = vmatprep.subr.msk.bf16.mxu0 %vm7662_vm12, %v8399_v24 }
 0x323   : > { %4783 = vmatpush1.bf16.msk.msra.mxu1 %vm7672_vm13, %v8396_v26 }
 0x324   : > { %4786 = vmatprep.subr.msk.bf16.mxu1 %vm7655_vm11, %v8398_v38 }
 0x325   : > { %4681 = vmatpush1.bf16.msk.msra.mxu0 %vm7682_vm14, %v8401_v48 }
 0x327   : > { %4789 = vmatpush1.bf16.msk.msra.mxu1 %vm7672_vm13, %v8400_v32 }
 0x328   : > { %3194 = vmatmul.mubr.f32.vlgmr.msra.gmra.mrb[8].mxu0 %v2806_v36 }
 0x329   : > { %4440 = vmatprep.mubr.msk.f32.mxu0 %vm968_vm0, %v2811_v51 }
 0x32a   : > { %3372 = vmatmul.mubr.f32.vlgmr.msra.gmra.mrb[8].mxu1 %v2806_v36 }
 0x32b   : > { %4444 = vmatprep.mubr.msk.f32.mxu1 %vm968_vm0, %v2811_v51 }
 0x32c   : > { %3200 = vmatmul.mubr.f32.gmra.mrb[10].mxu0 %v2810_v62 }
 0x32d   : > { %4441 = vmatprep.mubr.msk.f32.mxu0 %vm968_vm0, %v2815_v21 }
 0x32e   : > { %3378 = vmatmul.mubr.f32.gmra.mrb[10].mxu1 %v2810_v62 }
 0x32f   : > { %4445 = vmatprep.mubr.msk.f32.mxu1 %vm968_vm0, %v2815_v21 }
 0x330   : > { %3206 = vmatmul.mubr.f32.gmra.mrb[12].mxu0 %v2814_v61 }
 0x331   : > { %4442 = vmatprep.mubr.msk.f32.mxu0 %vm968_vm0, %v2819_v29 }
 0x332   : > { %3384 = vmatmul.mubr.f32.gmra.mrb[12].mxu1 %v2814_v61 }
 0x333   : > { %4446 = vmatprep.mubr.msk.f32.mxu1 %vm968_vm0, %v2819_v29 }
 0x334   : > { %3212 = vmatmul.mubr.f32.gmra.mrb[14].mxu0 %v2818_v12 }
 0x335   : > { %4447 = vmatprep.mubr.msk.f32.mxu0 %vm968_vm0, %v3989_v37 }
 0x336   : > { %3390 = vmatmul.mubr.f32.gmra.mrb[14].mxu1 %v2818_v12 }
 0x337   : > { %4451 = vmatprep.mubr.msk.f32.mxu1 %vm968_vm0, %v3989_v37 }
 0x3fb   : > { %v3195_v56 = vpop.f32.mrb[8].mxu0 }
 0x3fc   : > { %v3396_v58 = vmax.f32 %v3195_v56, 0.0  ;;  %v3197_v52 = vpop.f32.mrb[9].mxu0 }
 0x3fd   : > { %v3373_v50 = vpop.f32.mrb[8].mxu1  ;;  %v3397_v35 = vmax.f32 %v3197_v52, 0.0 }
 0x3fe   : > { %v3398_v44 = vmax.f32 %v3373_v50, 0.0  ;;  %v3375_v49 = vpop.f32.mrb[9].mxu1  ;;  %v3412_v54 = vsel %vm1192_vm6, %v3396_v58, 0.0 }
 0x3ff   : > { %v3399_v9 = vmax.f32 %v3375_v49, 0.0  ;;  %v3413_v22 = vsel %vm1193_vm7, %v3397_v35, 0.0  ;;  %v3201_v57 = vpop.f32.mrb[10].mxu0 }
 0x400   : > { %v3414_v41 = vsel %vm1194_vm8, %v3398_v44, 0.0  ;;  %v5792_v53 = vpack.i.bf16 %v3413_v22, %v3412_v54  ;;  %v3203_v47 = vpop.f32.mrb[11].mxu0  ;;  %v3400_v0 = vmax.f32 %v3201_v57, 0.0  ;;  %v7834_v54 = vpop.permute.xlu1 %5748 }
 0x401   : > { %v3415_v19 = vsel %vm1195_vm9, %v3399_v9, 0.0  ;;  %v3379_v46 = vpop.f32.mrb[10].mxu1  ;;  %v3401_v1 = vmax.f32 %v3203_v47, 0.0 }
 0x402   : > { %v7743_v14 = vpack.i.bf16 %v3415_v19, %v3414_v41  ;;  %v3381_v5 = vpop.f32.mrb[11].mxu1  ;;  %v3402_v17 = vmax.f32 %v3379_v46, 0.0  ;;  %5763 = vrot.lane.b32.xlu0 %v5792_v53, %s5956_s12  ;;  %v3416_v55 = vsel %vm1192_vm6, %v3400_v0, 0.0  ;;  %v7748_v8 = vpack.c.bf16 %v3400_v0, %v3396_v58 }
 0x403   : > { %v3403_v7 = vmax.f32 %v3381_v5, 0.0  ;;  %v3207_v60 = vpop.f32.mrb[12].mxu0  ;;  %v3417_v34 = vsel %vm1193_vm7, %v3401_v1, 0.0  ;;  %v7758_v31 = vpack.c.bf16 %v3401_v1, %v3397_v35  ;;  %v7832_v35 = vpop.permute.xlu0 %5743 }
 0x404   : > { %v3418_v25 = vsel %vm1194_vm8, %v3402_v17, 0.0  ;;  %v7752_v2 = vpack.c.bf16 %v3402_v17, %v3398_v44  ;;  %5768 = vrot.lane.b32.xlu1 %v7743_v14, %s5956_s12  ;;  %v3209_v30 = vpop.f32.mrb[13].mxu0  ;;  %v5872_v6 = vpack.i.bf16 %v3417_v34, %v3416_v55  ;;  %v3404_v28 = vmax.f32 %v3207_v60, 0.0  ;;  %v7838_v46 = vpop.permute.xlu1 %5758 }
 0x405   : > { %v3385_v3 = vpop.f32.mrb[12].mxu1  ;;  %v3419_v42 = vsel %vm1195_vm9, %v3403_v7, 0.0  ;;  %v7762_v20 = vpack.c.bf16 %v3403_v7, %v3399_v9  ;;  %v3405_v40 = vmax.f32 %v3209_v30, 0.0  ;;  %v5735_v60 = vunpack.i.l.bf16 %v5734_v10 }
 0x406   : > { %v3387_v13 = vpop.f32.mrb[13].mxu1  ;;  %v5882_v39 = vpack.i.bf16 %v3419_v42, %v3418_v25  ;;  %5773 = vrot.lane.b32.xlu0 %v5792_v53, %s5958_s13  ;;  %v3406_v33 = vmax.f32 %v3385_v3, 0.0  ;;  %v3420_v36 = vsel %vm1192_vm6, %v3404_v28, 0.0  ;;  %v5736_v30 = vunpack.i.h.bf16 %v5734_v10 }
 0x407   : > { %v3407_v15 = vmax.f32 %v3387_v13, 0.0  ;;  %v3213_v18 = vpop.f32.mrb[14].mxu0  ;;  %v3421_v51 = vsel %vm1193_vm7, %v3405_v40, 0.0  ;;  %v7836_v19 = vpop.permute.xlu0 %5753 }
 0x408   : > { %5778 = vrot.lane.b32.xlu1 %v7743_v14, %s5958_s13  ;;  %v3408_v23 = vmax.f32 %v3213_v18, 0.0  ;;  %v3215_v24 = vpop.f32.mrb[15].mxu0  ;;  %v3422_v48 = vsel %vm1194_vm8, %v3406_v33, 0.0  ;;  %v5902_v21 = vpack.i.bf16 %v3421_v51, %v3420_v36  ;;  %v5755_v37 = vunpack.i.l.bf16 %v7836_v19 }
 0x409   : > { %v3391_v11 = vpop.f32.mrb[14].mxu1  ;;  %v3423_v62 = vsel %vm1195_vm9, %v3407_v15, 0.0  ;;  %v3409_v44 = vmax.f32 %v3215_v24, 0.0 }
 0x40a   : > { %v3393_v26 = vpop.f32.mrb[15].mxu1  ;;  %v3410_v38 = vmax.f32 %v3391_v11, 0.0  ;;  %5783 = vrot.lane.b32.xlu0 %v5792_v53, %s5959_s14  ;;  %v5912_v61 = vpack.i.bf16 %v3423_v62, %v3422_v48  ;;  %v7778_v29 = vpack.c.bf16 %v3408_v23, %v3404_v28  ;;  %v3424_v56 = vsel %vm1192_vm6, %v3408_v23, 0.0 }
 0x40b   : > { %v3411_v32 = vmax.f32 %v3393_v26, 0.0  ;;  %v3425_v9 = vsel %vm1193_vm7, %v3409_v44, 0.0  ;;  %v7793_v41 = vpack.c.bf16 %v3409_v44, %v3405_v40  ;;  %v5745_v44 = vunpack.i.l.bf16 %v7832_v35 }
 0x40c   : > { %5788 = vrot.lane.b32.xlu1 %v7743_v14, %s5959_s14  ;;  %v3426_v12 = vsel %vm1194_vm8, %v3410_v38, 0.0  ;;  %v7782_v50 = vpack.c.bf16 %v3410_v38, %v3406_v33  ;;  %v5917_v45 = vpack.i.bf16 %v3425_v9, %v3424_v56  ;;  %v5756_v9 = vunpack.i.h.bf16 %v7836_v19 }
 0x40d   : > { %v3427_v49 = vsel %vm1195_vm9, %v3411_v32, 0.0  ;;  %v7788_v58 = vpack.c.bf16 %v3411_v32, %v3407_v15 }
 0x40e   : > { %v5922_v52 = vpack.i.bf16 %v3427_v49, %v3426_v12  ;;  %5793 = vrot.lane.b32.xlu0 %v5792_v53, %s5960_s15  ;;  %v5746_v12 = vunpack.i.h.bf16 %v7832_v35  ;;  %v5751_v49 = vunpack.i.h.bf16 %v7834_v54 }
 0x410   : > { %5803 = vrot.lane.b32.xlu1 %v5882_v39, %s5956_s12 }
 0x412   : > { %5798 = vrot.lane.b32.xlu0 %v5872_v6, %s5956_s12 }
 0x414   : > { %5813 = vrot.lane.b32.xlu1 %v5882_v39, %s5958_s13 }
 0x416   : > { %5808 = vrot.lane.b32.xlu0 %v5872_v6, %s5958_s13 }
 0x418   : > { %5823 = vrot.lane.b32.xlu1 %v5882_v39, %s5959_s14 }
 0x41a   : > { %5818 = vrot.lane.b32.xlu0 %v5872_v6, %s5959_s14 }
 0x41c   : > { %5828 = vrot.lane.b32.xlu1 %v5902_v21, %s5956_s12 }
 0x41e   : > { %5833 = vrot.lane.b32.xlu0 %v5912_v61, %s5956_s12 }
 0x420   : > { %5838 = vrot.lane.b32.xlu1 %v5902_v21, %s5958_s13 }
 0x422   : > { %5843 = vrot.lane.b32.xlu0 %v5912_v61, %s5958_s13 }
 0x424   : > { %5848 = vrot.lane.b32.xlu1 %v5902_v21, %s5959_s14 }
 0x426   : > { %5853 = vrot.lane.b32.xlu0 %v5912_v61, %s5959_s14 }
 0x428   : > { %5858 = vrot.lane.b32.xlu1 %v5917_v45, %s5956_s12 }
 0x42a   : > { %5868 = vrot.lane.b32.xlu0 %v5922_v52, %s5956_s12  ;;  %s4307_s12 = scalar_lea.vmem (%p6031_p5), %s8155_s5, %s4461_s10 }
 0x42c   : > { %5863 = vrot.lane.b32.xlu1 %v7743_v14, %s5960_s15 }
 0x42e   : > { %5873 = vrot.lane.b32.xlu0 %v5872_v6, %s5960_s15 }
 0x430   : > { %5878 = vrot.lane.b32.xlu1 %v5917_v45, %s5958_s13 }
 0x432   : > { %5888 = vrot.lane.b32.xlu0 %v5922_v52, %s5958_s13 }
 0x434   : > { %5883 = vrot.lane.b32.xlu1 %v5882_v39, %s5960_s15 }
 0x436   : > { %5893 = vrot.lane.b32.xlu0 %v8402_v43, %s5960_s15 }
 0x438   : > { %5898 = vrot.lane.b32.xlu1 %v5917_v45, %s5959_s14 }
 0x43a   : > { %5908 = vrot.lane.b32.xlu0 %v5922_v52, %s5959_s14 }
 0x43c   : > { %5903 = vrot.lane.b32.xlu1 %v5902_v21, %s5960_s15  ;;  %v5741_v21 = vunpack.i.h.bf16 %v7830_v59 }
 0x43e   : > { %5913 = vrot.lane.b32.xlu0 %v5912_v61, %s5960_s15  ;;  %v5740_v61 = vunpack.i.l.bf16 %v7830_v59 }
 0x440   : > { %5918 = vrot.lane.b32.xlu1 %v5917_v45, %s5960_s15 }
 0x442   : > { %5923 = vrot.lane.b32.xlu0 %v5922_v52, %s5960_s15  ;;  %v5750_v52 = vunpack.i.l.bf16 %v7834_v54 }
 0x444   : > { %5928 = vrot.lane.b32.xlu1 %v8402_v43, %s5960_s15 }
 0x474   : > { %v5764_v43 = vpop.permute.xlu0 %5763 }
 0x475   : > { %v5766_v7 = vunpack.i.h.bf16 %v5764_v43  ;;  %v5765_v3 = vunpack.i.l.bf16 %v5764_v43 }
 0x476   : > { %v5769_v22 = vpop.permute.xlu1 %5768 }
 0x477   : > { %v5771_v47 = vunpack.i.h.bf16 %v5769_v22  ;;  %v5770_v0 = vunpack.i.l.bf16 %v5769_v22  ;;  %v3524_v33 = vsel %vm412_vm1, %v5735_v60, %v5765_v3  ;;  %v3525_v40 = vsel %vm412_vm1, %v5765_v3, %v5766_v7 }
 0x478   : > { %v7840_v14 = vpop.permute.xlu0 %5773 }
 0x479   : > { %v3527_v34 = vsel %vm412_vm1, %v5770_v0, %v5771_v47  ;;  %v3526_v15 = vsel %vm412_vm1, %v5766_v7, %v5770_v0  ;;  %v5776_v59 = vunpack.i.h.bf16 %v7840_v14  ;;  %v5775_v43 = vunpack.i.l.bf16 %v7840_v14 }
 0x47a   : > { %v7842_v57 = vpop.permute.xlu1 %5778  ;;  %v5760_v14 = vunpack.i.l.bf16 %v7838_v46 }
 0x47b   : > { %v5780_v10 = vunpack.i.l.bf16 %v7842_v57  ;;  %v5781_v22 = vunpack.i.h.bf16 %v7842_v57 }
 0x47c   : > { %v7844_v5 = vpop.permute.xlu0 %5783 }
 0x47d   : > { %v5786_v47 = vunpack.i.h.bf16 %v7844_v5  ;;  %v5785_v0 = vunpack.i.l.bf16 %v7844_v5  ;;  %v7897_v5 = vsel %vm541_vm2, %v5776_v59, %v5780_v10 }
 0x47e   : > { %v7846_v53 = vpop.permute.xlu1 %5788 }
 0x47f   : > { %v5790_v35 = vunpack.i.l.bf16 %v7846_v53  ;;  %v5791_v7 = vunpack.i.h.bf16 %v7846_v53  ;;  %v7900_v53 = vsel %vm541_vm2, %v5745_v44, %v5775_v43 }
 0x480   : > { %v7848_v17 = vpop.permute.xlu0 %5793 }
 0x481   : > { %v8222_v3 = vunpack.i.h.bf16 %v7848_v17 }
 0x482   : > { %v5804_v1 = vpop.permute.xlu1 %5803 }
 0x483   : > { %v5806_v55 = vunpack.i.h.bf16 %v5804_v1  ;;  %v5805_v25 = vunpack.i.l.bf16 %v5804_v1  ;;  %v5761_v1 = vunpack.i.h.bf16 %v7838_v46 }
 0x484   : > { %v5799_v13 = vpop.permute.xlu0 %5798 }
 0x485   : > { %v3531_v42 = vsel %vm412_vm1, %v5805_v25, %v5806_v55  ;;  %v5801_v39 = vunpack.i.h.bf16 %v5799_v13  ;;  %v5800_v11 = vunpack.i.l.bf16 %v5799_v13  ;;  %v8223_v55 = vunpack.i.l.bf16 %v7848_v17 }
 0x486   : > { %v7852_v6 = vpop.permute.xlu1 %5813  ;;  %v4834_v28 = vpack.c.bf16 %v3531_v42, %v3527_v34 }
 0x487   : > { %v3530_v18 = vsel %vm412_vm1, %v5801_v39, %v5805_v25  ;;  %v3528_v26 = vsel %vm412_vm1, %v5736_v30, %v5800_v11  ;;  %v3529_v23 = vsel %vm412_vm1, %v5800_v11, %v5801_v39  ;;  %v5816_v57 = vunpack.i.h.bf16 %v7852_v6 }
 0x488   : > { %4835 = vmatprep.subr.bf16.mxu1 %v4834_v28  ;;  %v4836_v38 = vpack.c.bf16 %v3530_v18, %v3526_v15  ;;  %v4792_v24 = vpack.c.bf16 %v3528_v26, %v3524_v33  ;;  %v5809_v32 = vpop.permute.xlu0 %5808  ;;  %v4790_v36 = vpack.c.bf16 %v3529_v23, %v3525_v40  ;;  %v5815_v60 = vunpack.i.l.bf16 %v7852_v6 }
 0x489   : > { %v5811_v13 = vunpack.i.h.bf16 %v5809_v32  ;;  %v5810_v42 = vunpack.i.l.bf16 %v5809_v32  ;;  %v3653_v30 = vsel %vm541_vm2, %v5775_v43, %v5776_v59  ;;  %v7904_v39 = vsel %vm670_vm3, %v5786_v47, %v5790_v35 }
 0x48a   : > { %v7860_v48 = vpop.permute.xlu1 %5823  ;;  %4791 = vmatprep.subr.bf16.mxu0 %v4790_v36  ;;  %4837 = vmatpush1.bf16.msra.mxu1 %v4836_v38  ;;  %v7907_v11 = vsel %vm670_vm3, %v5755_v37, %v5785_v0  ;;  %v7910_v6 = vsel %vm541_vm2, %v5780_v10, %v5781_v22  ;;  %v7913_v28 = vsel %vm670_vm3, %v5785_v0, %v5786_v47 }
 0x48b   : > { %4793 = vmatpush1.bf16.msra.mxu0 %v4792_v24  ;;  %v7920_v18 = vsel %vm670_vm3, %v5790_v35, %v5791_v7  ;;  %v7927_v26 = vsel %vm799_vm4, %v8223_v55, %v8222_v3  ;;  %v5826_v23 = vunpack.i.h.bf16 %v7860_v48  ;;  %v5825_v38 = vunpack.i.l.bf16 %v7860_v48 }
 0x48c   : > { %v7862_v51 = vpop.permute.xlu0 %5818  ;;  %v7932_v24 = vsel %vm541_vm2, %v5811_v13, %v5815_v60  ;;  %v3659_v36 = vsel %vm541_vm2, %v5815_v60, %v5816_v57  ;;  %v3657_v48 = vsel %vm541_vm2, %v5810_v42, %v5811_v13 }
 0x48d   : > { %v5821_v44 = vunpack.i.h.bf16 %v7862_v51  ;;  %v5820_v59 = vunpack.i.l.bf16 %v7862_v51  ;;  %v4798_v13 = vpack.c.bf16 %v3657_v48, %v3653_v30 }
 0x48e   : > { %v7864_v62 = vpop.permute.xlu1 %5828 }
 0x48f   : > { %v5831_v33 = vunpack.i.h.bf16 %v7864_v62  ;;  %v5830_v40 = vunpack.i.l.bf16 %v7864_v62  ;;  %v3656_v62 = vsel %vm541_vm2, %v5746_v12, %v5810_v42  ;;  %v7948_v55 = vsel %vm670_vm3, %v5821_v44, %v5825_v38 }
 0x490   : > { %v7869_v56 = vpop.permute.xlu0 %5833  ;;  %v3785_v30 = vsel %vm670_vm3, %v5820_v59, %v5821_v44  ;;  %v4852_v44 = vpack.c.bf16 %v7948_v55, %v7904_v39  ;;  %v8404_v39 = vunpack.i.h.bf16 %v7848_v17 }
 0x491   : > { %v5836_v43 = vunpack.i.h.bf16 %v7869_v56  ;;  %v5835_v22 = vunpack.i.l.bf16 %v7869_v56  ;;  %v3532_v35 = vsel %vm412_vm1, %v5740_v61, %v5830_v40  ;;  %v3533_v7 = vsel %vm412_vm1, %v5830_v40, %v5831_v33 }
 0x492   : > { %v7875_v45 = vpop.permute.xlu1 %5838  ;;  %v7952_v61 = vsel %vm670_vm3, %v5825_v38, %v5826_v23  ;;  %v4844_v23 = vpack.c.bf16 %v7932_v24, %v7897_v5  ;;  %v3784_v5 = vsel %vm670_vm3, %v5756_v9, %v5820_v59 }
 0x493   : > { %v5840_v56 = vunpack.i.l.bf16 %v7875_v45  ;;  %v3535_v40 = vsel %vm412_vm1, %v5835_v22, %v5836_v43  ;;  %v4850_v43 = vpack.c.bf16 %v7952_v61, %v7920_v18  ;;  %v4808_v61 = vpack.c.bf16 %v3784_v5, %v7907_v11 }
 0x494   : > { %v7889_v25 = vpop.permute.xlu0 %5843 }
 0x496   : > { %v7894_v34 = vpop.permute.xlu1 %5848 }
 0x497   : > { %v5850_v18 = vunpack.i.l.bf16 %v7894_v34 }
 0x498   : > { %v7917_v15 = vpop.permute.xlu0 %5853 }
 0x499   : > { %v5855_v54 = vunpack.i.l.bf16 %v7917_v15 }
 0x49a   : > { %v5859_v32 = vpop.permute.xlu1 %5858 }
 0x49b   : > { %v5861_v37 = vunpack.i.h.bf16 %v5859_v32  ;;  %v5860_v10 = vunpack.i.l.bf16 %v5859_v32 }
 0x49c   : > { %v5869_v0 = vpop.permute.xlu0 %5868 }
 0x49d   : > { %v3536_v47 = vsel %vm412_vm1, %v5741_v21, %v5860_v10  ;;  %v3537_v12 = vsel %vm412_vm1, %v5860_v10, %v5861_v37  ;;  %v5871_v60 = vunpack.i.h.bf16 %v5869_v0  ;;  %v5870_v32 = vunpack.i.l.bf16 %v5869_v0 }
 0x49e   : > { %v4796_v57 = vpack.c.bf16 %v3536_v47, %v3532_v35  ;;  %v7945_v3 = vpop.permute.xlu1 %5863  ;;  %v4794_v51 = vpack.c.bf16 %v3537_v12, %v3533_v7  ;;  %v3534_v21 = vsel %vm412_vm1, %v5831_v33, %v5835_v22  ;;  %v5841_v35 = vunpack.i.h.bf16 %v7875_v45 }
 0x49f   : > { %v3538_v42 = vsel %vm412_vm1, %v5861_v37, %v5870_v32  ;;  %v3539_v10 = vsel %vm412_vm1, %v5870_v32, %v5871_v60  ;;  %v4800_v33 = vpack.c.bf16 %v3656_v62, %v7900_v53  ;;  %v4842_v37 = vpack.c.bf16 %v3659_v36, %v7910_v6 }
 0x4a0   : > { %4795 = vmatprep.subr.bf16.mxu0 %v4794_v51  ;;  %v4840_v47 = vpack.c.bf16 %v3538_v42, %v3534_v21  ;;  %v7959_v0 = vpop.permute.xlu0 %5873  ;;  %v4838_v7 = vpack.c.bf16 %v3539_v10, %v3535_v40  ;;  %v5846_v45 = vunpack.i.h.bf16 %v7889_v25  ;;  %v5845_v22 = vunpack.i.l.bf16 %v7889_v25 }
 0x4a1   : > { %4797 = vmatpush1.bf16.msra.mxu0 %v4796_v57  ;;  %v3660_v53 = vsel %vm541_vm2, %v5750_v52, %v5840_v56  ;;  %v4806_v6 = vpack.c.bf16 %v3785_v30, %v7913_v28  ;;  %v3661_v19 = vsel %vm541_vm2, %v5840_v56, %v5841_v35  ;;  %v5851_v60 = vunpack.i.h.bf16 %v7894_v34 }
 0x4a2   : > { %v5879_v38 = vpop.permute.xlu1 %5878  ;;  %4799 = vmatprep.subr.bf16.mxu0 %v4798_v13  ;;  %4839 = vmatprep.subr.bf16.mxu1 %v4838_v7  ;;  %v3662_v28 = vsel %vm541_vm2, %v5841_v35, %v5845_v22  ;;  %v5876_v32 = vunpack.i.h.bf16 %v7959_v0  ;;  %v5875_v51 = vunpack.i.l.bf16 %v7959_v0  ;;  %v5856_v21 = vunpack.i.h.bf16 %v7917_v15 }
 0x4a3   : > { %v5881_v48 = vunpack.i.h.bf16 %v5879_v38  ;;  %v5880_v12 = vunpack.i.l.bf16 %v5879_v38  ;;  %4841 = vmatpush1.bf16.msra.mxu1 %v4840_v47  ;;  %v3788_v10 = vsel %vm670_vm3, %v5760_v14, %v5850_v18  ;;  %v5866_v35 = vunpack.i.h.bf16 %v7945_v3 }
 0x4a4   : > { %v5889_v24 = vpop.permute.xlu0 %5888  ;;  %4843 = vmatprep.subr.bf16.mxu1 %v4842_v37  ;;  %v5865_v47 = vunpack.i.l.bf16 %v7945_v3  ;;  %v3790_v15 = vsel %vm670_vm3, %v5851_v60, %v5855_v54  ;;  %v3789_v37 = vsel %vm670_vm3, %v5850_v18, %v5851_v60  ;;  %v3913_v14 = vsel %vm799_vm4, %v5875_v51, %v5876_v32 }
 0x4a5   : > { %v3664_v25 = vsel %vm541_vm2, %v5751_v49, %v5880_v12  ;;  %4801 = vmatpush1.bf16.msra.mxu0 %v4800_v33  ;;  %v3665_v9 = vsel %vm541_vm2, %v5880_v12, %v5881_v48  ;;  %v5891_v62 = vunpack.i.h.bf16 %v5889_v24  ;;  %v5890_v59 = vunpack.i.l.bf16 %v5889_v24 }
 0x4a6   : > { %v4804_v36 = vpack.c.bf16 %v3664_v25, %v3660_v53  ;;  %v5884_v52 = vpop.permute.xlu1 %5883  ;;  %v4802_v57 = vpack.c.bf16 %v3665_v9, %v3661_v19  ;;  %v3663_v49 = vsel %vm541_vm2, %v5845_v22, %v5846_v45  ;;  %v8403_v18 = vunpack.i.l.bf16 %v7848_v17 }
 0x4a7   : > { %v3666_v56 = vsel %vm541_vm2, %v5881_v48, %v5890_v59  ;;  %4845 = vmatpush1.bf16.msra.mxu1 %v4844_v23  ;;  %v3667_v13 = vsel %vm541_vm2, %v5890_v59, %v5891_v62  ;;  %v5886_v0 = vunpack.i.h.bf16 %v5884_v52  ;;  %v5885_v30 = vunpack.i.l.bf16 %v5884_v52 }
 0x4a8   : > { %4803 = vmatprep.subr.bf16.mxu0 %v4802_v57  ;;  %v4848_v42 = vpack.c.bf16 %v3666_v56, %v3662_v28  ;;  %v5894_v34 = vpop.permute.xlu0 %5893  ;;  %v4846_v40 = vpack.c.bf16 %v3667_v13, %v3663_v49  ;;  %v3791_v48 = vsel %vm670_vm3, %v5855_v54, %v5856_v21  ;;  %v4814_v46 = vpack.c.bf16 %v3913_v14, %v7927_v26 }
 0x4a9   : > { %4805 = vmatpush1.bf16.msra.mxu0 %v4804_v36  ;;  %v5895_v23 = vunpack.i.l.bf16 %v5894_v34  ;;  %v5896_v38 = vunpack.i.h.bf16 %v5894_v34  ;;  %v3915_v19 = vsel %vm799_vm4, %v5885_v30, %v5886_v0  ;;  %v3914_v28 = vsel %vm799_vm4, %v5876_v32, %v5885_v30 }
 0x4aa   : > { %v5899_v7 = vpop.permute.xlu1 %5898  ;;  %4807 = vmatprep.subr.bf16.mxu0 %v4806_v6  ;;  %4847 = vmatprep.subr.bf16.mxu1 %v4846_v40 }
 0x4ab   : > { %v5901_v11 = vunpack.i.h.bf16 %v5899_v7  ;;  %v5900_v33 = vunpack.i.l.bf16 %v5899_v7  ;;  %4849 = vmatpush1.bf16.msra.mxu1 %v4848_v42  ;;  %v3908_v24 = vsel %vm799_vm4, %v5895_v23, %v8403_v18  ;;  %v4083_v18 = vld [vmem:[%s6065_s11 + $0x38] sm:$0xff] }
 0x4ac   : > { %v5909_v45 = vpop.permute.xlu0 %5908  ;;  %4851 = vmatprep.subr.bf16.mxu1 %v4850_v43  ;;  %v3912_v43 = vsel %vm799_vm4, %v5896_v38, %v5875_v51 }
 0x4ad   : > { %v3792_v3 = vsel %vm670_vm3, %v5761_v1, %v5900_v33  ;;  %4809 = vmatpush1.bf16.msra.mxu0 %v4808_v61  ;;  %v3793_v22 = vsel %vm670_vm3, %v5900_v33, %v5901_v11  ;;  %v5911_v5 = vunpack.i.h.bf16 %v5909_v45  ;;  %v5910_v53 = vunpack.i.l.bf16 %v5909_v45 }
 0x4ae   : > { %v4812_v12 = vpack.c.bf16 %v3792_v3, %v3788_v10  ;;  %v5904_v6 = vpop.permute.xlu1 %5903  ;;  %v4810_v25 = vpack.c.bf16 %v3793_v22, %v3789_v37  ;;  %v3911_v1 = vsel %vm799_vm4, %v5865_v47, %v5866_v35  ;;  %v4816_v49 = vpack.c.bf16 %v3912_v43, %v3908_v24 }
 0x4af   : > { %v3794_v9 = vsel %vm670_vm3, %v5901_v11, %v5910_v53  ;;  %4853 = vmatpush1.bf16.msra.mxu1 %v4852_v44  ;;  %v3795_v36 = vsel %vm670_vm3, %v5910_v53, %v5911_v5  ;;  %v5906_v59 = vunpack.i.h.bf16 %v5904_v6  ;;  %v5905_v52 = vunpack.i.l.bf16 %v5904_v6  ;;  %v4080_v53 = vld [vmem:[%s6065_s11 + $0x20] sm:$0xff]  ;;  %v4082_v6 = vld [vmem:[%s6065_s11 + $0x30] sm:$0xff] }
 0x4b0   : > { %4811 = vmatprep.subr.bf16.mxu0 %v4810_v25  ;;  %v4856_v62 = vpack.c.bf16 %v3794_v9, %v3790_v15  ;;  %v5914_v26 = vpop.permute.xlu0 %5913  ;;  %v4854_v57 = vpack.c.bf16 %v3795_v36, %v3791_v48  ;;  %v4858_v54 = vpack.c.bf16 %v3915_v19, %v3911_v1  ;;  %v3910_v44 = vsel %vm799_vm4, %v8404_v39, %v5865_v47  ;;  %v4081_v25 = vld [vmem:[%s6065_s11 + $0x28] sm:$0xff]  ;;  %v4088_v39 = vld [vmem:[%s6065_s11 + $0x60] sm:$0xff] }
 0x4b1   : > { %4813 = vmatpush1.bf16.msra.mxu0 %v4812_v12  ;;  %v5915_v51 = vunpack.i.l.bf16 %v5914_v26  ;;  %v5916_v55 = vunpack.i.h.bf16 %v5914_v26  ;;  %v3917_v21 = vsel %vm799_vm4, %v5905_v52, %v5906_v59  ;;  %v4860_v42 = vpack.c.bf16 %v3914_v28, %v3910_v44  ;;  %v4085_v26 = vld [vmem:[%s6065_s11 + $0x48] sm:$0xff]  ;;  %v4090_v44 = vld [vmem:[%s6065_s11 + $0x70] sm:$0xff] }
 0x4b2   : > { %v5919_v60 = vpop.permute.xlu1 %5918  ;;  %4815 = vmatprep.subr.bf16.mxu0 %v4814_v46  ;;  %4855 = vmatprep.subr.bf16.mxu1 %v4854_v57  ;;  %v4087_v57 = vld [vmem:[%s6065_s11 + $0x58] sm:$0xff] }
 0x4b3   : > { %v5921_v56 = vunpack.i.h.bf16 %v5919_v60  ;;  %v5920_v13 = vunpack.i.l.bf16 %v5919_v60  ;;  %4857 = vmatpush1.bf16.msra.mxu1 %v4856_v62  ;;  %v3918_v0 = vsel %vm799_vm4, %v5906_v59, %v5915_v51  ;;  %v3919_v47 = vsel %vm799_vm4, %v5915_v51, %v5916_v55  ;;  %v4084_v59 = vld [vmem:[%s6065_s11 + $0x40] sm:$0xff] }
 0x4b4   : > { %v5924_v61 = vpop.permute.xlu0 %5923  ;;  %4859 = vmatprep.subr.bf16.mxu1 %v4858_v54 }
 0x4b5   : > { %4817 = vmatpush1.bf16.msra.mxu0 %v4816_v49  ;;  %v3921_v32 = vsel %vm799_vm4, %v5920_v13, %v5921_v56  ;;  %v5926_v34 = vunpack.i.h.bf16 %v5924_v61  ;;  %v5925_v40 = vunpack.i.l.bf16 %v5924_v61  ;;  %v4089_v61 = vld [vmem:[%s6065_s11 + $0x68] sm:$0xff] }
 0x4b6   : > { %v5929_v10 = vpop.permute.xlu1 %5928  ;;  %v4818_v35 = vpack.c.bf16 %v3921_v32, %v3917_v21  ;;  %v4091_v21 = vld [vmem:[%s6065_s11 + $0x78] sm:$0xff] }
 0x4b7   : > { %v5931_v7 = vunpack.i.h.bf16 %v5929_v10  ;;  %v5930_v30 = vunpack.i.l.bf16 %v5929_v10  ;;  %v3922_v17 = vsel %vm799_vm4, %v5921_v56, %v5925_v40  ;;  %4861 = vmatpush1.bf16.msra.mxu1 %v4860_v42  ;;  %v3923_v23 = vsel %vm799_vm4, %v5925_v40, %v5926_v34 }
 0x4b8   : > { %4819 = vmatprep.subr.bf16.mxu0 %v4818_v35  ;;  %v4864_v11 = vpack.c.bf16 %v3922_v17, %v3918_v0  ;;  %v4862_v38 = vpack.c.bf16 %v3923_v23, %v3919_v47 }
 0x4b9   : > { %v3916_v33 = vsel %vm799_vm4, %v5930_v30, %v5905_v52  ;;  %v3920_v15 = vsel %vm799_vm4, %v5931_v7, %v5920_v13  ;;  %v4086_v52 = vld [vmem:[%s6065_s11 + $0x50] sm:$0xff] }
 0x4ba   : > { %v4820_v37 = vpack.c.bf16 %v3920_v15, %v3916_v33  ;;  %4863 = vmatprep.subr.bf16.mxu1 %v4862_v38 }
 0x4bb   : > { %4865 = vmatpush1.bf16.msra.mxu1 %v4864_v11 }
 0x4bc   : > { %4821 = vmatpush1.bf16.msra.mxu0 %v4820_v37  ;;  %4868 = vmatprep.subr.msk.bf16.mxu1 %vm7655_vm11, %v7762_v20  ;;  %v4076_v20 = vld [vmem:[%s6065_s11] sm:$0xff] }
 0x4bd   : > { %4824 = vmatprep.subr.msk.bf16.mxu0 %vm7662_vm12, %v7758_v31  ;;  %v3994_v31 = vld [vmem:[%s8154_s4 + $0x30] sm:$0xff] }
 0x4bf   : > { %4871 = vmatpush1.bf16.msk.msra.mxu1 %vm7672_vm13, %v7752_v2  ;;  %v3995_v2 = vld [vmem:[%s8154_s4 + $0x38] sm:$0xff] }
 0x4c0   : > { %4827 = vmatpush1.bf16.msk.msra.mxu0 %vm7682_vm14, %v7748_v8  ;;  %4874 = vmatprep.subr.msk.bf16.mxu1 %vm7655_vm11, %v7788_v58  ;;  %v3988_v8 = vld [vmem:[%s8154_s4] sm:$0xff]  ;;  %v4079_v58 = vld [vmem:[%s6065_s11 + $0x18] sm:$0xff] }
 0x4c1   : > { %4830 = vmatprep.subr.msk.bf16.mxu0 %vm7662_vm12, %v7793_v41 }
 0x4c3   : > { %4877 = vmatpush1.bf16.msk.msra.mxu1 %vm7672_vm13, %v7782_v50  ;;  %v4077_v50 = vld [vmem:[%s6065_s11 + $0x8] sm:$0xff] }
 0x4c4   : > { %4833 = vmatpush1.bf16.msk.msra.mxu0 %vm7682_vm14, %v7778_v29  ;;  %v4078_v29 = vld [vmem:[%s6065_s11 + $0x10] sm:$0xff] }
 0x4c6   : > { %4258 = vmatmul.mubr.f32.vlgmr.msra.gmra.mrb[16].mxu1 %v3988_v8 }
 0x4c7   : > { %4169 = vmatmul.mubr.f32.vlgmr.msra.gmra.mrb[16].mxu0 %v3988_v8  ;;  %4452 = vmatprep.mubr.msk.f32.mxu1 %vm968_vm0, %v3991_v16 }
 0x4c8   : > { %4448 = vmatprep.mubr.msk.f32.mxu0 %vm968_vm0, %v3991_v16 }
 0x4ca   : > { %4264 = vmatmul.mubr.f32.gmra.mrb[18].mxu1 %v3990_v63 }
 0x4cb   : > { %4175 = vmatmul.mubr.f32.gmra.mrb[18].mxu0 %v3990_v63  ;;  %4453 = vmatprep.mubr.msk.f32.mxu1 %vm968_vm0, %v3993_v27 }
 0x4cc   : > { %4449 = vmatprep.mubr.msk.f32.mxu0 %vm968_vm0, %v3993_v27 }
 0x4ce   : > { %4270 = vmatmul.mubr.f32.gmra.mrb[20].mxu1 %v3992_v4 }
 0x4cf   : > { %4181 = vmatmul.mubr.f32.gmra.mrb[20].mxu0 %v3992_v4  ;;  %4454 = vmatprep.mubr.msk.f32.mxu1 %vm968_vm0, %v3995_v2 }
 0x4d0   : > { %4450 = vmatprep.mubr.msk.f32.mxu0 %vm968_vm0, %v3995_v2 }
 0x4d2   : > { %4276 = vmatmul.mubr.f32.gmra.mrb[22].mxu1 %v3994_v31 }
 0x4d3   : > { %4187 = vmatmul.mubr.f32.gmra.mrb[22].mxu0 %v3994_v31 }
 0x599   : > { %v4259_v14 = vpop.f32.mrb[16].mxu1 }
 0x59a   : > { %v4170_v41 = vpop.f32.mrb[16].mxu0  ;;  %v4260_v22 = vadd.f32 %v4259_v14, %v4078_v29  ;;  %v4261_v48 = vpop.f32.mrb[17].mxu1 }
 0x59b   : > { %v4171_v3 = vadd.f32 %v4170_v41, %v4076_v20  ;;  %v4172_v45 = vpop.f32.mrb[17].mxu0  ;;  %v4262_v5 = vadd.f32 %v4261_v48, %v4079_v58 }
 0x59c   : > { %v4173_v12 = vadd.f32 %v4172_v45, %v4077_v50  ;;  %4284 = vst [vmem:[%s8090_s24 + $0x10] sm:$0xff] %v4260_v22 }
 0x59d   : > { %4282 = vst [vmem:[%s8090_s24] sm:$0xff] %v4171_v3  ;;  %4285 = vst [vmem:[%s8090_s24 + $0x18] sm:$0xff] %v4262_v5  ;;  %v4265_v46 = vpop.f32.mrb[18].mxu1 }
 0x59e   : > { %4283 = vst [vmem:[%s8090_s24 + $0x8] sm:$0xff] %v4173_v12  ;;  %v4176_v24 = vpop.f32.mrb[18].mxu0  ;;  %v4266_v43 = vadd.f32 %v4265_v46, %v4082_v6  ;;  %v4267_v9 = vpop.f32.mrb[19].mxu1 }
 0x59f   : > { %v4177_v1 = vadd.f32 %v4176_v24, %v4080_v53  ;;  %v4178_v19 = vpop.f32.mrb[19].mxu0  ;;  %v4268_v62 = vadd.f32 %v4267_v9, %v4083_v18 }
 0x5a0   : > { %v4179_v36 = vadd.f32 %v4178_v19, %v4081_v25  ;;  %4288 = vst [vmem:[%s8090_s24 + $0x30] sm:$0xff] %v4266_v43 }
 0x5a1   : > { %4286 = vst [vmem:[%s8090_s24 + $0x20] sm:$0xff] %v4177_v1  ;;  %4289 = vst [vmem:[%s8090_s24 + $0x38] sm:$0xff] %v4268_v62  ;;  %v4271_v60 = vpop.f32.mrb[20].mxu1 }
 0x5a2   : > { %4287 = vst [vmem:[%s8090_s24 + $0x28] sm:$0xff] %v4179_v36  ;;  %v4182_v28 = vpop.f32.mrb[20].mxu0  ;;  %v4272_v51 = vadd.f32 %v4271_v60, %v4086_v52  ;;  %v4273_v56 = vpop.f32.mrb[21].mxu1 }
 0x5a3   : > { %v4183_v54 = vadd.f32 %v4182_v28, %v4084_v59  ;;  %v4184_v49 = vpop.f32.mrb[21].mxu0  ;;  %v4274_v55 = vadd.f32 %v4273_v56, %v4087_v57  ;;  %v4324_v47 = vld [vmem:[%s8090_s24 + $0x10] sm:$0xff] (%p6031_p5) }
 0x5a4   : > { %v4185_v13 = vadd.f32 %v4184_v49, %v4085_v26  ;;  %4292 = vst [vmem:[%s8090_s24 + $0x50] sm:$0xff] %v4272_v51  ;;  %4304 = sbr.rel (!%p6031_p5) target bundleno = 1459 (0x5b3), region = 67  ;;  %v4320_v30 = vld [vmem:[%s8090_s24] sm:$0xff] (%p6031_p5)  ;;  %v4326_v23 = vld [vmem:[%s8090_s24 + $0x18] sm:$0xff] (%p6031_p5)  ;;  %4325 = vst [vmem:[%s4307_s12 + $0x10] sm:$0xff] (%p6031_p5), %v4324_v47 }
 0x5a5   : > { %4290 = vst [vmem:[%s8090_s24 + $0x40] sm:$0xff] %v4183_v54  ;;  %4293 = vst [vmem:[%s8090_s24 + $0x58] sm:$0xff] %v4274_v55  ;;  %v4277_v42 = vpop.f32.mrb[22].mxu1  ;;  %v4322_v17 = vld [vmem:[%s8090_s24 + $0x8] sm:$0xff] (%p6031_p5) }
 0x5a6   : > { %4291 = vst [vmem:[%s8090_s24 + $0x48] sm:$0xff] %v4185_v13  ;;  %v4188_v32 = vpop.f32.mrb[22].mxu0  ;;  %v4278_v10 = vadd.f32 %v4277_v42, %v4090_v44  ;;  %v4279_v35 = vpop.f32.mrb[23].mxu1  ;;  %4321 = vst [vmem:[%s4307_s12] sm:$0xff] (%p6031_p5), %v4320_v30 }
 0x5a7   : > { %v4189_v34 = vadd.f32 %v4188_v32, %v4088_v39  ;;  %v4190_v40 = vpop.f32.mrb[23].mxu0  ;;  %v4280_v7 = vadd.f32 %v4279_v35, %v4091_v21  ;;  %4323 = vst [vmem:[%s4307_s12 + $0x8] sm:$0xff] (%p6031_p5), %v4322_v17  ;;  %4327 = vst [vmem:[%s4307_s12 + $0x18] sm:$0xff] (%p6031_p5), %v4326_v23  ;;  %v4332_v15 = vld [vmem:[%s8090_s24 + $0x30] sm:$0xff] (%p6031_p5) }
 0x5a8   : > { %v4191_v0 = vadd.f32 %v4190_v40, %v4089_v61  ;;  %4296 = vst [vmem:[%s8090_s24 + $0x70] sm:$0xff] %v4278_v10  ;;  %v4328_v11 = vld [vmem:[%s8090_s24 + $0x20] sm:$0xff] (%p6031_p5)  ;;  %v4334_v38 = vld [vmem:[%s8090_s24 + $0x38] sm:$0xff] (%p6031_p5)  ;;  %4333 = vst [vmem:[%s4307_s12 + $0x50] sm:$0xff] (%p6031_p5), %v4332_v15 }
 0x5a9   : > { %4294 = vst [vmem:[%s8090_s24 + $0x60] sm:$0xff] %v4189_v34  ;;  %4297 = vst [vmem:[%s8090_s24 + $0x78] sm:$0xff] %v4280_v7  ;;  %v4330_v33 = vld [vmem:[%s8090_s24 + $0x28] sm:$0xff] (%p6031_p5) }
 0x5aa   : > { %4295 = vst [vmem:[%s8090_s24 + $0x68] sm:$0xff] %v4191_v0  ;;  %4329 = vst [vmem:[%s4307_s12 + $0x40] sm:$0xff] (%p6031_p5), %v4328_v11 }
 0x5ab   : > { %4331 = vst [vmem:[%s4307_s12 + $0x48] sm:$0xff] %v4330_v33  ;;  %4335 = vst [vmem:[%s4307_s12 + $0x58] sm:$0xff] %v4334_v38  ;;  %v4340_v16 = vld [vmem:[%s8090_s24 + $0x50] sm:$0xff] }
 0x5ac   : > { %v4336_v37 = vld [vmem:[%s8090_s24 + $0x40] sm:$0xff]  ;;  %v4342_v63 = vld [vmem:[%s8090_s24 + $0x58] sm:$0xff]  ;;  %4341 = vst [vmem:[%s4307_s12 + $0x90] sm:$0xff] %v4340_v16 }
 0x5ad   : > { %4337 = vst [vmem:[%s4307_s12 + $0x80] sm:$0xff] %v4336_v37  ;;  %v4338_v8 = vld [vmem:[%s8090_s24 + $0x48] sm:$0xff]  ;;  %4343 = vst [vmem:[%s4307_s12 + $0x98] sm:$0xff] %v4342_v63 }
 0x5ae   : > { %4339 = vst [vmem:[%s4307_s12 + $0x88] sm:$0xff] %v4338_v8 }
 0x5af   : > { %v4348_v2 = vld [vmem:[%s8090_s24 + $0x70] sm:$0xff] }
 0x5b0   : > { %v4344_v27 = vld [vmem:[%s8090_s24 + $0x60] sm:$0xff]  ;;  %4349 = vst [vmem:[%s4307_s12 + $0xd0] sm:$0xff] %v4348_v2  ;;  %v4350_v31 = vld [vmem:[%s8090_s24 + $0x78] sm:$0xff] }
 0x5b1   : > { %v4346_v4 = vld [vmem:[%s8090_s24 + $0x68] sm:$0xff]  ;;  %4345 = vst [vmem:[%s4307_s12 + $0xc0] sm:$0xff] %v4344_v27  ;;  %4351 = vst [vmem:[%s4307_s12 + $0xd8] sm:$0xff] %v4350_v31 }
 0x5b2   : > { %4347 = vst [vmem:[%s4307_s12 + $0xc8] sm:$0xff] %v4346_v4 }
 0x5b3 PF: > { %p12_p11 = scmp.ge.s32.totalorder %s6019_s22, 4   ;;  %s8405_s18 = smov %s5950_s19 }
 0x5b4   : > { %s8406_s19 = smov %s6029_s25  ;;  %s8407_s20 = smov %s6019_s22 }
 0x5b5   :  { %14 = sbr.rel (!%p12_p11) target bundleno = 2 (0x2), region = 124 }

</bundles_post_ra>
